<compile_context>
chip_gen: v7x
topology: tpu7x:2x2x1
jax: 0.10.0
libtpu: 0.0.40
codegen_flags: <defaults>
</compile_context>

<pallas_src>
import functools

import jax
import jax.numpy as jnp
from jax.experimental import pallas as pl
from jax.experimental.pallas import tpu as pltpu

# ---------------- Model hyper-parameters (small, deterministic) -------------
IN_FEATURES = 1956     # fixed by the module: nn.Linear(1956, dim)
K_PAD       = 2048     # contraction dim zero-padded to an MXU-aligned size
DIM         = 128      # hidden width ("dim" arg)
DNN_LAYERS  = 2        # number of Dropout/Linear/ReLU blocks

# ---------------- Batch tiling ------------------------------------------------
BATCH  = 512           # total rows processed per call
TILE_B = 256           # rows per grid step (multiple of 256 -> full MXU passes)


# ------------------------------ Pallas kernel -------------------------------
def mlp_kernel(x_ref, w0_ref, b0_ref, wh_ref, bh_ref, wl_ref, bl_ref, o_ref,
               *, dnn_layers):
    # x_ref : (TILE_B, K_PAD) f32  (columns >= IN_FEATURES are zero)
    # w0_ref: (K_PAD, DIM) bf16    (rows   >= IN_FEATURES are zero)
    # b0_ref: (1, DIM) f32
    # wh_ref: (L, DIM, DIM) bf16   bh_ref: (L, 1, DIM) f32
    # wl_ref: (1, DIM) f32         bl_ref: (1, 1) f32
    # o_ref : (TILE_B, 1) f32      (batch stays on sublanes, no relayout)
    x = x_ref[...].astype(jnp.bfloat16)    # bf16 MXU operand, f32 accumulation

    # 'begin' Linear(1956, dim) — no activation after it in the reference.
    h = jnp.dot(x, w0_ref[...], preferred_element_type=jnp.float32) + b0_ref[...]

    # dnn_layers x [Dropout (identity in eval), Linear(dim, dim), ReLU]
    for i in range(dnn_layers):
        h = jnp.dot(h.astype(jnp.bfloat16), wh_ref[i],
                    preferred_element_type=jnp.float32) + bh_ref[i]
        h = jnp.maximum(h, 0.0)

    # 'last' Linear(dim, 1): N=1 matmul off the MXU — VPU elementwise multiply
    # + XLU lane reduce; written as a (TILE_B, 1) column (batch on sublanes).
    s = jnp.sum(h * wl_ref[...], axis=-1, keepdims=True)      # (TILE_B, 1)
    o_ref[...] = (s + bl_ref[...]).astype(o_ref.dtype)


# ------------------------------- Host wrapper --------------------------------
def neural_net_forward(x, params):
    """x: (B, 1956) or K-padded (B, 2048) float32 -> (B,) float32 logits."""
    w0, b0, wh, bh, wl, bl = params

    if x.shape[1] == IN_FEATURES:
        # TODO(synk): fold this zero-pad into the producer of x; done here only
        #             so the wrapper also accepts the raw (B, 1956) layout.
        x = jnp.pad(x, ((0, 0), (0, K_PAD - IN_FEATURES)))
    assert x.shape[1] == K_PAD

    B = x.shape[0]
    assert B % TILE_B == 0, "BATCH must be a multiple of TILE_B"
    n_tiles = B // TILE_B

    kernel = functools.partial(mlp_kernel, dnn_layers=DNN_LAYERS)

    nbytes = lambda a: a.size * a.dtype.itemsize
    flops = 2 * B * (K_PAD * DIM + DNN_LAYERS * DIM * DIM + DIM)
    bytes_accessed = (nbytes(x) + nbytes(w0) + nbytes(b0) + nbytes(wh)
                      + nbytes(bh) + nbytes(wl) + nbytes(bl) + B * 4)

    out = pl.pallas_call(
        kernel,
        out_shape=jax.ShapeDtypeStruct((B, 1), jnp.float32),
        grid_spec=pltpu.PrefetchScalarGridSpec(
            num_scalar_prefetch=0,
            grid=(n_tiles,),  # batch-tiled; weights stay VMEM-resident
            in_specs=[
                pl.BlockSpec((TILE_B, K_PAD),        lambda i: (i, 0)),
                pl.BlockSpec((K_PAD, DIM),           lambda i: (0, 0)),
                pl.BlockSpec((1, DIM),               lambda i: (0, 0)),
                pl.BlockSpec((DNN_LAYERS, DIM, DIM), lambda i: (0, 0, 0)),
                pl.BlockSpec((DNN_LAYERS, 1, DIM),   lambda i: (0, 0, 0)),
                pl.BlockSpec((1, DIM),               lambda i: (0, 0)),
                pl.BlockSpec((1, 1),                 lambda i: (0, 0)),
            ],
            out_specs=pl.BlockSpec((TILE_B, 1), lambda i: (i, 0)),
        ),
        compiler_params=pltpu.CompilerParams(
            dimension_semantics=("parallel",)),   # v7x: split tiles across TCs
        cost_estimate=pl.CostEstimate(
            flops=flops, transcendentals=0, bytes_accessed=bytes_accessed),
    )(x, w0, b0, wh, bh, wl, bl)

    return out[:, 0]  # (B, 1) -> (B,)   (== .squeeze(1))


def init_params(key):
    """Deterministic parameter init (PyTorch-Linear-style uniform bounds).

    Returns (f32 unpadded reference params,
             kernel params with K-padded bf16 matmul weights).
    """
    ks = jax.random.split(key, 3)

    def lin_init(k, fan_in, fan_out):
        kw, kb = jax.random.split(k)
        bound = 1.0 / jnp.sqrt(fan_in)
        w = jax.random.uniform(kw, (fan_in, fan_out), jnp.float32, -bound, bound)
        b = jax.random.uniform(kb, (fan_out,), jnp.float32, -bound, bound)
        return w, b

    w0, b0 = lin_init(ks[0], IN_FEATURES, DIM)
    b0 = b0.reshape(1, DIM)
    # Zero-pad the contraction dim once at init: rows >= IN_FEATURES are zero.
    w0_pad = jnp.pad(w0, ((0, K_PAD - IN_FEATURES), (0, 0)))

    wh_list, bh_list = [], []
    hk = jax.random.split(ks[1], DNN_LAYERS)
    for i in range(DNN_LAYERS):
        w, b = lin_init(hk[i], DIM, DIM)
        wh_list.append(w)
        bh_list.append(b.reshape(1, DIM))
    wh = jnp.stack(wh_list, axis=0)            # (L, DIM, DIM)
    bh = jnp.stack(bh_list, axis=0)            # (L, 1, DIM)

    wl, bl = lin_init(ks[2], DIM, 1)
    wl = wl.reshape(1, DIM)                    # stored as a row for the VPU reduce
    bl = bl.reshape(1, 1)

    params_f32 = (w0, b0, wh, bh, wl, bl)
    params_kernel = (w0_pad.astype(jnp.bfloat16), b0,
                     wh.astype(jnp.bfloat16), bh,
                     wl, bl)
    return params_f32, params_kernel


def reference_forward(x, params):
    """Pure-JAX f32 reference (unpadded) for correctness check."""
    w0, b0, wh, bh, wl, bl = params
    h = x @ w0 + b0
    for i in range(DNN_LAYERS):
        h = jnp.maximum(h @ wh[i] + bh[i], 0.0)
    return (h @ wl.T + bl)[:, 0]


if __name__ == "__main__":
    key = jax.random.PRNGKey(0)
    kx, kp = jax.random.split(key)
    x = jax.random.normal(kx, (BATCH, IN_FEATURES), dtype=jnp.float32)
    params_f32, params_kernel = init_params(kp)

    # Pad the contraction dim once, outside the forward call (in a real
    # pipeline this would be fused into the producer of x).
    x_pad = jnp.pad(x, ((0, 0), (0, K_PAD - IN_FEATURES)))

    y = neural_net_forward(x_pad, params_kernel)
    y = jax.block_until_ready(y)
    assert y.shape == (BATCH,)

    # Tight check: f32-math reference using the same bf16-rounded weights the
    # kernel sees (isolates kernel correctness from the quantization choice).
    w0k, b0k, whk, bhk, wlk, blk = params_kernel
    params_dequant = (w0k[:IN_FEATURES].astype(jnp.float32), b0k,
                      whk.astype(jnp.float32), bhk, wlk, blk)
    y_ref_q = reference_forward(x, params_dequant)
    assert jnp.allclose(y, y_ref_q, atol=3e-2, rtol=3e-2), \
        "mismatch vs bf16-weight reference"

    # Loose sanity check against the full-f32 model (bf16 weights/x with f32
    # accumulation over K=1956 lose ~2-3 decimal digits vs the f32 reference).
    y_ref = reference_forward(x, params_f32)
    assert jnp.allclose(y, y_ref, atol=1e-1, rtol=1e-1), \
        "mismatch vs f32 reference"

    print("KERNEL_OK")
</pallas_src>

<mosaic_0001>
module attributes {stable_mosaic.version = 11 : i64} {
  func.func @mlp_kernel(%arg0: i32, %arg1: memref<256x2048xf32, #tpu.memory_space<vmem>>, %arg2: memref<2048x128xbf16, #tpu.memory_space<vmem>>, %arg3: memref<1x128xf32, #tpu.memory_space<vmem>>, %arg4: memref<2x128x128xbf16, #tpu.memory_space<vmem>>, %arg5: memref<2x1x128xf32, #tpu.memory_space<vmem>>, %arg6: memref<1x128xf32, #tpu.memory_space<vmem>>, %arg7: memref<1x1xf32, #tpu.memory_space<vmem>>, %arg8: memref<256x1xf32, #tpu.memory_space<vmem>>) attributes {dimension_semantics = [#tpu.dimension_semantics<parallel>], iteration_bounds = array<i64: 2>, scalar_prefetch = 0 : i64, scratch_operands = 0 : i64, tpu.core_type = #tpu.core_type<tc>, window_params = [{transform_indices = @transform_0, window_bounds = array<i64: 256, 2048>}, {pipeline_mode = #tpu.pipeline_mode<synchronous>, transform_indices = @transform_1, window_bounds = array<i64: 2048, 128>}, {pipeline_mode = #tpu.pipeline_mode<synchronous>, transform_indices = @transform_2, window_bounds = array<i64: 1, 128>}, {pipeline_mode = #tpu.pipeline_mode<synchronous>, transform_indices = @transform_3, window_bounds = array<i64: 2, 128, 128>}, {pipeline_mode = #tpu.pipeline_mode<synchronous>, transform_indices = @transform_4, window_bounds = array<i64: 2, 1, 128>}, {pipeline_mode = #tpu.pipeline_mode<synchronous>, transform_indices = @transform_5, window_bounds = array<i64: 1, 128>}, {pipeline_mode = #tpu.pipeline_mode<synchronous>, transform_indices = @transform_6, window_bounds = array<i64: 1, 1>}, {transform_indices = @transform_7, window_bounds = array<i64: 256, 1>}]} {
    %c0 = arith.constant 0 : index
    %c0_0 = arith.constant 0 : index
    %0 = vector.load %arg1[%c0, %c0_0] : memref<256x2048xf32, #tpu.memory_space<vmem>>, vector<256x2048xf32>
    %1 = arith.truncf %0 : vector<256x2048xf32> to vector<256x2048xbf16>
    %c0_1 = arith.constant 0 : index
    %c0_2 = arith.constant 0 : index
    %2 = vector.load %arg2[%c0_1, %c0_2] : memref<2048x128xbf16, #tpu.memory_space<vmem>>, vector<2048x128xbf16>
    %cst = arith.constant dense<0.000000e+00> : vector<256x128xf32>
    %3 = tpu.matmul %1, %2, %cst {dimension_numbers = #tpu.dot_dimension_numbers<[1], [0], [0], [1], [0, 0, 1, 1], [], []>} : vector<256x2048xbf16>, vector<2048x128xbf16>, vector<256x128xf32> -> vector<256x128xf32>
    %c0_3 = arith.constant 0 : index
    %c0_4 = arith.constant 0 : index
    %4 = vector.load %arg3[%c0_3, %c0_4] : memref<1x128xf32, #tpu.memory_space<vmem>>, vector<1x128xf32>
    %5 = vector.broadcast %4 : vector<1x128xf32> to vector<256x128xf32>
    %6 = arith.addf %3, %5 : vector<256x128xf32>
    %7 = arith.truncf %6 : vector<256x128xf32> to vector<256x128xbf16>
    %c0_5 = arith.constant 0 : index
    %c0_6 = arith.constant 0 : index
    %c0_7 = arith.constant 0 : index
    %8 = vector.load %arg4[%c0_5, %c0_6, %c0_7] : memref<2x128x128xbf16, #tpu.memory_space<vmem>>, vector<1x128x128xbf16>
    %9 = vector.shape_cast %8 : vector<1x128x128xbf16> to vector<128x128xbf16>
    %cst_8 = arith.constant dense<0.000000e+00> : vector<256x128xf32>
    %10 = tpu.matmul %7, %9, %cst_8 {dimension_numbers = #tpu.dot_dimension_numbers<[1], [0], [0], [1], [0, 0, 1, 1], [], []>} : vector<256x128xbf16>, vector<128x128xbf16>, vector<256x128xf32> -> vector<256x128xf32>
    %c0_9 = arith.constant 0 : index
    %c0_10 = arith.constant 0 : index
    %c0_11 = arith.constant 0 : index
    %11 = vector.load %arg5[%c0_9, %c0_10, %c0_11] : memref<2x1x128xf32, #tpu.memory_space<vmem>>, vector<1x1x128xf32>
    %12 = vector.shape_cast %11 : vector<1x1x128xf32> to vector<1x128xf32>
    %13 = vector.broadcast %12 : vector<1x128xf32> to vector<256x128xf32>
    %14 = arith.addf %10, %13 : vector<256x128xf32>
    %cst_12 = arith.constant 0.000000e+00 : f32
    %15 = vector.broadcast %cst_12 : f32 to vector<256x128xf32>
    %16 = arith.maximumf %14, %15 : vector<256x128xf32>
    %17 = arith.truncf %16 : vector<256x128xf32> to vector<256x128xbf16>
    %c1 = arith.constant 1 : index
    %c0_13 = arith.constant 0 : index
    %c0_14 = arith.constant 0 : index
    %18 = vector.load %arg4[%c1, %c0_13, %c0_14] : memref<2x128x128xbf16, #tpu.memory_space<vmem>>, vector<1x128x128xbf16>
    %19 = vector.shape_cast %18 : vector<1x128x128xbf16> to vector<128x128xbf16>
    %cst_15 = arith.constant dense<0.000000e+00> : vector<256x128xf32>
    %20 = tpu.matmul %17, %19, %cst_15 {dimension_numbers = #tpu.dot_dimension_numbers<[1], [0], [0], [1], [0, 0, 1, 1], [], []>} : vector<256x128xbf16>, vector<128x128xbf16>, vector<256x128xf32> -> vector<256x128xf32>
    %c1_16 = arith.constant 1 : index
    %c0_17 = arith.constant 0 : index
    %c0_18 = arith.constant 0 : index
    %21 = vector.load %arg5[%c1_16, %c0_17, %c0_18] : memref<2x1x128xf32, #tpu.memory_space<vmem>>, vector<1x1x128xf32>
    %22 = vector.shape_cast %21 : vector<1x1x128xf32> to vector<1x128xf32>
    %23 = vector.broadcast %22 : vector<1x128xf32> to vector<256x128xf32>
    %24 = arith.addf %20, %23 : vector<256x128xf32>
    %cst_19 = arith.constant 0.000000e+00 : f32
    %25 = vector.broadcast %cst_19 : f32 to vector<256x128xf32>
    %26 = arith.maximumf %24, %25 : vector<256x128xf32>
    %c0_20 = arith.constant 0 : index
    %c0_21 = arith.constant 0 : index
    %27 = vector.load %arg6[%c0_20, %c0_21] : memref<1x128xf32, #tpu.memory_space<vmem>>, vector<1x128xf32>
    %28 = vector.broadcast %27 : vector<1x128xf32> to vector<256x128xf32>
    %29 = arith.mulf %26, %28 : vector<256x128xf32>
    %cst_22 = arith.constant dense<0.000000e+00> : vector<256xf32>
    %30 = vector.multi_reduction <add>, %29, %cst_22 [1] : vector<256x128xf32> to vector<256xf32>
    %31 = vector.shape_cast %30 : vector<256xf32> to vector<256x1xf32>
    %c0_23 = arith.constant 0 : index
    %c0_24 = arith.constant 0 : index
    %32 = vector.load %arg7[%c0_23, %c0_24] : memref<1x1xf32, #tpu.memory_space<vmem>>, vector<1x1xf32>
    %33 = vector.broadcast %32 : vector<1x1xf32> to vector<256x1xf32>
    %34 = arith.addf %31, %33 : vector<256x1xf32>
    %c0_25 = arith.constant 0 : index
    %c0_26 = arith.constant 0 : index
    %35 = vector.load %arg8[%c0_25, %c0_26] : memref<256x1xf32, #tpu.memory_space<vmem>>, vector<256x1xf32>
    tpu.vector_store %arg8[%c0_25, %c0_26], %34 {strides = array<i32>} : memref<256x1xf32, #tpu.memory_space<vmem>>, vector<256x1xf32>,
    return
  }
  func.func @transform_0(%arg0: i32) -> (i32, i32) {
    %c0_i32 = arith.constant 0 : i32
    %c0_i32_0 = arith.constant 0 : i32
    return %arg0, %c0_i32 : i32, i32
  }
  func.func @transform_1(%arg0: i32) -> (i32, i32) {
    %c0_i32 = arith.constant 0 : i32
    %c0_i32_0 = arith.constant 0 : i32
    %c0_i32_1 = arith.constant 0 : i32
    return %c0_i32, %c0_i32_0 : i32, i32
  }
  func.func @transform_2(%arg0: i32) -> (i32, i32) {
    %c0_i32 = arith.constant 0 : i32
    %c0_i32_0 = arith.constant 0 : i32
    %c0_i32_1 = arith.constant 0 : i32
    return %c0_i32, %c0_i32_0 : i32, i32
  }
  func.func @transform_3(%arg0: i32) -> (i32, i32, i32) {
    %c0_i32 = arith.constant 0 : i32
    %c0_i32_0 = arith.constant 0 : i32
    %c0_i32_1 = arith.constant 0 : i32
    %c0_i32_2 = arith.constant 0 : i32
    return %c0_i32, %c0_i32_0, %c0_i32_1 : i32, i32, i32
  }
  func.func @transform_4(%arg0: i32) -> (i32, i32, i32) {
    %c0_i32 = arith.constant 0 : i32
    %c0_i32_0 = arith.constant 0 : i32
    %c0_i32_1 = arith.constant 0 : i32
    %c0_i32_2 = arith.constant 0 : i32
    return %c0_i32, %c0_i32_0, %c0_i32_1 : i32, i32, i32
  }
  func.func @transform_5(%arg0: i32) -> (i32, i32) {
    %c0_i32 = arith.constant 0 : i32
    %c0_i32_0 = arith.constant 0 : i32
    %c0_i32_1 = arith.constant 0 : i32
    return %c0_i32, %c0_i32_0 : i32, i32
  }
  func.func @transform_6(%arg0: i32) -> (i32, i32) {
    %c0_i32 = arith.constant 0 : i32
    %c0_i32_0 = arith.constant 0 : i32
    %c0_i32_1 = arith.constant 0 : i32
    return %c0_i32, %c0_i32_0 : i32, i32
  }
  func.func @transform_7(%arg0: i32) -> (i32, i32) {
    %c0_i32 = arith.constant 0 : i32
    %c0_i32_0 = arith.constant 0 : i32
    return %arg0, %c0_i32 : i32, i32
  }
}

</mosaic_0001>

<bundles_post_ra>
// kernel: tpu_custom_call.1
= control target key start
LH: loop header
LB: loop body
LE: loop exit
PB: predicated region body
PF: predicated region fallthrough
CT: control target
= control target key end

     0   :  { %s7334_s0 = inlined_call_operand.hbm [shape: f32[512,2048], index: 0, kind: input, shape index: {}]   ;;  %s7335_s1 = inlined_call_operand.hbm [shape: bf16[2048,128], index: 1, kind: input, shape index: {}]   ;;  %s7336_s2 = inlined_call_operand.hbm [shape: f32[1,128], index: 2, kind: input, shape index: {}]   ;;  %s7337_s3 = inlined_call_operand.hbm [shape: bf16[2,128,128], index: 3, kind: input, shape index: {}]   ;;  %s7338_s4 = inlined_call_operand.hbm [shape: f32[2,1,128], index: 4, kind: input, shape index: {}]   ;;  %s7339_s5 = inlined_call_operand.hbm [shape: f32[1,128], index: 5, kind: input, shape index: {}]   ;;  %s7340_s6 = inlined_call_operand.<no memory space> [shape: f32[1,1], index: 6, kind: input, shape index: {}]   ;;  %s7341_s7 = inlined_call_operand.vmem [shape: f32[512,1], index: 7, kind: output, shape index: {}]  }
   0x1   :  { %v12_v0 = vstv %s7340_s6 }
   0x2   :  { %13 = vst [vmem:[#allocation2] sm:$0x1] %v12_v0 }
   0x3   :  { %14 = vsyncpa [#allocation4], 0 }
   0x4   :  { %16 = vsyncpa [#allocation4 + $0x1], 0 }
   0x5   :  { %17 = vsyncpa [#allocation6], 0 }
   0x6   :  { %18 = vsyncpa [#allocation9], 0 }
   0x7   :  { %19 = vsyncpa [#allocation12], 0  ;;  %s6042_s26 = smov 0   ;;  %s6044_s27 = smov 0  }
   0x8   :  { %s6046_s28 = smov 0   ;;  %s6048_s29 = smov 0  }
   0x9 LB: > { %s5987_s6 = smov [#allocation5]   ;;  %s4313_s8 = sadd.s32 4294967295, %s5985_s29   ;;  %s5985_s29 = sphi %s6048_s29, %s7357_s29   ;;  %s5981_s28 = sphi %s6046_s28, %s7356_s28   ;;  %s5977_s27 = sphi %s6044_s27, %s7355_s27   ;;  %s5973_s26 = sphi %s6042_s26, %s7354_s26  }
   0xa   : > { %s220_s30 = sshll.u32 %s5987_s6, 4  ;;  %p4315_p0 = scmp.ge.s32.totalorder %s5985_s29, 1  ;;  %s6071_s30 = int_to_ptr.vmem [resolvable:$true] %s220_s30 }
   0xb   : > { %p6066_p1 = scmp.eq.s32.totalorder %s4313_s8, 0  ;;  %p208_p2 = scmp.lt.s32.totalorder %s5985_s29, 3 }
   0xc   : > { %s5988_s11 = smov [#allocation8]   ;;  %s5989_s14 = smov [#allocation7]  }
   0xd   : > { %s7345_s9 = scalar_select %p6066_p1, 1, 0 }
   0xe   : > { %p6073_p3 = pnand %p4315_p0, %p208_p2  ;;  %s244_s12 = sshll.u32 %s5988_s11, 4  ;;  %s6085_s12 = int_to_ptr.vmem [resolvable:$true] %s244_s12 }
   0xf   : > { %s234_s15 = sshll.u32 %s5989_s14, 4  ;;  %s5769_s18 = scalar_lea.hbm %s7335_s1, 16384  ;;  %s6087_s15 = int_to_ptr.vmem [resolvable:$true] %s234_s15 }
  0x10   : > { %s7346_s10 = scalar_select %p6073_p3, 1, 0 }
  0x11   : > { %p5550_p4 = pneg %p6073_p3  ;;  %p5770_p6 = scmp.ne.s32.totalorder %s7335_s1, %s5769_s18 }
  0x12   : > { %p5776_p10 = scmp.lt.u32.totalorder %s5769_s18, %s7335_s1 }
  0x13   : > { %p6081_p5 = pnand %p5550_p4, %p6066_p1 }
  0x15   : > { %p6097_p7 = pneg %p6081_p5 }
  0x17   : > { %p5772_p8 = pnand %p6097_p7, %p5770_p6 }
  0x19   : > { %p5773_p9 = pneg %p5772_p8 }
  0x1b   : > { %p5778_p11 = pnand %p5776_p10, %p5773_p9 }
  0x1d   : > { %5781 = shalt.err (!%p5778_p11)
}
  0x1e   : > { %s5782_s24 = scalar_lea.vmem %s6071_s30, 16384  ;;  %p5790_p2 = scmp.lt.s32.totalorder %s6071_s30, %s6071_s30 }
  0x1f   : > { %p5783_p12 = scmp.ne.s32.totalorder %s6071_s30, %s5782_s24  ;;  %p5791_p4 = scmp.lt.s32.totalorder %s5782_s24, %s5782_s24 }
  0x21   : > { %p5785_p13 = pnand %p5783_p12, %p6097_p7  ;;  %p5792_p6 = por %p5791_p4, %p5790_p2 }
  0x23   : > { %p5786_p0 = pneg %p5785_p13 }
  0x25   : > { %p5793_p8 = pnand %p5792_p6, %p5786_p0 }
  0x27   : > { %5796 = shalt.err (!%p5793_p8)
}
  0x28   : > { %s5990_s25 = smov 64   ;;  %s5991_s6 = smov 4  }
  0x29   : > { %5553 = dma.hbm_to_vmem [thread:$0]  (!%p6081_p5), %s7335_s1, 16384, %s6071_s30, [#allocation6], %s5990_s25, %s5990_s25, %s5991_s6  }
  0x2a   : > { %s5797_s18 = scalar_lea.hbm %s7337_s3, 2048 }
  0x2b   : > { %p5798_p9 = scmp.ne.s32.totalorder %s7337_s3, %s5797_s18  ;;  %p5804_p12 = scmp.lt.u32.totalorder %s5797_s18, %s7337_s3 }
  0x2d   : > { %p5800_p10 = pnand %p5798_p9, %p6097_p7 }
  0x2f   : > { %p5801_p11 = pneg %p5800_p10 }
  0x31   : > { %p5806_p13 = pnand %p5804_p12, %p5801_p11 }
  0x33   : > { %5809 = shalt.err (!%p5806_p13)
}
  0x34   : > { %s5810_s30 = scalar_lea.vmem %s6085_s12, 2048  ;;  %p5818_p6 = scmp.lt.s32.totalorder %s6085_s12, %s6085_s12 }
  0x35   : > { %p5811_p0 = scmp.ne.s32.totalorder %s6085_s12, %s5810_s30  ;;  %p5819_p8 = scmp.lt.s32.totalorder %s5810_s30, %s5810_s30 }
  0x37   : > { %p5813_p2 = pnand %p5811_p0, %p6097_p7  ;;  %p5820_p9 = por %p5819_p8, %p5818_p6 }
  0x39   : > { %p5814_p4 = pneg %p5813_p2 }
  0x3b   : > { %p5821_p10 = pnand %p5820_p9, %p5814_p4 }
  0x3d   : > { %5824 = shalt.err (!%p5821_p10)
}
  0x3e   : > { %5559 = dma.hbm_to_vmem [thread:$0]  (!%p6081_p5), %s7337_s3, 2048, %s6085_s12, [#allocation9], %s5990_s25, %s5990_s25, %s5991_s6  }
  0x3f   : > { %s5825_s17 = scalar_lea.hbm %s7336_s2, 16 }
  0x40   : > { %p5826_p11 = scmp.ne.s32.totalorder %s7336_s2, %s5825_s17  ;;  %p5832_p0 = scmp.lt.u32.totalorder %s5825_s17, %s7336_s2 }
  0x42   : > { %p5828_p12 = pnand %p5826_p11, %p6097_p7 }
  0x44   : > { %p5829_p13 = pneg %p5828_p12 }
  0x46   : > { %p5834_p2 = pnand %p5832_p0, %p5829_p13 }
  0x48   : > { %5837 = shalt.err (!%p5834_p2)
}
  0x49   : > { %s5838_s12 = scalar_lea.vmem %s6087_s15, 16  ;;  %s5845_s25 = scalar_lea.vmem %s6087_s15, 32 }
  0x4a   : > { %p5839_p4 = scmp.ne.s32.totalorder %s6087_s15, %s5838_s12  ;;  %p5846_p9 = scmp.lt.s32.totalorder %s6087_s15, %s6087_s15 }
  0x4b   : > { %p5847_p10 = scmp.lt.s32.totalorder %s5845_s25, %s5838_s12 }
  0x4c   : > { %p5841_p6 = pnand %p5839_p4, %p6097_p7 }
  0x4d   : > { %p5848_p11 = por %p5847_p10, %p5846_p9 }
  0x4e   : > { %p5842_p8 = pneg %p5841_p6 }
  0x50   : > { %p5849_p12 = pnand %p5848_p11, %p5842_p8 }
  0x52   : > { %5852 = shalt.err (!%p5849_p12)
}
  0x53   : > { %5556 = dma.hbm_to_vmem [thread:$0]  (!%p6081_p5), %s7336_s2, 16, %s6087_s15, [#allocation6]  }
  0x54   : > { %s5992_s30 = smov [#allocation10]   ;;  %s5853_s16 = scalar_lea.hbm %s7338_s4, 32 }
  0x55   : > { %s257_s24 = sshll.u32 %s5992_s30, 4  ;;  %p5854_p13 = scmp.ne.s32.totalorder %s7338_s4, %s5853_s16  ;;  %s258_s24 = int_to_ptr.vmem [resolvable:$true] %s257_s24 }
  0x56   : > { %p5860_p4 = scmp.lt.u32.totalorder %s5853_s16, %s7338_s4 }
  0x57   : > { %p5856_p0 = pnand %p5854_p13, %p6097_p7 }
  0x59   : > { %p5857_p2 = pneg %p5856_p0 }
  0x5b   : > { %p5862_p6 = pnand %p5860_p4, %p5857_p2 }
  0x5d   : > { %5865 = shalt.err (!%p5862_p6)
}
  0x5e   : > { %s5866_s15 = scalar_lea.vmem %s258_s24, 32  ;;  %p5874_p11 = scmp.lt.s32.totalorder %s258_s24, %s258_s24 }
  0x5f   : > { %p5867_p8 = scmp.ne.s32.totalorder %s258_s24, %s5866_s15  ;;  %p5875_p12 = scmp.lt.s32.totalorder %s5866_s15, %s5866_s15 }
  0x61   : > { %p5869_p9 = pnand %p5867_p8, %p6097_p7  ;;  %p5876_p3 = por %p5875_p12, %p5874_p11 }
  0x63   : > { %p5870_p10 = pneg %p5869_p9 }
  0x65   : > { %p5877_p1 = pnand %p5876_p3, %p5870_p10 }
  0x67   : > { %5880 = shalt.err (!%p5877_p1)
}
  0x68   : > { %s5993_s22 = smov 16   ;;  %s5994_s12 = smov 1  }
  0x69   : > { %5562 = dma.hbm_to_vmem [thread:$0]  (!%p6081_p5), %s7338_s4, 32, %s258_s24, [#allocation9], %s5993_s22, %s5993_s22, %s5994_s12  }
  0x6a   : > { %s5995_s23 = smov [#allocation11]   ;;  %s5881_s16 = scalar_lea.hbm %s7339_s5, 16 }
  0x6b   : > { %s271_s30 = sshll.u32 %s5995_s23, 4  ;;  %p5882_p1 = scmp.ne.s32.totalorder %s7339_s5, %s5881_s16  ;;  %s272_s30 = int_to_ptr.vmem [resolvable:$true] %s271_s30 }
  0x6c   : > { %p5888_p0 = scmp.lt.u32.totalorder %s5881_s16, %s7339_s5 }
  0x6d   : > { %p5884_p3 = pnand %p5882_p1, %p6097_p7 }
  0x6f   : > { %p5885_p13 = pneg %p5884_p3 }
  0x71   : > { %p5890_p2 = pnand %p5888_p0, %p5885_p13 }
  0x73   : > { %5893 = shalt.err (!%p5890_p2)
}
  0x74   : > { %s5894_s24 = scalar_lea.vmem %s272_s30, 16  ;;  %s5901_s15 = scalar_lea.vmem %s272_s30, 32 }
  0x75   : > { %p5895_p4 = scmp.ne.s32.totalorder %s272_s30, %s5894_s24  ;;  %p5902_p9 = scmp.lt.s32.totalorder %s272_s30, %s272_s30 }
  0x76   : > { %p5903_p10 = scmp.lt.s32.totalorder %s5901_s15, %s5894_s24 }
  0x77   : > { %p5897_p6 = pnand %p5895_p4, %p6097_p7 }
  0x78   : > { %p5904_p11 = por %p5903_p10, %p5902_p9 }
  0x79   : > { %p5898_p8 = pneg %p5897_p6 }
  0x7b   : > { %p5905_p12 = pnand %p5904_p11, %p5898_p8 }
  0x7d   : > { %5908 = shalt.err (!%p5905_p12)
}
  0x7e   : > { %5565 = dma.hbm_to_vmem [thread:$0]  (!%p6081_p5), %s7339_s5, 16, %s272_s30, [#allocation12]  }
  0x7f   : > { %s6202_s21 = sadd.s32 1, %s5985_s29   ;;  %s32_s25 = sadd.s32 1, %s5981_s28 }
  0x80   : > { %s29_s13 = ssub.s32 %s5985_s29, %s6202_s21  ;;  %p39_p1 = scmp.ne.s32.totalorder %s5981_s28, %s5977_s27 }
  0x81   : > { %p30_p7 = scmp.eq.s32.totalorder %s29_s13, 0  ;;  %p40_p3 = scmp.eq.s32.totalorder %s5985_s29, 0 }
  0x82   : > { %p45_p13 = scmp.ne.s32.totalorder %s5977_s27, %s5973_s26  ;;  %p7349_p2 = scmp.ne.s32.totalorder %s7345_s9, 0 }
  0x83   : > { %s6213_s6 = scalar_select %p30_p7, %s5981_s28, %s32_s25  }
  0x84   : > { %p41_p0 = por %p40_p3, %p39_p1  ;;  %p6217_p4 = por %p7349_p2, %p45_p13 }
  0x85   : > { %p5575_p6 = scmp.lt.s32.totalorder %s5985_s29, 2  ;;  %s285_s11 = sand.u32 1, %s5981_s28  }
  0x86   : > { %s4322_s30 = sshll.u32 %s285_s11, 12  ;;  %s4487_s14 = sshll.u32 %s5985_s29, 16 }
  0x87   : > { %s6227_s18 = scalar_lea.hbm %s7334_s0, %s4487_s14  ;;  %s289_s26 = scalar_lea.vmem [#allocation3], %s4322_s30 }
  0x88   : > { %s297_s19 = sshll.u32 %s289_s26, 4  ;;  %p6231_p5 = pnand %p5575_p6, %p41_p0  ;;  %s6229_s19 = int_to_ptr.vmem [resolvable:$true] %s297_s19 }
  0x89   : > { %s6235_s24 = scalar_lea.sflag [#allocation4], %s285_s11  ;;  %s5909_s15 = scalar_lea.hbm %s6227_s18, 65536 }
  0x8a   : > { %p5910_p8 = scmp.ne.s32.totalorder %s6227_s18, %s5909_s15  ;;  %p5911_p9 = pneg %p6231_p5 }
  0x8b   : > { %s5914_s13 = scalar_lea.hbm %s7334_s0, 131072  ;;  %p5915_p12 = scmp.lt.u32.totalorder %s6227_s18, %s7334_s0 }
  0x8c   : > { %p5912_p10 = pnand %p5911_p9, %p5910_p8  ;;  %p5916_p7 = scmp.lt.u32.totalorder %s5914_s13, %s5909_s15 }
  0x8d   : > { %p5918_p3 = scmp.lt.u32.totalorder %s5909_s15, %s6227_s18 }
  0x8e   : > { %p5913_p11 = pneg %p5912_p10  ;;  %p5917_p1 = por %p5916_p7, %p5915_p12 }
  0x90   : > { %p5919_p13 = por %p5918_p3, %p5917_p1 }
  0x92   : > { %p5920_p0 = pnand %p5919_p13, %p5913_p11 }
  0x94   : > { %5923 = shalt.err (!%p5920_p0)
}
  0x95   : > { %s5924_s11 = scalar_lea.vmem %s6229_s19, 65536  ;;  %s5996_s14 = smov [#allocation3]  }
  0x96   : > { %p5925_p2 = scmp.ne.s32.totalorder %s6229_s19, %s5924_s11  ;;  %s5929_s16 = sshll.u32 %s5996_s14, 4  ;;  %s5930_s16 = int_to_ptr.vmem [resolvable:$false] %s5929_s16 }
  0x97   : > { %s5931_s17 = scalar_lea.vmem %s5930_s16, 131072  ;;  %p5932_p10 = scmp.lt.s32.totalorder %s6229_s19, %s5930_s16 }
  0x98   : > { %p5927_p6 = pnand %p5925_p2, %p5911_p9  ;;  %p5933_p12 = scmp.lt.s32.totalorder %s5931_s17, %s5924_s11 }
  0x9a   : > { %p5928_p8 = pneg %p5927_p6  ;;  %p5934_p7 = por %p5933_p12, %p5932_p10 }
  0x9c   : > { %p5935_p1 = pnand %p5934_p7, %p5928_p8 }
  0x9e   : > { %5938 = shalt.err (!%p5935_p1)
}
  0x9f   : > { %s5997_s26 = smov 2048   ;;  %s5998_s15 = smov 128  }
  0xa0   : > { %5569 = dma.hbm_to_vmem [thread:$0]  (!%p6231_p5), %s6227_s18, 65536, %s6229_s19, %s6235_s24, %s5997_s26, %s5997_s26, %s5998_s15  }
  0xa1   : > { %p7352_p9 = scmp.ne.s32.totalorder %s7346_s10, 0 }
  0xa2   : > { %s311_s22 = sand.u32 (!%p7352_p9), 1, %s5977_s27  }
  0xa3   : > { %309 = sbr.rel (%p7352_p9) target bundleno = 1531 (0x5fb), region = 48  ;;  %s4327_s12 = sshll.u32 (!%p7352_p9), %s311_s22, 12 }
  0xa4   : > { %s312_s13 = scalar_lea.sflag (!%p7352_p9), [#allocation4], %s311_s22  ;;  %s6266_s25 = scalar_lea.vmem (!%p7352_p9), [#allocation3], %s4327_s12 }
  0xaa   : > { %5956 = dma.done.wait (%p6217_p4), %s312_s13, 65536  }
  0xab   : > { %5958 = vsyncadd (%p6217_p4), %s312_s13, 4294901760  ;;  %p7353_p11 = scmp.ne.s32.totalorder %s7345_s9, 0 }
  0xad   : > { %5960 = dma.done.wait (%p7353_p11), [#allocation6], 16400  }
  0xae   : > { %5962 = vsyncadd (%p7353_p11), [#allocation6], 4294950896 }
  0xaf   : > { %5964 = dma.done.wait (%p7353_p11), [#allocation9], 2080  }
  0xb0   : > { %5966 = vsyncadd (%p7353_p11), [#allocation9], 4294965216 }
  0xb1   : > { %5968 = dma.done.wait (%p7353_p11), [#allocation12], 16  }
  0xb2   : > { %5970 = vsyncadd (%p7353_p11), [#allocation12], 4294967280  ;;  %v5624_v1 = vld [vmem:[#allocation5 + $0x40] sm:$0xff]   ;;  %v5628_v5 = vld [vmem:[#allocation5 + $0x48] sm:$0xff]   ;;  %s4333_s9 = sshll.u32 %s4313_s8, 5  ;;  %vm4165_vm0 = vcmask 7168  }
  0xb3   : > { %v5625_v2 = vld [vmem:[#allocation5 + $0xc0] sm:$0xff]   ;;  %4488 = vmatprep.subr.bf16.mxu0 %v5624_v1  ;;  %v5629_v6 = vld [vmem:[#allocation5 + $0xc8] sm:$0xff]   ;;  %v5632_v9 = vld [vmem:[#allocation5 + $0x50] sm:$0xff]   ;;  %p368_p4 = scmp.lt.s32.totalorder %s4333_s9, 63 }
  0xb4   : > { %v5626_v3 = vld [vmem:[#allocation5] sm:$0xff]   ;;  %4600 = vmatprep.subr.bf16.mxu1 %v5625_v2  ;;  %v5630_v7 = vld [vmem:[#allocation5 + $0x8] sm:$0xff]   ;;  %v5633_v10 = vld [vmem:[#allocation5 + $0xd0] sm:$0xff]  }
  0xb5   : > { %v5627_v4 = vld [vmem:[#allocation5 + $0x80] sm:$0xff]   ;;  %4489 = vmatpush3.bf16.msra.mxu0 %v5626_v3  ;;  %v5631_v8 = vld [vmem:[#allocation5 + $0x88] sm:$0xff]   ;;  %v5634_v11 = vld [vmem:[#allocation5 + $0x10] sm:$0xff]   ;;  %s7359_s9 = smov (!%p368_p4, %s4333_s9), 63 }
  0xb6   : > { %4601 = vmatpush3.bf16.msra.mxu1 %v5627_v4  ;;  %4490 = vmatprep.subr.bf16.mxu0 %v5628_v5  ;;  %v5635_v12 = vld [vmem:[#allocation5 + $0x90] sm:$0xff]   ;;  %v5636_v13 = vld [vmem:[#allocation5 + $0x58] sm:$0xff]   ;;  %v5640_v17 = vld [vmem:[#allocation5 + $0x60] sm:$0xff]   ;;  %s4334_s10 = sshll.u32 %s7359_s9, 3 }
  0xb7   : > { %4602 = vmatprep.subr.bf16.mxu1 %v5629_v6  ;;  %v5637_v14 = vld [vmem:[#allocation5 + $0xd8] sm:$0xff]   ;;  %v5641_v18 = vld [vmem:[#allocation5 + $0xe0] sm:$0xff]   ;;  %v5644_v21 = vld [vmem:[#allocation5 + $0x68] sm:$0xff]   ;;  %s7223_s19 = scalar_lea.vmem %s7341_s7, %s4334_s10 }
  0xb8   : > { %v5638_v15 = vld [vmem:[#allocation5 + $0x18] sm:$0xff]   ;;  %v5642_v19 = vld [vmem:[#allocation5 + $0x20] sm:$0xff]   ;;  %v5645_v22 = vld [vmem:[#allocation5 + $0xe8] sm:$0xff]  }
  0xb9   : > { %4491 = vmatpush3.bf16.msra.mxu0 %v5630_v7  ;;  %v5639_v16 = vld [vmem:[#allocation5 + $0x98] sm:$0xff]   ;;  %v5643_v20 = vld [vmem:[#allocation5 + $0xa0] sm:$0xff]   ;;  %v5646_v23 = vld [vmem:[#allocation5 + $0x28] sm:$0xff]  }
  0xba   : > { %4603 = vmatpush3.bf16.msra.mxu1 %v5631_v8  ;;  %4492 = vmatprep.subr.bf16.mxu0 %v5632_v9  ;;  %v5647_v24 = vld [vmem:[#allocation5 + $0xa8] sm:$0xff]   ;;  %v5648_v25 = vld [vmem:[#allocation5 + $0x70] sm:$0xff]   ;;  %v5652_v29 = vld [vmem:[#allocation5 + $0x78] sm:$0xff]  }
  0xbb   : > { %4604 = vmatprep.subr.bf16.mxu1 %v5633_v10  ;;  %v5649_v26 = vld [vmem:[#allocation5 + $0xf0] sm:$0xff]   ;;  %v5653_v30 = vld [vmem:[#allocation5 + $0xf8] sm:$0xff]   ;;  %v375_v33 = vld [vmem:[%s6266_s25 + $0x8] sm:$0xff] }
  0xbc   : > { %v5650_v27 = vld [vmem:[#allocation5 + $0x30] sm:$0xff]   ;;  %v5654_v31 = vld [vmem:[#allocation5 + $0x38] sm:$0xff]   ;;  %v391_v34 = vld [vmem:[%s6266_s25 + $0x88] sm:$0xff] }
  0xbd   : > { %4493 = vmatpush3.bf16.msra.mxu0 %v5634_v11  ;;  %v5651_v28 = vld [vmem:[#allocation5 + $0xb0] sm:$0xff]   ;;  %v5655_v32 = vld [vmem:[#allocation5 + $0xb8] sm:$0xff]   ;;  %v887_v36 = vpack.c.bf16 %v391_v34, %v375_v33  ;;  %v374_v38 = vld [vmem:[%s6266_s25] sm:$0xff] }
  0xbe   : > { %4605 = vmatpush3.bf16.msra.mxu1 %v5635_v12  ;;  %4494 = vmatprep.subr.bf16.mxu0 %v5636_v13  ;;  %v377_v35 = vld [vmem:[%s6266_s25 + $0x18] sm:$0xff]  ;;  %v390_v39 = vld [vmem:[%s6266_s25 + $0x80] sm:$0xff]  ;;  %v376_v42 = vld [vmem:[%s6266_s25 + $0x10] sm:$0xff] }
  0xbf   : > { %4606 = vmatprep.subr.bf16.mxu1 %v5637_v14  ;;  %v393_v37 = vld [vmem:[%s6266_s25 + $0x98] sm:$0xff]  ;;  %v886_v41 = vpack.c.bf16 %v390_v39, %v374_v38  ;;  %v392_v43 = vld [vmem:[%s6266_s25 + $0x90] sm:$0xff]  ;;  %2205 = vmatprep.mubr.bf16.mxu0 %v887_v36  ;;  %v5656_v45 = vld [vmem:[#allocation5 + $0x140] sm:$0xff]  }
  0xc0   : > { %v889_v40 = vpack.c.bf16 %v393_v37, %v377_v35  ;;  %v888_v44 = vpack.c.bf16 %v392_v43, %v376_v42  ;;  %v5657_v46 = vld [vmem:[#allocation5 + $0x100] sm:$0xff]   ;;  %v407_v49 = vld [vmem:[%s6266_s25 + $0x108] sm:$0xff]  ;;  %v409_v51 = vld [vmem:[%s6266_s25 + $0x118] sm:$0xff] }
  0xc1   : > { %4495 = vmatpush3.bf16.msra.mxu0 %v5638_v15  ;;  %v5658_v47 = vld [vmem:[#allocation5 + $0x1c0] sm:$0xff]   ;;  %v423_v50 = vld [vmem:[%s6266_s25 + $0x188] sm:$0xff]  ;;  %v425_v52 = vld [vmem:[%s6266_s25 + $0x198] sm:$0xff] }
  0xc2   : > { %4607 = vmatpush3.bf16.msra.mxu1 %v5639_v16  ;;  %4496 = vmatprep.subr.bf16.mxu0 %v5640_v17  ;;  %v5659_v48 = vld [vmem:[#allocation5 + $0x180] sm:$0xff]   ;;  %v903_v53 = vpack.c.bf16 %v423_v50, %v407_v49  ;;  %v905_v54 = vpack.c.bf16 %v425_v52, %v409_v51  ;;  %v408_v57 = vld [vmem:[%s6266_s25 + $0x110] sm:$0xff]  ;;  %v439_v60 = vld [vmem:[%s6266_s25 + $0x208] sm:$0xff] }
  0xc3   : > { %4608 = vmatprep.subr.bf16.mxu1 %v5641_v18  ;;  %2366 = vmatprep.mubr.bf16.mxu1 %v889_v40  ;;  %v406_v55 = vld [vmem:[%s6266_s25 + $0x100] sm:$0xff]  ;;  %v424_v59 = vld [vmem:[%s6266_s25 + $0x190] sm:$0xff]  ;;  %v455_v61 = vld [vmem:[%s6266_s25 + $0x288] sm:$0xff] }
  0xc4   : > { %v422_v56 = vld [vmem:[%s6266_s25 + $0x180] sm:$0xff]  ;;  %v904_v62 = vpack.c.bf16 %v424_v59, %v408_v57  ;;  %v919_v63 = vpack.c.bf16 %v455_v61, %v439_v60  ;;  %v441_v0 = vld [vmem:[%s6266_s25 + $0x218] sm:$0xff]  ;;  %v440_v5 = vld [vmem:[%s6266_s25 + $0x210] sm:$0xff] }
  0xc5   : > { %4497 = vmatpush3.bf16.msra.mxu0 %v5642_v19  ;;  %v902_v58 = vpack.c.bf16 %v422_v56, %v406_v55  ;;  %v457_v1 = vld [vmem:[%s6266_s25 + $0x298] sm:$0xff]  ;;  %v438_v3 = vld [vmem:[%s6266_s25 + $0x200] sm:$0xff]  ;;  %v456_v6 = vld [vmem:[%s6266_s25 + $0x290] sm:$0xff] }
  0xc6   : > { %4609 = vmatpush3.bf16.msra.mxu1 %v5643_v20  ;;  %4498 = vmatprep.subr.bf16.mxu0 %v5644_v21  ;;  %v921_v2 = vpack.c.bf16 %v457_v1, %v441_v0  ;;  %v454_v4 = vld [vmem:[%s6266_s25 + $0x280] sm:$0xff]  ;;  %v5660_v7 = vld [vmem:[#allocation5 + $0x148] sm:$0xff]   ;;  %v473_v14 = vld [vmem:[%s6266_s25 + $0x318] sm:$0xff]  ;;  %v920_v15 = vpack.c.bf16 %v456_v6, %v440_v5 }
  0xc7   : > { %4610 = vmatprep.subr.bf16.mxu1 %v5645_v22  ;;  %v5661_v8 = vld [vmem:[#allocation5 + $0x108] sm:$0xff]   ;;  %v918_v11 = vpack.c.bf16 %v454_v4, %v438_v3  ;;  %v489_v17 = vld [vmem:[%s6266_s25 + $0x398] sm:$0xff]  ;;  %v470_v19 = vld [vmem:[%s6266_s25 + $0x300] sm:$0xff] }
  0xc8   : > { %v5662_v9 = vld [vmem:[#allocation5 + $0x1c8] sm:$0xff]   ;;  %v937_v18 = vpack.c.bf16 %v489_v17, %v473_v14  ;;  %v486_v20 = vld [vmem:[%s6266_s25 + $0x380] sm:$0xff]  ;;  %v472_v21 = vld [vmem:[%s6266_s25 + $0x310] sm:$0xff] }
  0xc9   : > { %4499 = vmatpush3.bf16.msra.mxu0 %v5646_v23  ;;  %v5663_v10 = vld [vmem:[#allocation5 + $0x188] sm:$0xff]   ;;  %v488_v22 = vld [vmem:[%s6266_s25 + $0x390] sm:$0xff]  ;;  %v502_v35 = vld [vmem:[%s6266_s25 + $0x400] sm:$0xff] }
  0xca   : > { %4611 = vmatpush3.bf16.msra.mxu1 %v5647_v24  ;;  %4500 = vmatprep.subr.bf16.mxu0 %v5648_v25  ;;  %v471_v12 = vld [vmem:[%s6266_s25 + $0x308] sm:$0xff]  ;;  %v505_v25 = vld [vmem:[%s6266_s25 + $0x418] sm:$0xff]  ;;  %v5667_v33 = vld [vmem:[#allocation5 + $0x190] sm:$0xff]  }
  0xcb   : > { %4612 = vmatprep.subr.bf16.mxu1 %v5649_v26  ;;  %v487_v13 = vld [vmem:[%s6266_s25 + $0x388] sm:$0xff]  ;;  %v521_v26 = vld [vmem:[%s6266_s25 + $0x498] sm:$0xff]  ;;  %v518_v36 = vld [vmem:[%s6266_s25 + $0x480] sm:$0xff] }
  0xcc   : > { %v935_v16 = vpack.c.bf16 %v487_v13, %v471_v12  ;;  %v503_v23 = vld [vmem:[%s6266_s25 + $0x408] sm:$0xff]  ;;  %v953_v34 = vpack.c.bf16 %v521_v26, %v505_v25  ;;  %v504_v37 = vld [vmem:[%s6266_s25 + $0x410] sm:$0xff]  ;;  %v553_v42 = vld [vmem:[%s6266_s25 + $0x598] sm:$0xff] }
  0xcd   : > { %4501 = vmatpush3.bf16.msra.mxu0 %v5650_v27  ;;  %v519_v24 = vld [vmem:[%s6266_s25 + $0x488] sm:$0xff]  ;;  %v5664_v27 = vld [vmem:[#allocation5 + $0x150] sm:$0xff]   ;;  %v5668_v43 = vld [vmem:[#allocation5 + $0x158] sm:$0xff]  }
  0xce   : > { %4613 = vmatpush3.bf16.msra.mxu1 %v5651_v28  ;;  %4502 = vmatprep.subr.bf16.mxu0 %v5652_v29  ;;  %v5665_v28 = vld [vmem:[#allocation5 + $0x110] sm:$0xff]   ;;  %v934_v29 = vpack.c.bf16 %v486_v20, %v470_v19  ;;  %v535_v39 = vld [vmem:[%s6266_s25 + $0x508] sm:$0xff]  ;;  %v5671_v50 = vld [vmem:[#allocation5 + $0x198] sm:$0xff]  }
  0xcf   : > { %4614 = vmatprep.subr.bf16.mxu1 %v5653_v30  ;;  %v5666_v30 = vld [vmem:[#allocation5 + $0x1d0] sm:$0xff]   ;;  %v551_v40 = vld [vmem:[%s6266_s25 + $0x588] sm:$0xff]  ;;  %v534_v51 = vld [vmem:[%s6266_s25 + $0x500] sm:$0xff] }
  0xd0   : > { %v520_v38 = vld [vmem:[%s6266_s25 + $0x490] sm:$0xff]  ;;  %v550_v52 = vld [vmem:[%s6266_s25 + $0x580] sm:$0xff]  ;;  %v567_v55 = vld [vmem:[%s6266_s25 + $0x608] sm:$0xff] }
  0xd1   : > { %4503 = vmatpush3.bf16.msra.mxu0 %v5654_v31  ;;  %v936_v31 = vpack.c.bf16 %v488_v22, %v472_v21  ;;  %v583_v56 = vld [vmem:[%s6266_s25 + $0x688] sm:$0xff]  ;;  %v569_v57 = vld [vmem:[%s6266_s25 + $0x618] sm:$0xff]  ;;  %v966_v59 = vpack.c.bf16 %v550_v52, %v534_v51  ;;  %v5672_v60 = vld [vmem:[#allocation5 + $0x160] sm:$0xff]  }
  0xd2   : > { %4615 = vmatpush3.bf16.msra.mxu1 %v5655_v32  ;;  %4712 = vmatprep.subr.bf16.mxu0 %v5656_v45  ;;  %v951_v32 = vpack.c.bf16 %v519_v24, %v503_v23  ;;  %v5669_v45 = vld [vmem:[#allocation5 + $0x118] sm:$0xff]   ;;  %v5674_v1 = vld [vmem:[#allocation5 + $0x1e0] sm:$0xff]   ;;  %v568_v5 = vld [vmem:[%s6266_s25 + $0x610] sm:$0xff] }
  0xd3   : > { %4824 = vmatprep.subr.bf16.mxu1 %v5658_v47  ;;  %v967_v47 = vpack.c.bf16 %v551_v40, %v535_v39  ;;  %v566_v3 = vld [vmem:[%s6266_s25 + $0x600] sm:$0xff]  ;;  %v584_v6 = vld [vmem:[%s6266_s25 + $0x690] sm:$0xff]  ;;  %v5677_v17 = vld [vmem:[#allocation5 + $0x128] sm:$0xff]  }
  0xd4   : > { %2206 = vmatmul.mubr.bf16.vlgmr.msra.gmra.mrb[0].mxu0 %v886_v41  ;;  %v537_v41 = vld [vmem:[%s6266_s25 + $0x518] sm:$0xff]  ;;  %v582_v4 = vld [vmem:[%s6266_s25 + $0x680] sm:$0xff]  ;;  %v984_v12 = vpack.c.bf16 %v584_v6, %v568_v5  ;;  %v600_v20 = vld [vmem:[%s6266_s25 + $0x710] sm:$0xff] }
  0xd5   : > { %2367 = vmatmul.mubr.bf16.vlgmr.msra.gmra.mrb[0].mxu1 %v888_v44  ;;  %4713 = vmatpush3.bf16.msra.mxu0 %v5657_v46  ;;  %v950_v44 = vpack.c.bf16 %v518_v36, %v502_v35  ;;  %v952_v46 = vpack.c.bf16 %v520_v38, %v504_v37  ;;  %v969_v49 = vpack.c.bf16 %v553_v42, %v537_v41  ;;  %v614_v19 = vld [vmem:[%s6266_s25 + $0x780] sm:$0xff]  ;;  %v5679_v21 = vld [vmem:[#allocation5 + $0x1a8] sm:$0xff]   ;;  %v616_v22 = vld [vmem:[%s6266_s25 + $0x790] sm:$0xff] }
  0xd6   : > { %4825 = vmatpush3.bf16.msra.mxu1 %v5659_v48  ;;  %2213 = vmatprep.mubr.bf16.mxu0 %v903_v53  ;;  %v5670_v48 = vld [vmem:[#allocation5 + $0x1d8] sm:$0xff]   ;;  %v536_v53 = vld [vmem:[%s6266_s25 + $0x510] sm:$0xff]  ;;  %v631_v23 = vld [vmem:[%s6266_s25 + $0x808] sm:$0xff] }
  0xd7   : > { %2374 = vmatprep.mubr.bf16.mxu1 %v905_v54  ;;  %4714 = vmatprep.subr.bf16.mxu0 %v5660_v7  ;;  %v552_v54 = vld [vmem:[%s6266_s25 + $0x590] sm:$0xff]  ;;  %v599_v7 = vld [vmem:[%s6266_s25 + $0x708] sm:$0xff]  ;;  %v633_v25 = vld [vmem:[%s6266_s25 + $0x818] sm:$0xff] }
  0xd8   : > { %4826 = vmatprep.subr.bf16.mxu1 %v5662_v9  ;;  %v968_v61 = vpack.c.bf16 %v552_v54, %v536_v53  ;;  %v601_v9 = vld [vmem:[%s6266_s25 + $0x718] sm:$0xff]  ;;  %v647_v24 = vld [vmem:[%s6266_s25 + $0x888] sm:$0xff]  ;;  %v648_v35 = vld [vmem:[%s6266_s25 + $0x890] sm:$0xff] }
  0xd9   : > { %4715 = vmatpush3.bf16.msra.mxu0 %v5661_v8  ;;  %v615_v8 = vld [vmem:[%s6266_s25 + $0x788] sm:$0xff]  ;;  %v649_v26 = vld [vmem:[%s6266_s25 + $0x898] sm:$0xff]  ;;  %v5681_v37 = vld [vmem:[#allocation5 + $0x130] sm:$0xff]  }
  0xda   : > { %4827 = vmatpush3.bf16.msra.mxu1 %v5663_v10  ;;  %4716 = vmatprep.subr.bf16.mxu0 %v5664_v27  ;;  %v617_v10 = vld [vmem:[%s6266_s25 + $0x798] sm:$0xff]  ;;  %v999_v13 = vpack.c.bf16 %v615_v8, %v599_v7  ;;  %v663_v36 = vld [vmem:[%s6266_s25 + $0x908] sm:$0xff]  ;;  %v5682_v38 = vld [vmem:[#allocation5 + $0x1f0] sm:$0xff]  }
  0xdb   : > { %4828 = vmatprep.subr.bf16.mxu1 %v5666_v30  ;;  %v1001_v14 = vpack.c.bf16 %v617_v10, %v601_v9  ;;  %v1017_v30 = vpack.c.bf16 %v649_v26, %v633_v25  ;;  %v679_v39 = vld [vmem:[%s6266_s25 + $0x988] sm:$0xff]  ;;  %v5683_v40 = vld [vmem:[#allocation5 + $0x1b0] sm:$0xff]   ;;  %v665_v41 = vld [vmem:[%s6266_s25 + $0x918] sm:$0xff] }
  0xdc   : > { %2214 = vmatmul.mubr.bf16.gmra.mrb[4].mxu0 %v902_v58  ;;  %v585_v58 = vld [vmem:[%s6266_s25 + $0x698] sm:$0xff]  ;;  %v695_v51 = vld [vmem:[%s6266_s25 + $0xa08] sm:$0xff]  ;;  %v5688_v6 = vld [vmem:[#allocation5 + $0x240] sm:$0xff]  }
  0xdd   : > { %2375 = vmatmul.mubr.bf16.gmra.mrb[4].mxu1 %v904_v62  ;;  %2221 = vmatprep.mubr.bf16.mxu0 %v919_v63  ;;  %v983_v62 = vpack.c.bf16 %v583_v56, %v567_v55  ;;  %v5673_v63 = vld [vmem:[#allocation5 + $0x120] sm:$0xff]   ;;  %v985_v0 = vpack.c.bf16 %v585_v58, %v569_v57  ;;  %v681_v42 = vld [vmem:[%s6266_s25 + $0x998] sm:$0xff]  ;;  %v711_v52 = vld [vmem:[%s6266_s25 + $0xa88] sm:$0xff] }
  0xde   : > { %2382 = vmatprep.mubr.bf16.mxu1 %v921_v2  ;;  %4717 = vmatpush3.bf16.msra.mxu0 %v5665_v28  ;;  %v5675_v2 = vld [vmem:[#allocation5 + $0x1a0] sm:$0xff]   ;;  %v1000_v28 = vpack.c.bf16 %v616_v22, %v600_v20  ;;  %v5684_v53 = vld [vmem:[#allocation5 + $0x178] sm:$0xff]  }
  0xdf   : > { %4829 = vmatpush3.bf16.msra.mxu1 %v5667_v33  ;;  %4718 = vmatprep.subr.bf16.mxu0 %v5668_v43  ;;  %v5680_v33 = vld [vmem:[#allocation5 + $0x170] sm:$0xff]   ;;  %v697_v54 = vld [vmem:[%s6266_s25 + $0xa18] sm:$0xff]  ;;  %v5690_v9 = vld [vmem:[#allocation5 + $0x2c0] sm:$0xff]  }
  0xe0   : > { %4830 = vmatprep.subr.bf16.mxu1 %v5670_v48  ;;  %v678_v48 = vld [vmem:[%s6266_s25 + $0x980] sm:$0xff]  ;;  %v713_v55 = vld [vmem:[%s6266_s25 + $0xa98] sm:$0xff] }
  0xe1   : > { %v5685_v56 = vld [vmem:[#allocation5 + $0x138] sm:$0xff]   ;;  %v758_v25 = vld [vmem:[%s6266_s25 + $0xc00] sm:$0xff] }
  0xe2   : > { %4719 = vmatpush3.bf16.msra.mxu0 %v5669_v45  ;;  %v1031_v45 = vpack.c.bf16 %v679_v39, %v663_v36  ;;  %v5686_v57 = vld [vmem:[#allocation5 + $0x1f8] sm:$0xff]   ;;  %v774_v26 = vld [vmem:[%s6266_s25 + $0xc80] sm:$0xff]  ;;  %v792_v39 = vld [vmem:[%s6266_s25 + $0xd10] sm:$0xff] }
  0xe3   : > { %4831 = vmatpush3.bf16.msra.mxu1 %v5671_v50  ;;  %4720 = vmatprep.subr.bf16.mxu0 %v5672_v60  ;;  %v680_v50 = vld [vmem:[%s6266_s25 + $0x990] sm:$0xff]  ;;  %v5687_v58 = vld [vmem:[#allocation5 + $0x1b8] sm:$0xff]  }
  0xe4   : > { %2222 = vmatmul.mubr.bf16.gmra.mrb[8].mxu0 %v918_v11  ;;  %4832 = vmatprep.subr.bf16.mxu1 %v5674_v1  ;;  %v982_v11 = vpack.c.bf16 %v582_v4, %v566_v3  ;;  %v696_v1 = vld [vmem:[%s6266_s25 + $0xa10] sm:$0xff]  ;;  %v727_v3 = vld [vmem:[%s6266_s25 + $0xb08] sm:$0xff]  ;;  %v729_v5 = vld [vmem:[%s6266_s25 + $0xb18] sm:$0xff] }
  0xe5   : > { %2383 = vmatmul.mubr.bf16.gmra.mrb[8].mxu1 %v920_v15  ;;  %2229 = vmatprep.mubr.bf16.mxu0 %v935_v16  ;;  %v5676_v15 = vld [vmem:[#allocation5 + $0x168] sm:$0xff]   ;;  %v598_v16 = vld [vmem:[%s6266_s25 + $0x700] sm:$0xff]  ;;  %v745_v7 = vld [vmem:[%s6266_s25 + $0xb98] sm:$0xff] }
  0xe6   : > { %2390 = vmatprep.mubr.bf16.mxu1 %v937_v18  ;;  %4721 = vmatpush3.bf16.msra.mxu0 %v5673_v63  ;;  %v5678_v18 = vld [vmem:[#allocation5 + $0x1e8] sm:$0xff]   ;;  %v998_v27 = vpack.c.bf16 %v614_v19, %v598_v16  ;;  %v694_v63 = vld [vmem:[%s6266_s25 + $0xa00] sm:$0xff]  ;;  %v744_v16 = vld [vmem:[%s6266_s25 + $0xb90] sm:$0xff] }
  0xe7   : > { %4833 = vmatpush3.bf16.msra.mxu1 %v5675_v2  ;;  %4722 = vmatprep.subr.bf16.mxu0 %v5676_v15  ;;  %v712_v2 = vld [vmem:[%s6266_s25 + $0xa90] sm:$0xff]  ;;  %v743_v4 = vld [vmem:[%s6266_s25 + $0xb88] sm:$0xff]  ;;  %v761_v19 = vld [vmem:[%s6266_s25 + $0xc18] sm:$0xff] }
  0xe8   : > { %4834 = vmatprep.subr.bf16.mxu1 %v5678_v18  ;;  %v1048_v10 = vpack.c.bf16 %v712_v2, %v696_v1  ;;  %v728_v15 = vld [vmem:[%s6266_s25 + $0xb10] sm:$0xff]  ;;  %v775_v18 = vld [vmem:[%s6266_s25 + $0xc88] sm:$0xff]  ;;  %v777_v20 = vld [vmem:[%s6266_s25 + $0xc98] sm:$0xff] }
  0xe9   : > { %v1064_v22 = vpack.c.bf16 %v744_v16, %v728_v15  ;;  %v379_v1 = vld [vmem:[%s6266_s25 + $0x28] sm:$0xff]  ;;  %v413_v16 = vld [vmem:[%s6266_s25 + $0x138] sm:$0xff] }
  0xea   : > { %4723 = vmatpush3.bf16.msra.mxu0 %v5677_v17  ;;  %v759_v17 = vld [vmem:[%s6266_s25 + $0xc08] sm:$0xff] }
  0xeb   : > { %4835 = vmatpush3.bf16.msra.mxu1 %v5679_v21  ;;  %4724 = vmatprep.subr.bf16.mxu0 %v5680_v33  ;;  %v1078_v33 = vpack.c.bf16 %v774_v26, %v758_v25  ;;  %v395_v2 = vld [vmem:[%s6266_s25 + $0xa8] sm:$0xff]  ;;  %v412_v26 = vld [vmem:[%s6266_s25 + $0x130] sm:$0xff] }
  0xec   : > { %2230 = vmatmul.mubr.bf16.gmra.mrb[12].mxu0 %v934_v29  ;;  %v1015_v29 = vpack.c.bf16 %v647_v24, %v631_v23  ;;  %4836 = vmatprep.subr.bf16.mxu1 %v5682_v38  ;;  %v1079_v23 = vpack.c.bf16 %v775_v18, %v759_v17  ;;  %v1081_v24 = vpack.c.bf16 %v777_v20, %v761_v19  ;;  %v806_v38 = vld [vmem:[%s6266_s25 + $0xd80] sm:$0xff]  ;;  %v429_v17 = vld [vmem:[%s6266_s25 + $0x1b8] sm:$0xff]  ;;  %v5692_v25 = vld [vmem:[#allocation5 + $0x248] sm:$0xff]  }
  0xed   : > { %2391 = vmatmul.mubr.bf16.gmra.mrb[12].mxu1 %v936_v31  ;;  %2237 = vmatprep.mubr.bf16.mxu0 %v951_v32  ;;  %v630_v31 = vld [vmem:[%s6266_s25 + $0x800] sm:$0xff] }
  0xee   : > { %2398 = vmatprep.mubr.bf16.mxu1 %v953_v34  ;;  %v646_v32 = vld [vmem:[%s6266_s25 + $0x880] sm:$0xff]  ;;  %v632_v34 = vld [vmem:[%s6266_s25 + $0x810] sm:$0xff]  ;;  %4725 = vmatpush3.bf16.msra.mxu0 %v5681_v37 }
  0xef   : > { %v1014_v43 = vpack.c.bf16 %v646_v32, %v630_v31  ;;  %4837 = vmatpush3.bf16.msra.mxu1 %v5683_v40  ;;  %4726 = vmatprep.subr.bf16.mxu0 %v5684_v53  ;;  %v793_v31 = vld [vmem:[%s6266_s25 + $0xd18] sm:$0xff]  ;;  %v790_v37 = vld [vmem:[%s6266_s25 + $0xd00] sm:$0xff]  ;;  %v808_v40 = vld [vmem:[%s6266_s25 + $0xd90] sm:$0xff] }
  0xf0   : > { %4838 = vmatprep.subr.bf16.mxu1 %v5686_v57  ;;  %v809_v32 = vld [vmem:[%s6266_s25 + $0xd98] sm:$0xff]  ;;  %v855_v53 = vld [vmem:[%s6266_s25 + $0xf08] sm:$0xff]  ;;  %v5689_v19 = vld [vmem:[#allocation5 + $0x200] sm:$0xff]  }
  0xf1   : > { %v1097_v36 = vpack.c.bf16 %v809_v32, %v793_v31  ;;  %v5691_v20 = vld [vmem:[#allocation5 + $0x280] sm:$0xff]   ;;  %v445_v31 = vld [vmem:[%s6266_s25 + $0x238] sm:$0xff] }
  0xf2   : > { %4727 = vmatpush3.bf16.msra.mxu0 %v5685_v56  ;;  %v873_v56 = vld [vmem:[%s6266_s25 + $0xf98] sm:$0xff] }
  0xf3   : > { %4839 = vmatpush3.bf16.msra.mxu1 %v5687_v58  ;;  %4936 = vmatprep.subr.bf16.mxu0 %v5688_v6  ;;  %v461_v32 = vld [vmem:[%s6266_s25 + $0x2b8] sm:$0xff] }
  0xf4   : > { %2238 = vmatmul.mubr.bf16.gmra.mrb[16].mxu0 %v950_v44  ;;  %v1016_v44 = vpack.c.bf16 %v648_v35, %v632_v34  ;;  %5048 = vmatprep.subr.bf16.mxu1 %v5690_v9  ;;  %v378_v9 = vld [vmem:[%s6266_s25 + $0x20] sm:$0xff] }
  0xf5   : > { %2399 = vmatmul.mubr.bf16.gmra.mrb[16].mxu1 %v952_v46  ;;  %2245 = vmatprep.mubr.bf16.mxu0 %v967_v47  ;;  %v1033_v46 = vpack.c.bf16 %v681_v42, %v665_v41  ;;  %v662_v47 = vld [vmem:[%s6266_s25 + $0x900] sm:$0xff]  ;;  %v823_v41 = vld [vmem:[%s6266_s25 + $0xe08] sm:$0xff] }
  0xf6   : > { %2406 = vmatprep.mubr.bf16.mxu1 %v969_v49  ;;  %v664_v49 = vld [vmem:[%s6266_s25 + $0x910] sm:$0xff]  ;;  %v839_v42 = vld [vmem:[%s6266_s25 + $0xe88] sm:$0xff] }
  0xf7   : > { %v1032_v60 = vpack.c.bf16 %v680_v50, %v664_v49  ;;  %v822_v49 = vld [vmem:[%s6266_s25 + $0xe00] sm:$0xff] }
  0xf8   : > { %v838_v50 = vld [vmem:[%s6266_s25 + $0xe80] sm:$0xff] }
  0xf9   : > { %v1110_v57 = vpack.c.bf16 %v838_v50, %v822_v49  ;;  %v475_v49 = vld [vmem:[%s6266_s25 + $0x328] sm:$0xff] }
  0xfa   : > { %v491_v50 = vld [vmem:[%s6266_s25 + $0x3a8] sm:$0xff] }
  0xfc   : > { %2246 = vmatmul.mubr.bf16.gmra.mrb[20].mxu0 %v966_v59  ;;  %v1030_v59 = vpack.c.bf16 %v678_v48, %v662_v47  ;;  %v1111_v47 = vpack.c.bf16 %v839_v42, %v823_v41  ;;  %v5697_v41 = vld [vmem:[#allocation5 + $0x210] sm:$0xff]   ;;  %v442_v42 = vld [vmem:[%s6266_s25 + $0x220] sm:$0xff] }
  0xfd   : > { %2407 = vmatmul.mubr.bf16.gmra.mrb[20].mxu1 %v968_v61  ;;  %2253 = vmatprep.mubr.bf16.mxu0 %v983_v62  ;;  %v1047_v61 = vpack.c.bf16 %v711_v52, %v695_v51  ;;  %v1049_v62 = vpack.c.bf16 %v713_v55, %v697_v54  ;;  %v824_v51 = vld [vmem:[%s6266_s25 + $0xe10] sm:$0xff]  ;;  %v871_v54 = vld [vmem:[%s6266_s25 + $0xf88] sm:$0xff]  ;;  %v857_v55 = vld [vmem:[%s6266_s25 + $0xf18] sm:$0xff] }
  0xfe   : > { %2414 = vmatprep.mubr.bf16.mxu1 %v985_v0  ;;  %v710_v0 = vld [vmem:[%s6266_s25 + $0xa80] sm:$0xff]  ;;  %v840_v52 = vld [vmem:[%s6266_s25 + $0xe90] sm:$0xff] }
  0xff   : > { %v1046_v8 = vpack.c.bf16 %v710_v0, %v694_v63  ;;  %v1112_v58 = vpack.c.bf16 %v840_v52, %v824_v51  ;;  %v856_v63 = vld [vmem:[%s6266_s25 + $0xf10] sm:$0xff]  ;;  %v477_v51 = vld [vmem:[%s6266_s25 + $0x338] sm:$0xff] }
 0x100   : > { %v872_v0 = vld [vmem:[%s6266_s25 + $0xf90] sm:$0xff]  ;;  %v493_v52 = vld [vmem:[%s6266_s25 + $0x3b8] sm:$0xff] }
 0x101   : > { %v1128_v6 = vpack.c.bf16 %v872_v0, %v856_v63  ;;  %v5708_v63 = vld [vmem:[#allocation5 + $0x268] sm:$0xff]   ;;  %v474_v0 = vld [vmem:[%s6266_s25 + $0x320] sm:$0xff] }
 0x104   : > { %2254 = vmatmul.mubr.bf16.gmra.mrb[24].mxu0 %v982_v11  ;;  %v1063_v11 = vpack.c.bf16 %v743_v4, %v727_v3  ;;  %v381_v3 = vld [vmem:[%s6266_s25 + $0x38] sm:$0xff] }
 0x105   : > { %2415 = vmatmul.mubr.bf16.gmra.mrb[24].mxu1 %v984_v12  ;;  %2261 = vmatprep.mubr.bf16.mxu0 %v999_v13  ;;  %v1065_v12 = vpack.c.bf16 %v745_v7, %v729_v5  ;;  %v726_v13 = vld [vmem:[%s6266_s25 + $0xb00] sm:$0xff]  ;;  %v397_v4 = vld [vmem:[%s6266_s25 + $0xb8] sm:$0xff]  ;;  %v891_v7 = vpack.c.bf16 %v395_v2, %v379_v1  ;;  %v5710_v2 = vld [vmem:[#allocation5 + $0x2e8] sm:$0xff]  }
 0x106   : > { %2422 = vmatprep.mubr.bf16.mxu1 %v1001_v14  ;;  %v742_v14 = vld [vmem:[%s6266_s25 + $0xb80] sm:$0xff] }
 0x107   : > { %v1062_v21 = vpack.c.bf16 %v742_v14, %v726_v13  ;;  %v411_v13 = vld [vmem:[%s6266_s25 + $0x128] sm:$0xff]  ;;  %v490_v1 = vld [vmem:[%s6266_s25 + $0x3a0] sm:$0xff] }
 0x108   : > { %v427_v14 = vld [vmem:[%s6266_s25 + $0x1a8] sm:$0xff] }
 0x10c   : > { %2262 = vmatmul.mubr.bf16.gmra.mrb[28].mxu0 %v998_v27  ;;  %v760_v27 = vld [vmem:[%s6266_s25 + $0xc10] sm:$0xff] }
 0x10d   : > { %2423 = vmatmul.mubr.bf16.gmra.mrb[28].mxu1 %v1000_v28  ;;  %2269 = vmatprep.mubr.bf16.mxu0 %v1015_v29  ;;  %v776_v28 = vld [vmem:[%s6266_s25 + $0xc90] sm:$0xff]  ;;  %v791_v29 = vld [vmem:[%s6266_s25 + $0xd08] sm:$0xff] }
 0x10e   : > { %2430 = vmatprep.mubr.bf16.mxu1 %v1017_v30  ;;  %v807_v30 = vld [vmem:[%s6266_s25 + $0xd88] sm:$0xff]  ;;  %v1080_v34 = vpack.c.bf16 %v776_v28, %v760_v27  ;;  %v428_v27 = vld [vmem:[%s6266_s25 + $0x1b0] sm:$0xff] }
 0x10f   : > { %v1095_v35 = vpack.c.bf16 %v807_v30, %v791_v29  ;;  %v443_v28 = vld [vmem:[%s6266_s25 + $0x228] sm:$0xff] }
 0x110   : > { %v459_v29 = vld [vmem:[%s6266_s25 + $0x2a8] sm:$0xff] }
 0x111   : > { %v5694_v30 = vld [vmem:[#allocation5 + $0x2c8] sm:$0xff]  }
 0x114   : > { %2270 = vmatmul.mubr.bf16.gmra.mrb[32].mxu0 %v1014_v43  ;;  %v825_v43 = vld [vmem:[%s6266_s25 + $0xe18] sm:$0xff] }
 0x115   : > { %2431 = vmatmul.mubr.bf16.gmra.mrb[32].mxu1 %v1016_v44  ;;  %2277 = vmatprep.mubr.bf16.mxu0 %v1031_v45  ;;  %v841_v44 = vld [vmem:[%s6266_s25 + $0xe98] sm:$0xff]  ;;  %v1094_v45 = vpack.c.bf16 %v806_v38, %v790_v37  ;;  %v908_v38 = vpack.c.bf16 %v428_v27, %v412_v26  ;;  %v555_v26 = vld [vmem:[%s6266_s25 + $0x5a8] sm:$0xff] }
 0x116   : > { %2438 = vmatprep.mubr.bf16.mxu1 %v1033_v46  ;;  %v1096_v46 = vpack.c.bf16 %v808_v40, %v792_v39  ;;  %v1113_v48 = vpack.c.bf16 %v841_v44, %v825_v43  ;;  %v923_v39 = vpack.c.bf16 %v459_v29, %v443_v28  ;;  %v925_v40 = vpack.c.bf16 %v461_v32, %v445_v31  ;;  %v458_v43 = vld [vmem:[%s6266_s25 + $0x2a0] sm:$0xff]  ;;  %v5699_v44 = vld [vmem:[#allocation5 + $0x290] sm:$0xff]   ;;  %v541_v27 = vld [vmem:[%s6266_s25 + $0x538] sm:$0xff] }
 0x117   : > { %v5717_v28 = vld [vmem:[#allocation5 + $0x238] sm:$0xff]   ;;  %v5720_v31 = vld [vmem:[#allocation5 + $0x340] sm:$0xff]  }
 0x118   : > { %v557_v29 = vld [vmem:[%s6266_s25 + $0x5b8] sm:$0xff] }
 0x11c   : > { %2278 = vmatmul.mubr.bf16.gmra.mrb[36].mxu0 %v1030_v59  ;;  %v1127_v59 = vpack.c.bf16 %v871_v54, %v855_v53  ;;  %v5701_v53 = vld [vmem:[#allocation5 + $0x218] sm:$0xff]  }
 0x11d   : > { %2439 = vmatmul.mubr.bf16.gmra.mrb[36].mxu1 %v1032_v60  ;;  %2285 = vmatprep.mubr.bf16.mxu0 %v1047_v61  ;;  %v1129_v60 = vpack.c.bf16 %v873_v56, %v857_v55  ;;  %v854_v61 = vld [vmem:[%s6266_s25 + $0xf00] sm:$0xff]  ;;  %v5703_v54 = vld [vmem:[#allocation5 + $0x298] sm:$0xff]   ;;  %v922_v56 = vpack.c.bf16 %v458_v43, %v442_v42  ;;  %v587_v42 = vld [vmem:[%s6266_s25 + $0x6a8] sm:$0xff] }
 0x11e   : > { %2446 = vmatprep.mubr.bf16.mxu1 %v1049_v62  ;;  %v870_v62 = vld [vmem:[%s6266_s25 + $0xf80] sm:$0xff]  ;;  %v573_v43 = vld [vmem:[%s6266_s25 + $0x638] sm:$0xff] }
 0x11f   : > { %v1126_v5 = vpack.c.bf16 %v870_v62, %v854_v61  ;;  %v5704_v55 = vld [vmem:[#allocation5 + $0x260] sm:$0xff]  }
 0x120   : > { %v5705_v61 = vld [vmem:[#allocation5 + $0x220] sm:$0xff]  }
 0x121   : > { %v5707_v62 = vld [vmem:[#allocation5 + $0x2a0] sm:$0xff]  }
 0x124   : > { %2286 = vmatmul.mubr.bf16.gmra.mrb[40].mxu0 %v1046_v8  ;;  %v893_v8 = vpack.c.bf16 %v397_v4, %v381_v3  ;;  %v476_v3 = vld [vmem:[%s6266_s25 + $0x330] sm:$0xff] }
 0x125   : > { %2447 = vmatmul.mubr.bf16.gmra.mrb[40].mxu1 %v1048_v10  ;;  %2293 = vmatprep.mubr.bf16.mxu0 %v1063_v11  ;;  %v394_v10 = vld [vmem:[%s6266_s25 + $0xa0] sm:$0xff]  ;;  %v380_v11 = vld [vmem:[%s6266_s25 + $0x30] sm:$0xff] }
 0x126   : > { %2454 = vmatprep.mubr.bf16.mxu1 %v1065_v12  ;;  %v396_v12 = vld [vmem:[%s6266_s25 + $0xb0] sm:$0xff]  ;;  %v890_v15 = vpack.c.bf16 %v394_v10, %v378_v9  ;;  %v525_v9 = vld [vmem:[%s6266_s25 + $0x4b8] sm:$0xff]  ;;  %v5711_v10 = vld [vmem:[#allocation5 + $0x2a8] sm:$0xff]  }
 0x127   : > { %v892_v18 = vpack.c.bf16 %v396_v12, %v380_v11  ;;  %v492_v4 = vld [vmem:[%s6266_s25 + $0x3b0] sm:$0xff]  ;;  %v938_v12 = vpack.c.bf16 %v490_v1, %v474_v0  ;;  %v635_v1 = vld [vmem:[%s6266_s25 + $0x828] sm:$0xff] }
 0x128   : > { %v5712_v11 = vld [vmem:[#allocation5 + $0x270] sm:$0xff]  }
 0x129   : > { %v620_v0 = vld [vmem:[%s6266_s25 + $0x7b0] sm:$0xff] }
 0x12c   : > { %2294 = vmatmul.mubr.bf16.gmra.mrb[44].mxu0 %v1062_v21  ;;  %v907_v21 = vpack.c.bf16 %v427_v14, %v411_v13  ;;  %v5714_v13 = vld [vmem:[#allocation5 + $0x2f0] sm:$0xff]   ;;  %v940_v14 = vpack.c.bf16 %v492_v4, %v476_v3  ;;  %v637_v3 = vld [vmem:[%s6266_s25 + $0x838] sm:$0xff] }
 0x12d   : > { %2455 = vmatmul.mubr.bf16.gmra.mrb[44].mxu1 %v1064_v22  ;;  %2301 = vmatprep.mubr.bf16.mxu0 %v1079_v23  ;;  %v909_v22 = vpack.c.bf16 %v429_v17, %v413_v16  ;;  %v410_v23 = vld [vmem:[%s6266_s25 + $0x120] sm:$0xff]  ;;  %v5713_v16 = vld [vmem:[#allocation5 + $0x230] sm:$0xff]   ;;  %v653_v4 = vld [vmem:[%s6266_s25 + $0x8b8] sm:$0xff] }
 0x12e   : > { %2462 = vmatprep.mubr.bf16.mxu1 %v1081_v24  ;;  %v426_v24 = vld [vmem:[%s6266_s25 + $0x1a0] sm:$0xff] }
 0x12f   : > { %v906_v37 = vpack.c.bf16 %v426_v24, %v410_v23  ;;  %v508_v23 = vld [vmem:[%s6266_s25 + $0x430] sm:$0xff] }
 0x130   : > { %v524_v24 = vld [vmem:[%s6266_s25 + $0x4b0] sm:$0xff] }
 0x134   : > { %2302 = vmatmul.mubr.bf16.gmra.mrb[48].mxu0 %v1078_v33  ;;  %v5693_v33 = vld [vmem:[#allocation5 + $0x208] sm:$0xff]  }
 0x135   : > { %2463 = vmatmul.mubr.bf16.gmra.mrb[48].mxu1 %v1080_v34  ;;  %2309 = vmatprep.mubr.bf16.mxu0 %v1095_v35  ;;  %v5695_v34 = vld [vmem:[#allocation5 + $0x288] sm:$0xff]   ;;  %v5696_v35 = vld [vmem:[#allocation5 + $0x250] sm:$0xff]  }
 0x136   : > { %2470 = vmatprep.mubr.bf16.mxu1 %v1097_v36  ;;  %v5698_v36 = vld [vmem:[#allocation5 + $0x2d0] sm:$0xff]  }
 0x13c   : > { %2310 = vmatmul.mubr.bf16.gmra.mrb[52].mxu0 %v1094_v45  ;;  %v5700_v45 = vld [vmem:[#allocation5 + $0x258] sm:$0xff]  }
 0x13d   : > { %2471 = vmatmul.mubr.bf16.gmra.mrb[52].mxu1 %v1096_v46  ;;  %2317 = vmatprep.mubr.bf16.mxu0 %v1111_v47  ;;  %v444_v46 = vld [vmem:[%s6266_s25 + $0x230] sm:$0xff] }
 0x13e   : > { %2478 = vmatprep.mubr.bf16.mxu1 %v1113_v48  ;;  %v460_v47 = vld [vmem:[%s6266_s25 + $0x2b0] sm:$0xff]  ;;  %v5702_v48 = vld [vmem:[#allocation5 + $0x2d8] sm:$0xff]  }
 0x144   : > { %2318 = vmatmul.mubr.bf16.gmra.mrb[56].mxu0 %v1110_v57  ;;  %v5706_v57 = vld [vmem:[#allocation5 + $0x2e0] sm:$0xff]  }
 0x145   : > { %2479 = vmatmul.mubr.bf16.gmra.mrb[56].mxu1 %v1112_v58  ;;  %2325 = vmatprep.mubr.bf16.mxu0 %v1127_v59  ;;  %v924_v58 = vpack.c.bf16 %v460_v47, %v444_v46  ;;  %v939_v59 = vpack.c.bf16 %v491_v50, %v475_v49  ;;  %v570_v49 = vld [vmem:[%s6266_s25 + $0x620] sm:$0xff] }
 0x146   : > { %2486 = vmatprep.mubr.bf16.mxu1 %v1129_v60  ;;  %v941_v60 = vpack.c.bf16 %v493_v52, %v477_v51  ;;  %v586_v50 = vld [vmem:[%s6266_s25 + $0x6a0] sm:$0xff]  ;;  %v572_v51 = vld [vmem:[%s6266_s25 + $0x630] sm:$0xff] }
 0x147   : > { %v588_v52 = vld [vmem:[%s6266_s25 + $0x6b0] sm:$0xff] }
 0x14c   : > { %2326 = vmatmul.mubr.bf16.gmra.mrb[60].mxu0 %v1126_v5  ;;  %v507_v5 = vld [vmem:[%s6266_s25 + $0x428] sm:$0xff] }
 0x14d   : > { %2487 = vmatmul.mubr.bf16.gmra.mrb[60].mxu1 %v1128_v6  ;;  %2527 = vmatprep.mubr.bf16.mxu0 %v891_v7  ;;  %v523_v6 = vld [vmem:[%s6266_s25 + $0x4a8] sm:$0xff]  ;;  %v509_v7 = vld [vmem:[%s6266_s25 + $0x438] sm:$0xff] }
 0x14e   : > { %2688 = vmatprep.mubr.bf16.mxu1 %v893_v8  ;;  %v5709_v8 = vld [vmem:[#allocation5 + $0x228] sm:$0xff]   ;;  %v957_v17 = vpack.c.bf16 %v525_v9, %v509_v7  ;;  %v634_v9 = vld [vmem:[%s6266_s25 + $0x820] sm:$0xff] }
 0x154   : > { %2528 = vmatmul.mubr.bf16.vlgmr.msra.gmra.mrb[64].mxu0 %v890_v15  ;;  %v955_v15 = vpack.c.bf16 %v523_v6, %v507_v5 }
 0x155   : > { %2689 = vmatmul.mubr.bf16.vlgmr.msra.gmra.mrb[64].mxu1 %v892_v18  ;;  %4937 = vmatpush3.bf16.msra.mxu0 %v5689_v19  ;;  %v5715_v18 = vld [vmem:[#allocation5 + $0x2b0] sm:$0xff]   ;;  %v5716_v19 = vld [vmem:[#allocation5 + $0x278] sm:$0xff]  }
 0x156   : > { %5049 = vmatpush3.bf16.msra.mxu1 %v5691_v20  ;;  %2535 = vmatprep.mubr.bf16.mxu0 %v907_v21  ;;  %v506_v20 = vld [vmem:[%s6266_s25 + $0x420] sm:$0xff] }
 0x157   : > { %2696 = vmatprep.mubr.bf16.mxu1 %v909_v22  ;;  %4938 = vmatprep.subr.bf16.mxu0 %v5692_v25  ;;  %v522_v21 = vld [vmem:[%s6266_s25 + $0x4a0] sm:$0xff]  ;;  %v5718_v22 = vld [vmem:[#allocation5 + $0x2f8] sm:$0xff]   ;;  %v539_v25 = vld [vmem:[%s6266_s25 + $0x528] sm:$0xff] }
 0x158   : > { %5050 = vmatprep.subr.bf16.mxu1 %v5694_v30  ;;  %v5719_v30 = vld [vmem:[#allocation5 + $0x2b8] sm:$0xff]   ;;  %v954_v32 = vpack.c.bf16 %v522_v21, %v506_v20  ;;  %v666_v21 = vld [vmem:[%s6266_s25 + $0x920] sm:$0xff] }
 0x159   : > { %4939 = vmatpush3.bf16.msra.mxu0 %v5693_v33  ;;  %v5722_v33 = vld [vmem:[#allocation5 + $0x3c0] sm:$0xff]  }
 0x15a   : > { %5051 = vmatpush3.bf16.msra.mxu1 %v5695_v34  ;;  %4940 = vmatprep.subr.bf16.mxu0 %v5696_v35  ;;  %v956_v34 = vpack.c.bf16 %v524_v24, %v508_v23  ;;  %v971_v35 = vpack.c.bf16 %v555_v26, %v539_v25  ;;  %v668_v23 = vld [vmem:[%s6266_s25 + $0x930] sm:$0xff]  ;;  %v699_v25 = vld [vmem:[%s6266_s25 + $0xa28] sm:$0xff] }
 0x15b   : > { %5052 = vmatprep.subr.bf16.mxu1 %v5698_v36  ;;  %v973_v36 = vpack.c.bf16 %v557_v29, %v541_v27  ;;  %v684_v24 = vld [vmem:[%s6266_s25 + $0x9b0] sm:$0xff]  ;;  %v715_v26 = vld [vmem:[%s6266_s25 + $0xaa8] sm:$0xff]  ;;  %v701_v27 = vld [vmem:[%s6266_s25 + $0xa38] sm:$0xff] }
 0x15c   : > { %2536 = vmatmul.mubr.bf16.gmra.mrb[68].mxu0 %v906_v37  ;;  %v538_v37 = vld [vmem:[%s6266_s25 + $0x520] sm:$0xff] }
 0x15d   : > { %2697 = vmatmul.mubr.bf16.gmra.mrb[68].mxu1 %v908_v38  ;;  %2543 = vmatprep.mubr.bf16.mxu0 %v923_v39  ;;  %v554_v38 = vld [vmem:[%s6266_s25 + $0x5a0] sm:$0xff]  ;;  %v540_v39 = vld [vmem:[%s6266_s25 + $0x530] sm:$0xff] }
 0x15e   : > { %2704 = vmatprep.mubr.bf16.mxu1 %v925_v40  ;;  %4941 = vmatpush3.bf16.msra.mxu0 %v5697_v41  ;;  %v556_v40 = vld [vmem:[%s6266_s25 + $0x5b0] sm:$0xff]  ;;  %v571_v41 = vld [vmem:[%s6266_s25 + $0x628] sm:$0xff] }
 0x15f   : > { %5053 = vmatpush3.bf16.msra.mxu1 %v5699_v44  ;;  %4942 = vmatprep.subr.bf16.mxu0 %v5700_v45  ;;  %v589_v44 = vld [vmem:[%s6266_s25 + $0x6b8] sm:$0xff]  ;;  %v970_v45 = vpack.c.bf16 %v554_v38, %v538_v37  ;;  %v972_v46 = vpack.c.bf16 %v556_v40, %v540_v39  ;;  %v987_v47 = vpack.c.bf16 %v587_v42, %v571_v41  ;;  %v731_v37 = vld [vmem:[%s6266_s25 + $0xb28] sm:$0xff] }
 0x160   : > { %5054 = vmatprep.subr.bf16.mxu1 %v5702_v48  ;;  %v989_v48 = vpack.c.bf16 %v589_v44, %v573_v43  ;;  %v747_v38 = vld [vmem:[%s6266_s25 + $0xba8] sm:$0xff]  ;;  %v733_v39 = vld [vmem:[%s6266_s25 + $0xb38] sm:$0xff] }
 0x161   : > { %v749_v40 = vld [vmem:[%s6266_s25 + $0xbb8] sm:$0xff]  ;;  %v1067_v43 = vpack.c.bf16 %v747_v38, %v731_v37  ;;  %v810_v37 = vld [vmem:[%s6266_s25 + $0xda0] sm:$0xff]  ;;  %v796_v38 = vld [vmem:[%s6266_s25 + $0xd30] sm:$0xff] }
 0x162   : > { %4943 = vmatpush3.bf16.msra.mxu0 %v5701_v53  ;;  %v603_v53 = vld [vmem:[%s6266_s25 + $0x728] sm:$0xff]  ;;  %v1069_v44 = vpack.c.bf16 %v749_v40, %v733_v39  ;;  %v812_v40 = vld [vmem:[%s6266_s25 + $0xdb0] sm:$0xff] }
 0x163   : > { %5055 = vmatpush3.bf16.msra.mxu1 %v5703_v54  ;;  %4944 = vmatprep.subr.bf16.mxu0 %v5704_v55  ;;  %v619_v54 = vld [vmem:[%s6266_s25 + $0x7a8] sm:$0xff]  ;;  %v605_v55 = vld [vmem:[%s6266_s25 + $0x738] sm:$0xff] }
 0x164   : > { %2544 = vmatmul.mubr.bf16.gmra.mrb[72].mxu0 %v922_v56  ;;  %5056 = vmatprep.subr.bf16.mxu1 %v5706_v57  ;;  %v621_v56 = vld [vmem:[%s6266_s25 + $0x7b8] sm:$0xff]  ;;  %v986_v57 = vpack.c.bf16 %v586_v50, %v570_v49  ;;  %v763_v49 = vld [vmem:[%s6266_s25 + $0xc28] sm:$0xff] }
 0x165   : > { %2705 = vmatmul.mubr.bf16.gmra.mrb[72].mxu1 %v924_v58  ;;  %2551 = vmatprep.mubr.bf16.mxu0 %v939_v59  ;;  %v988_v58 = vpack.c.bf16 %v588_v52, %v572_v51  ;;  %v1003_v59 = vpack.c.bf16 %v619_v54, %v603_v53  ;;  %v779_v50 = vld [vmem:[%s6266_s25 + $0xca8] sm:$0xff]  ;;  %v765_v52 = vld [vmem:[%s6266_s25 + $0xc38] sm:$0xff] }
 0x166   : > { %2712 = vmatprep.mubr.bf16.mxu1 %v941_v60  ;;  %4945 = vmatpush3.bf16.msra.mxu0 %v5705_v61  ;;  %v1005_v60 = vpack.c.bf16 %v621_v56, %v605_v55  ;;  %v602_v61 = vld [vmem:[%s6266_s25 + $0x720] sm:$0xff]  ;;  %v781_v53 = vld [vmem:[%s6266_s25 + $0xcb8] sm:$0xff] }
 0x167   : > { %5057 = vmatpush3.bf16.msra.mxu1 %v5707_v62  ;;  %4946 = vmatprep.subr.bf16.mxu0 %v5708_v63  ;;  %v618_v62 = vld [vmem:[%s6266_s25 + $0x7a0] sm:$0xff]  ;;  %v604_v63 = vld [vmem:[%s6266_s25 + $0x730] sm:$0xff] }
 0x168   : > { %5058 = vmatprep.subr.bf16.mxu1 %v5710_v2  ;;  %v651_v2 = vld [vmem:[%s6266_s25 + $0x8a8] sm:$0xff]  ;;  %v1002_v5 = vpack.c.bf16 %v618_v62, %v602_v61  ;;  %v1004_v6 = vpack.c.bf16 %v620_v0, %v604_v63  ;;  %v6512_v55 = vld [vmem:[#allocation7] ss:$0 sm:$0xff]  ;;  %v1083_v62 = vpack.c.bf16 %v779_v50, %v763_v49 }
 0x169   : > { %v1019_v7 = vpack.c.bf16 %v651_v2, %v635_v1  ;;  %v1085_v2 = vpack.c.bf16 %v781_v53, %v765_v52  ;;  %v1100_v53 = vpack.c.bf16 %v812_v40, %v796_v38  ;;  %v385_v40 = vld [vmem:[%s6266_s25 + $0x58] sm:$0xff] }
 0x16a   : > { %4947 = vmatpush3.bf16.msra.mxu0 %v5709_v8  ;;  %v1021_v8 = vpack.c.bf16 %v653_v4, %v637_v3 }
 0x16b   : > { %5059 = vmatpush3.bf16.msra.mxu1 %v5711_v10  ;;  %4948 = vmatprep.subr.bf16.mxu0 %v5712_v11  ;;  %v650_v10 = vld [vmem:[%s6266_s25 + $0x8a0] sm:$0xff]  ;;  %v636_v11 = vld [vmem:[%s6266_s25 + $0x830] sm:$0xff] }
 0x16c   : > { %2552 = vmatmul.mubr.bf16.gmra.mrb[76].mxu0 %v938_v12  ;;  %5060 = vmatprep.subr.bf16.mxu1 %v5714_v13  ;;  %v652_v12 = vld [vmem:[%s6266_s25 + $0x8b0] sm:$0xff]  ;;  %v667_v13 = vld [vmem:[%s6266_s25 + $0x928] sm:$0xff] }
 0x16d   : > { %2713 = vmatmul.mubr.bf16.gmra.mrb[76].mxu1 %v940_v14  ;;  %2559 = vmatprep.mubr.bf16.mxu0 %v955_v15  ;;  %v683_v14 = vld [vmem:[%s6266_s25 + $0x9a8] sm:$0xff]  ;;  %v669_v15 = vld [vmem:[%s6266_s25 + $0x938] sm:$0xff] }
 0x16e   : > { %2720 = vmatprep.mubr.bf16.mxu1 %v957_v17  ;;  %4949 = vmatpush3.bf16.msra.mxu0 %v5713_v16  ;;  %v685_v16 = vld [vmem:[%s6266_s25 + $0x9b8] sm:$0xff]  ;;  %v1018_v17 = vpack.c.bf16 %v650_v10, %v634_v9  ;;  %v764_v9 = vld [vmem:[%s6266_s25 + $0xc30] sm:$0xff] }
 0x16f   : > { %5061 = vmatpush3.bf16.msra.mxu1 %v5715_v18  ;;  %4950 = vmatprep.subr.bf16.mxu0 %v5716_v19  ;;  %v1020_v18 = vpack.c.bf16 %v652_v12, %v636_v11  ;;  %v1035_v19 = vpack.c.bf16 %v683_v14, %v667_v13  ;;  %v1037_v20 = vpack.c.bf16 %v685_v16, %v669_v15  ;;  %v780_v12 = vld [vmem:[%s6266_s25 + $0xcb0] sm:$0xff]  ;;  %v795_v13 = vld [vmem:[%s6266_s25 + $0xd28] sm:$0xff]  ;;  %v797_v16 = vld [vmem:[%s6266_s25 + $0xd38] sm:$0xff] }
 0x170   : > { %5062 = vmatprep.subr.bf16.mxu1 %v5718_v22  ;;  %v682_v22 = vld [vmem:[%s6266_s25 + $0x9a0] sm:$0xff]  ;;  %v811_v14 = vld [vmem:[%s6266_s25 + $0xda8] sm:$0xff] }
 0x171   : > { %v1034_v29 = vpack.c.bf16 %v682_v22, %v666_v21 }
 0x172   : > { %4951 = vmatpush3.bf16.msra.mxu0 %v5717_v28  ;;  %v717_v28 = vld [vmem:[%s6266_s25 + $0xab8] sm:$0xff] }
 0x173   : > { %5063 = vmatpush3.bf16.msra.mxu1 %v5719_v30  ;;  %5160 = vmatprep.subr.bf16.mxu0 %v5720_v31  ;;  %v1036_v30 = vpack.c.bf16 %v684_v24, %v668_v23  ;;  %v1051_v31 = vpack.c.bf16 %v715_v26, %v699_v25  ;;  %v1084_v25 = vpack.c.bf16 %v780_v12, %v764_v9  ;;  %v861_v9 = vld [vmem:[%s6266_s25 + $0xf38] sm:$0xff] }
 0x174   : > { %2560 = vmatmul.mubr.bf16.gmra.mrb[80].mxu0 %v954_v32  ;;  %5272 = vmatprep.subr.bf16.mxu1 %v5722_v33  ;;  %v1053_v32 = vpack.c.bf16 %v717_v28, %v701_v27  ;;  %v698_v33 = vld [vmem:[%s6266_s25 + $0xa20] sm:$0xff]  ;;  %v1099_v26 = vpack.c.bf16 %v811_v14, %v795_v13 }
 0x175   : > { %2721 = vmatmul.mubr.bf16.gmra.mrb[80].mxu1 %v956_v34  ;;  %2567 = vmatprep.mubr.bf16.mxu0 %v971_v35  ;;  %v714_v34 = vld [vmem:[%s6266_s25 + $0xaa0] sm:$0xff]  ;;  %v700_v35 = vld [vmem:[%s6266_s25 + $0xa30] sm:$0xff] }
 0x176   : > { %2728 = vmatprep.mubr.bf16.mxu1 %v973_v36  ;;  %v716_v36 = vld [vmem:[%s6266_s25 + $0xab0] sm:$0xff]  ;;  %v1050_v41 = vpack.c.bf16 %v714_v34, %v698_v33 }
 0x177   : > { %v1052_v42 = vpack.c.bf16 %v716_v36, %v700_v35  ;;  %v794_v36 = vld [vmem:[%s6266_s25 + $0xd20] sm:$0xff] }
 0x178   : > { %v1098_v49 = vpack.c.bf16 %v810_v37, %v794_v36  ;;  %v383_v36 = vld [vmem:[%s6266_s25 + $0x48] sm:$0xff] }
 0x179   : > { %v399_v37 = vld [vmem:[%s6266_s25 + $0xc8] sm:$0xff] }
 0x17c   : > { %2568 = vmatmul.mubr.bf16.gmra.mrb[84].mxu0 %v970_v45  ;;  %v730_v45 = vld [vmem:[%s6266_s25 + $0xb20] sm:$0xff] }
 0x17d   : > { %2729 = vmatmul.mubr.bf16.gmra.mrb[84].mxu1 %v972_v46  ;;  %2575 = vmatprep.mubr.bf16.mxu0 %v987_v47  ;;  %v746_v46 = vld [vmem:[%s6266_s25 + $0xba0] sm:$0xff]  ;;  %v732_v47 = vld [vmem:[%s6266_s25 + $0xb30] sm:$0xff] }
 0x17e   : > { %2736 = vmatprep.mubr.bf16.mxu1 %v989_v48  ;;  %v748_v48 = vld [vmem:[%s6266_s25 + $0xbb0] sm:$0xff] }
 0x17f   : > { %v1068_v61 = vpack.c.bf16 %v748_v48, %v732_v47 }
 0x184   : > { %2576 = vmatmul.mubr.bf16.gmra.mrb[88].mxu0 %v986_v57  ;;  %v1066_v57 = vpack.c.bf16 %v746_v46, %v730_v45  ;;  %v845_v45 = vld [vmem:[%s6266_s25 + $0xeb8] sm:$0xff] }
 0x185   : > { %2737 = vmatmul.mubr.bf16.gmra.mrb[88].mxu1 %v988_v58  ;;  %2583 = vmatprep.mubr.bf16.mxu0 %v1003_v59 }
 0x186   : > { %2744 = vmatprep.mubr.bf16.mxu1 %v1005_v60 }
 0x18c   : > { %2584 = vmatmul.mubr.bf16.gmra.mrb[92].mxu0 %v1002_v5 }
 0x18d   : > { %2745 = vmatmul.mubr.bf16.gmra.mrb[92].mxu1 %v1004_v6  ;;  %2591 = vmatprep.mubr.bf16.mxu0 %v1019_v7  ;;  %v762_v6 = vld [vmem:[%s6266_s25 + $0xc20] sm:$0xff] }
 0x18e   : > { %2752 = vmatprep.mubr.bf16.mxu1 %v1021_v8  ;;  %v778_v7 = vld [vmem:[%s6266_s25 + $0xca0] sm:$0xff] }
 0x18f   : > { %v1082_v21 = vpack.c.bf16 %v778_v7, %v762_v6  ;;  %v859_v6 = vld [vmem:[%s6266_s25 + $0xf28] sm:$0xff] }
 0x190   : > { %v875_v7 = vld [vmem:[%s6266_s25 + $0xfa8] sm:$0xff] }
 0x194   : > { %2592 = vmatmul.mubr.bf16.gmra.mrb[96].mxu0 %v1018_v17  ;;  %v813_v17 = vld [vmem:[%s6266_s25 + $0xdb8] sm:$0xff] }
 0x195   : > { %2753 = vmatmul.mubr.bf16.gmra.mrb[96].mxu1 %v1020_v18  ;;  %2599 = vmatprep.mubr.bf16.mxu0 %v1035_v19 }
 0x196   : > { %2760 = vmatprep.mubr.bf16.mxu1 %v1037_v20 }
 0x19c   : > { %2600 = vmatmul.mubr.bf16.gmra.mrb[100].mxu0 %v1034_v29 }
 0x19d   : > { %2761 = vmatmul.mubr.bf16.gmra.mrb[100].mxu1 %v1036_v30  ;;  %2607 = vmatprep.mubr.bf16.mxu0 %v1051_v31  ;;  %v1101_v30 = vpack.c.bf16 %v813_v17, %v797_v16 }
 0x19e   : > { %2768 = vmatprep.mubr.bf16.mxu1 %v1053_v32 }
 0x1a4   : > { %2608 = vmatmul.mubr.bf16.gmra.mrb[104].mxu0 %v1050_v41  ;;  %v827_v41 = vld [vmem:[%s6266_s25 + $0xe28] sm:$0xff] }
 0x1a5   : > { %2769 = vmatmul.mubr.bf16.gmra.mrb[104].mxu1 %v1052_v42  ;;  %2615 = vmatprep.mubr.bf16.mxu0 %v1067_v43  ;;  %v843_v42 = vld [vmem:[%s6266_s25 + $0xea8] sm:$0xff] }
 0x1a6   : > { %2776 = vmatprep.mubr.bf16.mxu1 %v1069_v44  ;;  %v829_v44 = vld [vmem:[%s6266_s25 + $0xe38] sm:$0xff] }
 0x1a7   : > { %v4504_v51 = vpop.f32.mrb[0].mxu0 }
 0x1a8   : > { %v4616_v54 = vpop.f32.mrb[0].mxu1  ;;  %v4505_v56 = vpop.f32.mrb[1].mxu0 }
 0x1a9   : > { %v4506_v58 = vadd.f32 %v4505_v56, %v4504_v51  ;;  %v4617_v59 = vpop.f32.mrb[1].mxu1  ;;  %v4507_v60 = vpop.f32.mrb[2].mxu0 }
 0x1aa   : > { %v4618_v63 = vadd.f32 %v4617_v59, %v4616_v54  ;;  %v4619_v0 = vpop.f32.mrb[2].mxu1  ;;  %v4508_v1 = vpop.f32.mrb[3].mxu0  ;;  %v1115_v54 = vpack.c.bf16 %v843_v42, %v827_v41  ;;  %v1117_v59 = vpack.c.bf16 %v845_v45, %v829_v44  ;;  %v401_v41 = vld [vmem:[%s6266_s25 + $0xd8] sm:$0xff] }
 0x1ab   : > { %v2208_v3 = vadd.f32 %v4506_v58, %v6512_v55  ;;  %v4509_v4 = vadd.f32 %v4508_v1, %v4507_v60  ;;  %v4620_v5 = vpop.f32.mrb[3].mxu1  ;;  %v826_v1 = vld [vmem:[%s6266_s25 + $0xe20] sm:$0xff] }
 0x1ac   : > { %v4621_v8 = vadd.f32 %v4620_v5, %v4619_v0  ;;  %2616 = vmatmul.mubr.bf16.gmra.mrb[108].mxu0 %v1066_v57  ;;  %v844_v5 = vld [vmem:[%s6266_s25 + $0xeb0] sm:$0xff] }
 0x1ad   : > { %v2211_v10 = vadd.f32 %v4509_v4, %v6512_v55  ;;  %2777 = vmatmul.mubr.bf16.gmra.mrb[108].mxu1 %v1068_v61  ;;  %2623 = vmatprep.mubr.bf16.mxu0 %v1083_v62  ;;  %v6519_v11 = vadd.f32 %v4618_v63, %v2208_v3  ;;  %v828_v3 = vld [vmem:[%s6266_s25 + $0xe30] sm:$0xff] }
 0x1ae   : > { %2784 = vmatprep.mubr.bf16.mxu1 %v1085_v2  ;;  %v842_v2 = vld [vmem:[%s6266_s25 + $0xea0] sm:$0xff] }
 0x1af   : > { %v4510_v15 = vpop.f32.mrb[4].mxu0  ;;  %v6526_v18 = vadd.f32 %v4621_v8, %v2211_v10  ;;  %v877_v10 = vld [vmem:[%s6266_s25 + $0xfb8] sm:$0xff] }
 0x1b0   : > { %v4622_v19 = vpop.f32.mrb[4].mxu1  ;;  %v4511_v20 = vpop.f32.mrb[5].mxu0 }
 0x1b1   : > { %v4512_v22 = vadd.f32 %v4511_v20, %v4510_v15  ;;  %v4623_v23 = vpop.f32.mrb[5].mxu1  ;;  %v4513_v24 = vpop.f32.mrb[6].mxu0  ;;  %v1114_v15 = vpack.c.bf16 %v842_v2, %v826_v1  ;;  %v1116_v20 = vpack.c.bf16 %v844_v5, %v828_v3  ;;  %v384_v1 = vld [vmem:[%s6266_s25 + $0x50] sm:$0xff]  ;;  %v415_v5 = vld [vmem:[%s6266_s25 + $0x148] sm:$0xff] }
 0x1b2   : > { %v4624_v27 = vadd.f32 %v4623_v23, %v4622_v19  ;;  %v4625_v28 = vpop.f32.mrb[6].mxu1  ;;  %v4514_v29 = vpop.f32.mrb[7].mxu0  ;;  %v400_v2 = vld [vmem:[%s6266_s25 + $0xd0] sm:$0xff] }
 0x1b3   : > { %v2216_v31 = vadd.f32 %v4512_v22, %v6512_v55  ;;  %v4515_v32 = vadd.f32 %v4514_v29, %v4513_v24  ;;  %v4626_v33 = vpop.f32.mrb[7].mxu1 }
 0x1b4   : > { %v4627_v34 = vadd.f32 %v4626_v33, %v4625_v28  ;;  %2624 = vmatmul.mubr.bf16.gmra.mrb[112].mxu0 %v1082_v21  ;;  %v1131_v21 = vpack.c.bf16 %v875_v7, %v859_v6  ;;  %v860_v33 = vld [vmem:[%s6266_s25 + $0xf30] sm:$0xff]  ;;  %v431_v6 = vld [vmem:[%s6266_s25 + $0x1c8] sm:$0xff] }
 0x1b5   : > { %v2219_v35 = vadd.f32 %v4515_v32, %v6512_v55  ;;  %2785 = vmatmul.mubr.bf16.gmra.mrb[112].mxu1 %v1084_v25  ;;  %2631 = vmatprep.mubr.bf16.mxu0 %v1099_v26  ;;  %v6533_v39 = vadd.f32 %v4624_v27, %v2216_v31  ;;  %v1133_v25 = vpack.c.bf16 %v877_v10, %v861_v9  ;;  %v858_v31 = vld [vmem:[%s6266_s25 + $0xf20] sm:$0xff] }
 0x1b6   : > { %2792 = vmatprep.mubr.bf16.mxu1 %v1101_v30  ;;  %v874_v32 = vld [vmem:[%s6266_s25 + $0xfa0] sm:$0xff] }
 0x1b7   : > { %v4516_v43 = vpop.f32.mrb[8].mxu0  ;;  %v6540_v46 = vadd.f32 %v4627_v34, %v2219_v35  ;;  %v876_v35 = vld [vmem:[%s6266_s25 + $0xfb0] sm:$0xff]  ;;  %v1130_v45 = vpack.c.bf16 %v874_v32, %v858_v31  ;;  %v5724_v31 = vld [vmem:[#allocation5 + $0x348] sm:$0xff]  }
 0x1b8   : > { %v4628_v47 = vpop.f32.mrb[8].mxu1  ;;  %v4517_v48 = vpop.f32.mrb[9].mxu0 }
 0x1b9   : > { %v4518_v50 = vadd.f32 %v4517_v48, %v4516_v43  ;;  %v4629_v51 = vpop.f32.mrb[9].mxu1  ;;  %v4519_v52 = vpop.f32.mrb[10].mxu0 }
 0x1ba   : > { %v4630_v56 = vadd.f32 %v4629_v51, %v4628_v47  ;;  %v4631_v57 = vpop.f32.mrb[10].mxu1  ;;  %v4520_v58 = vpop.f32.mrb[11].mxu0  ;;  %v895_v51 = vpack.c.bf16 %v399_v37, %v383_v36  ;;  %v5726_v36 = vld [vmem:[#allocation5 + $0x3c8] sm:$0xff]  }
 0x1bb   : > { %v2224_v60 = vadd.f32 %v4518_v50, %v6512_v55  ;;  %v4521_v61 = vadd.f32 %v4520_v58, %v4519_v52  ;;  %v4632_v62 = vpop.f32.mrb[11].mxu1  ;;  %v1132_v50 = vpack.c.bf16 %v876_v35, %v860_v33  ;;  %v430_v33 = vld [vmem:[%s6266_s25 + $0x1c0] sm:$0xff]  ;;  %v416_v35 = vld [vmem:[%s6266_s25 + $0x150] sm:$0xff] }
 0x1bc   : > { %v4633_v63 = vadd.f32 %v4632_v62, %v4631_v57  ;;  %2632 = vmatmul.mubr.bf16.gmra.mrb[116].mxu0 %v1098_v49  ;;  %v382_v62 = vld [vmem:[%s6266_s25 + $0x40] sm:$0xff] }
 0x1bd   : > { %v2227_v0 = vadd.f32 %v4521_v61, %v6512_v55  ;;  %2793 = vmatmul.mubr.bf16.gmra.mrb[116].mxu1 %v1100_v53  ;;  %2639 = vmatprep.mubr.bf16.mxu0 %v1115_v54  ;;  %v6547_v4 = vadd.f32 %v4630_v56, %v2224_v60  ;;  %v897_v56 = vpack.c.bf16 %v401_v41, %v385_v40  ;;  %v447_v40 = vld [vmem:[%s6266_s25 + $0x248] sm:$0xff] }
 0x1be   : > { %2800 = vmatprep.mubr.bf16.mxu1 %v1117_v59  ;;  %v5725_v41 = vld [vmem:[#allocation5 + $0x308] sm:$0xff]  }
 0x1bf   : > { %v4522_v8 = vpop.f32.mrb[12].mxu0  ;;  %v6554_v12 = vadd.f32 %v4633_v63, %v2227_v0  ;;  %v398_v63 = vld [vmem:[%s6266_s25 + $0xc0] sm:$0xff] }
 0x1c0   : > { %v4634_v13 = vpop.f32.mrb[12].mxu1  ;;  %v4523_v14 = vpop.f32.mrb[13].mxu0  ;;  %v894_v10 = vpack.c.bf16 %v398_v63, %v382_v62 }
 0x1c1   : > { %v4524_v16 = vadd.f32 %v4523_v14, %v4522_v8  ;;  %v4635_v17 = vpop.f32.mrb[13].mxu1  ;;  %v4525_v19 = vpop.f32.mrb[14].mxu0  ;;  %v433_v14 = vld [vmem:[%s6266_s25 + $0x1d8] sm:$0xff] }
 0x1c2   : > { %v4636_v22 = vadd.f32 %v4635_v17, %v4634_v13  ;;  %v4637_v23 = vpop.f32.mrb[14].mxu1  ;;  %v4526_v24 = vpop.f32.mrb[15].mxu0  ;;  %v417_v13 = vld [vmem:[%s6266_s25 + $0x158] sm:$0xff] }
 0x1c3   : > { %v2232_v26 = vadd.f32 %v4524_v16, %v6512_v55  ;;  %v4527_v27 = vadd.f32 %v4526_v24, %v4525_v19  ;;  %v4638_v28 = vpop.f32.mrb[15].mxu1  ;;  %v896_v19 = vpack.c.bf16 %v400_v2, %v384_v1  ;;  %v5723_v24 = vld [vmem:[#allocation5 + $0x380] sm:$0xff]  }
 0x1c4   : > { %v4639_v29 = vadd.f32 %v4638_v28, %v4637_v23  ;;  %2640 = vmatmul.mubr.bf16.gmra.mrb[120].mxu0 %v1114_v15 }
 0x1c5   : > { %v2235_v30 = vadd.f32 %v4527_v27, %v6512_v55  ;;  %2801 = vmatmul.mubr.bf16.gmra.mrb[120].mxu1 %v1116_v20  ;;  %2647 = vmatprep.mubr.bf16.mxu0 %v1131_v21  ;;  %v6561_v34 = vadd.f32 %v4636_v22, %v2232_v26  ;;  %v5721_v20 = vld [vmem:[#allocation5 + $0x300] sm:$0xff]  }
 0x1c6   : > { %2808 = vmatprep.mubr.bf16.mxu1 %v1133_v25  ;;  %v911_v25 = vpack.c.bf16 %v431_v6, %v415_v5 }
 0x1c7   : > { %v4528_v38 = vpop.f32.mrb[16].mxu0  ;;  %v6568_v42 = vadd.f32 %v4639_v29, %v2235_v30  ;;  %v913_v29 = vpack.c.bf16 %v433_v14, %v417_v13  ;;  %v414_v30 = vld [vmem:[%s6266_s25 + $0x140] sm:$0xff] }
 0x1c8   : > { %v4640_v43 = vpop.f32.mrb[16].mxu1  ;;  %v4529_v44 = vpop.f32.mrb[17].mxu0  ;;  %v446_v14 = vld [vmem:[%s6266_s25 + $0x240] sm:$0xff] }
 0x1c9   : > { %v4530_v47 = vadd.f32 %v4529_v44, %v4528_v38  ;;  %v4641_v48 = vpop.f32.mrb[17].mxu1  ;;  %v4531_v49 = vpop.f32.mrb[18].mxu0  ;;  %v432_v38 = vld [vmem:[%s6266_s25 + $0x1d0] sm:$0xff]  ;;  %v463_v44 = vld [vmem:[%s6266_s25 + $0x2c8] sm:$0xff] }
 0x1ca   : > { %v4642_v52 = vadd.f32 %v4641_v48, %v4640_v43  ;;  %v4643_v53 = vpop.f32.mrb[18].mxu1  ;;  %v4532_v54 = vpop.f32.mrb[19].mxu0 }
 0x1cb   : > { %v2240_v57 = vadd.f32 %v4530_v47, %v6512_v55  ;;  %v4533_v58 = vadd.f32 %v4532_v54, %v4531_v49  ;;  %v4644_v59 = vpop.f32.mrb[19].mxu1  ;;  %v5728_v47 = vld [vmem:[#allocation5 + $0x350] sm:$0xff]   ;;  %v449_v49 = vld [vmem:[%s6266_s25 + $0x258] sm:$0xff] }
 0x1cc   : > { %v4645_v60 = vadd.f32 %v4644_v59, %v4643_v53  ;;  %2648 = vmatmul.mubr.bf16.gmra.mrb[124].mxu0 %v1130_v45  ;;  %v5727_v45 = vld [vmem:[#allocation5 + $0x388] sm:$0xff]  }
 0x1cd   : > { %v2243_v61 = vadd.f32 %v4533_v58, %v6512_v55  ;;  %2809 = vmatmul.mubr.bf16.gmra.mrb[124].mxu1 %v1132_v50  ;;  %2849 = vmatprep.mubr.bf16.mxu0 %v895_v51  ;;  %v6574_v0 = vadd.f32 %v4642_v52, %v2240_v57  ;;  %v465_v50 = vld [vmem:[%s6266_s25 + $0x2d8] sm:$0xff]  ;;  %v5730_v51 = vld [vmem:[#allocation5 + $0x3d0] sm:$0xff]  }
 0x1ce   : > { %3010 = vmatprep.mubr.bf16.mxu1 %v897_v56  ;;  %v910_v56 = vpack.c.bf16 %v430_v33, %v414_v30  ;;  %v929_v2 = vpack.c.bf16 %v465_v50, %v449_v49  ;;  %v5737_v49 = vld [vmem:[#allocation5 + $0x320] sm:$0xff]  }
 0x1cf   : > { %v4534_v3 = vpop.f32.mrb[20].mxu0  ;;  %v6580_v7 = vadd.f32 %v4645_v60, %v2243_v61  ;;  %v912_v60 = vpack.c.bf16 %v432_v38, %v416_v35  ;;  %v927_v61 = vpack.c.bf16 %v463_v44, %v447_v40  ;;  %v5738_v35 = vld [vmem:[#allocation5 + $0x3e0] sm:$0xff]  }
 0x1d0   : > { %v4646_v8 = vpop.f32.mrb[20].mxu1  ;;  %v4535_v9 = vpop.f32.mrb[21].mxu0 }
 0x1d1   : > { %v4536_v15 = vadd.f32 %v4535_v9, %v4534_v3  ;;  %v4647_v16 = vpop.f32.mrb[21].mxu1  ;;  %v4537_v17 = vpop.f32.mrb[22].mxu0  ;;  %v5729_v3 = vld [vmem:[#allocation5 + $0x310] sm:$0xff]  }
 0x1d2   : > { %v4648_v21 = vadd.f32 %v4647_v16, %v4646_v8  ;;  %v4649_v22 = vpop.f32.mrb[22].mxu1  ;;  %v4538_v23 = vpop.f32.mrb[23].mxu0  ;;  %v5731_v9 = vld [vmem:[#allocation5 + $0x390] sm:$0xff]   ;;  %v5734_v16 = vld [vmem:[#allocation5 + $0x3d8] sm:$0xff]  }
 0x1d3   : > { %v2248_v26 = vadd.f32 %v4536_v15, %v6512_v55  ;;  %v4539_v27 = vadd.f32 %v4538_v23, %v4537_v17  ;;  %v4650_v28 = vpop.f32.mrb[23].mxu1  ;;  %v462_v15 = vld [vmem:[%s6266_s25 + $0x2c0] sm:$0xff]  ;;  %v495_v23 = vld [vmem:[%s6266_s25 + $0x3c8] sm:$0xff] }
 0x1d4   : > { %v4651_v32 = vadd.f32 %v4650_v28, %v4649_v22  ;;  %2850 = vmatmul.mubr.bf16.vlgmr.msra.gmra.mrb[128].mxu0 %v894_v10  ;;  %v5732_v10 = vld [vmem:[#allocation5 + $0x358] sm:$0xff]   ;;  %v926_v33 = vpack.c.bf16 %v462_v15, %v446_v14 }
 0x1d5   : > { %v2251_v37 = vadd.f32 %v4539_v27, %v6512_v55  ;;  %3011 = vmatmul.mubr.bf16.vlgmr.msra.gmra.mrb[128].mxu1 %v896_v19  ;;  %5161 = vmatpush3.bf16.msra.mxu0 %v5721_v20  ;;  %v6591_v43 = vadd.f32 %v4648_v21, %v2248_v26  ;;  %v448_v19 = vld [vmem:[%s6266_s25 + $0x250] sm:$0xff]  ;;  %v479_v21 = vld [vmem:[%s6266_s25 + $0x348] sm:$0xff]  ;;  %v497_v27 = vld [vmem:[%s6266_s25 + $0x3d8] sm:$0xff] }
 0x1d6   : > { %5273 = vmatpush3.bf16.msra.mxu1 %v5723_v24  ;;  %2857 = vmatprep.mubr.bf16.mxu0 %v911_v25  ;;  %v464_v20 = vld [vmem:[%s6266_s25 + $0x2d0] sm:$0xff]  ;;  %v481_v24 = vld [vmem:[%s6266_s25 + $0x358] sm:$0xff] }
 0x1d7   : > { %v4540_v48 = vpop.f32.mrb[24].mxu0  ;;  %3018 = vmatprep.mubr.bf16.mxu1 %v913_v29  ;;  %5162 = vmatprep.subr.bf16.mxu0 %v5724_v31  ;;  %v6596_v52 = vadd.f32 %v4651_v32, %v2251_v37  ;;  %v5733_v25 = vld [vmem:[#allocation5 + $0x318] sm:$0xff]   ;;  %v5736_v29 = vld [vmem:[#allocation5 + $0x360] sm:$0xff]   ;;  %v928_v40 = vpack.c.bf16 %v464_v20, %v448_v19  ;;  %v5746_v19 = vld [vmem:[#allocation5 + $0x3f0] sm:$0xff]  }
 0x1d8   : > { %v4652_v53 = vpop.f32.mrb[24].mxu1  ;;  %v4541_v54 = vpop.f32.mrb[25].mxu0  ;;  %5274 = vmatprep.subr.bf16.mxu1 %v5726_v36  ;;  %v5735_v28 = vld [vmem:[#allocation5 + $0x398] sm:$0xff]  }
 0x1d9   : > { %v4542_v57 = vadd.f32 %v4541_v54, %v4540_v48  ;;  %v4653_v58 = vpop.f32.mrb[25].mxu1  ;;  %v4543_v59 = vpop.f32.mrb[26].mxu0  ;;  %5163 = vmatpush3.bf16.msra.mxu0 %v5725_v41  ;;  %v943_v41 = vpack.c.bf16 %v495_v23, %v479_v21  ;;  %v945_v48 = vpack.c.bf16 %v497_v27, %v481_v24  ;;  %v5739_v54 = vld [vmem:[#allocation5 + $0x3a0] sm:$0xff]  }
 0x1da   : > { %v4654_v62 = vadd.f32 %v4653_v58, %v4652_v53  ;;  %v4655_v63 = vpop.f32.mrb[26].mxu1  ;;  %v4544_v1 = vpop.f32.mrb[27].mxu0  ;;  %5275 = vmatpush3.bf16.msra.mxu1 %v5727_v45  ;;  %5164 = vmatprep.subr.bf16.mxu0 %v5728_v47  ;;  %v478_v58 = vld [vmem:[%s6266_s25 + $0x340] sm:$0xff] }
 0x1db   : > { %v2256_v5 = vadd.f32 %v4542_v57, %v6512_v55  ;;  %v4545_v6 = vadd.f32 %v4544_v1, %v4543_v59  ;;  %v4656_v8 = vpop.f32.mrb[27].mxu1  ;;  %5276 = vmatprep.subr.bf16.mxu1 %v5730_v51  ;;  %v494_v59 = vld [vmem:[%s6266_s25 + $0x3c0] sm:$0xff]  ;;  %v511_v1 = vld [vmem:[%s6266_s25 + $0x448] sm:$0xff] }
 0x1dc   : > { %v4657_v13 = vadd.f32 %v4656_v8, %v4655_v63  ;;  %2858 = vmatmul.mubr.bf16.gmra.mrb[132].mxu0 %v910_v56  ;;  %v5740_v56 = vld [vmem:[#allocation5 + $0x368] sm:$0xff]   ;;  %v496_v63 = vld [vmem:[%s6266_s25 + $0x3d0] sm:$0xff] }
 0x1dd   : > { %v2259_v17 = vadd.f32 %v4545_v6, %v6512_v55  ;;  %3019 = vmatmul.mubr.bf16.gmra.mrb[132].mxu1 %v912_v60  ;;  %2865 = vmatprep.mubr.bf16.mxu0 %v927_v61  ;;  %v6605_v22 = vadd.f32 %v4654_v62, %v2256_v5  ;;  %v5742_v60 = vld [vmem:[#allocation5 + $0x3e8] sm:$0xff]   ;;  %v480_v62 = vld [vmem:[%s6266_s25 + $0x350] sm:$0xff]  ;;  %v513_v5 = vld [vmem:[%s6266_s25 + $0x458] sm:$0xff] }
 0x1de   : > { %3026 = vmatprep.mubr.bf16.mxu1 %v929_v2  ;;  %5165 = vmatpush3.bf16.msra.mxu0 %v5729_v3  ;;  %v527_v3 = vld [vmem:[%s6266_s25 + $0x4c8] sm:$0xff]  ;;  %v944_v24 = vpack.c.bf16 %v496_v63, %v480_v62 }
 0x1df   : > { %v4546_v26 = vpop.f32.mrb[28].mxu0  ;;  %5277 = vmatpush3.bf16.msra.mxu1 %v5731_v9  ;;  %5166 = vmatprep.subr.bf16.mxu0 %v5732_v10  ;;  %v6610_v30 = vadd.f32 %v4657_v13, %v2259_v17  ;;  %v5741_v6 = vld [vmem:[#allocation5 + $0x328] sm:$0xff]   ;;  %v529_v9 = vld [vmem:[%s6266_s25 + $0x4d8] sm:$0xff]  ;;  %v5744_v13 = vld [vmem:[#allocation5 + $0x370] sm:$0xff]   ;;  %v942_v17 = vpack.c.bf16 %v494_v59, %v478_v58 }
 0x1e0   : > { %v4658_v31 = vpop.f32.mrb[28].mxu1  ;;  %v4547_v32 = vpop.f32.mrb[29].mxu0  ;;  %5278 = vmatprep.subr.bf16.mxu1 %v5734_v16  ;;  %v5743_v10 = vld [vmem:[#allocation5 + $0x3a8] sm:$0xff]   ;;  %v561_v58 = vld [vmem:[%s6266_s25 + $0x5d8] sm:$0xff] }
 0x1e1   : > { %v4548_v36 = vadd.f32 %v4547_v32, %v4546_v26  ;;  %v4659_v37 = vpop.f32.mrb[29].mxu1  ;;  %v4549_v38 = vpop.f32.mrb[30].mxu0  ;;  %v5751_v59 = vld [vmem:[#allocation5 + $0x3b8] sm:$0xff]  }
 0x1e2   : > { %v4660_v44 = vadd.f32 %v4659_v37, %v4658_v31  ;;  %v4661_v45 = vpop.f32.mrb[30].mxu1  ;;  %v4550_v47 = vpop.f32.mrb[31].mxu0  ;;  %5167 = vmatpush3.bf16.msra.mxu0 %v5733_v25  ;;  %v959_v25 = vpack.c.bf16 %v527_v3, %v511_v1  ;;  %v5745_v31 = vld [vmem:[#allocation5 + $0x330] sm:$0xff]   ;;  %v5748_v37 = vld [vmem:[#allocation5 + $0x378] sm:$0xff]  }
 0x1e3   : > { %v2264_v50 = vadd.f32 %v4548_v36, %v6512_v55  ;;  %v4551_v51 = vadd.f32 %v4550_v47, %v4549_v38  ;;  %v4662_v53 = vpop.f32.mrb[31].mxu1  ;;  %5279 = vmatpush3.bf16.msra.mxu1 %v5735_v28  ;;  %5168 = vmatprep.subr.bf16.mxu0 %v5736_v29  ;;  %v961_v29 = vpack.c.bf16 %v529_v9, %v513_v5  ;;  %v5747_v36 = vld [vmem:[#allocation5 + $0x3b0] sm:$0xff]   ;;  %v526_v47 = vld [vmem:[%s6266_s25 + $0x4c0] sm:$0xff] }
 0x1e4   : > { %v4663_v57 = vadd.f32 %v4662_v53, %v4661_v45  ;;  %2866 = vmatmul.mubr.bf16.gmra.mrb[136].mxu0 %v926_v33  ;;  %5280 = vmatprep.subr.bf16.mxu1 %v5738_v35  ;;  %v5749_v53 = vld [vmem:[#allocation5 + $0x338] sm:$0xff]  }
 0x1e5   : > { %v2267_v61 = vadd.f32 %v4551_v51, %v6512_v55  ;;  %3027 = vmatmul.mubr.bf16.gmra.mrb[136].mxu1 %v928_v40  ;;  %2873 = vmatprep.mubr.bf16.mxu0 %v943_v41  ;;  %v6619_v2 = vadd.f32 %v4660_v44, %v2264_v50  ;;  %v510_v40 = vld [vmem:[%s6266_s25 + $0x440] sm:$0xff]  ;;  %v5750_v41 = vld [vmem:[#allocation5 + $0x3f8] sm:$0xff]   ;;  %v543_v50 = vld [vmem:[%s6266_s25 + $0x548] sm:$0xff] }
 0x1e6   : > { %3034 = vmatprep.mubr.bf16.mxu1 %v945_v48  ;;  %5169 = vmatpush3.bf16.msra.mxu0 %v5737_v49  ;;  %v512_v48 = vld [vmem:[%s6266_s25 + $0x450] sm:$0xff]  ;;  %v559_v51 = vld [vmem:[%s6266_s25 + $0x5c8] sm:$0xff]  ;;  %v958_v62 = vpack.c.bf16 %v526_v47, %v510_v40 }
 0x1e7   : > { %v4552_v8 = vpop.f32.mrb[32].mxu0  ;;  %5281 = vmatpush3.bf16.msra.mxu1 %v5739_v54  ;;  %5170 = vmatprep.subr.bf16.mxu0 %v5740_v56  ;;  %v6624_v14 = vadd.f32 %v4663_v57, %v2267_v61  ;;  %v528_v49 = vld [vmem:[%s6266_s25 + $0x4d0] sm:$0xff]  ;;  %v545_v57 = vld [vmem:[%s6266_s25 + $0x558] sm:$0xff] }
 0x1e8   : > { %v4664_v15 = vpop.f32.mrb[32].mxu1  ;;  %v4553_v16 = vpop.f32.mrb[33].mxu0  ;;  %5282 = vmatprep.subr.bf16.mxu1 %v5742_v60  ;;  %v960_v5 = vpack.c.bf16 %v528_v49, %v512_v48 }
 0x1e9   : > { %v4554_v20 = vadd.f32 %v4553_v16, %v4552_v8  ;;  %v4665_v21 = vpop.f32.mrb[33].mxu1  ;;  %v4555_v23 = vpop.f32.mrb[34].mxu0 }
 0x1ea   : > { %v4666_v26 = vadd.f32 %v4665_v21, %v4664_v15  ;;  %v4667_v27 = vpop.f32.mrb[34].mxu1  ;;  %v4556_v28 = vpop.f32.mrb[35].mxu0  ;;  %5171 = vmatpush3.bf16.msra.mxu0 %v5741_v6  ;;  %v975_v6 = vpack.c.bf16 %v559_v51, %v543_v50 }
 0x1eb   : > { %v2272_v32 = vadd.f32 %v4554_v20, %v6512_v55  ;;  %v4557_v33 = vadd.f32 %v4556_v28, %v4555_v23  ;;  %v4668_v35 = vpop.f32.mrb[35].mxu1  ;;  %5283 = vmatpush3.bf16.msra.mxu1 %v5743_v10  ;;  %5172 = vmatprep.subr.bf16.mxu0 %v5744_v13  ;;  %v977_v13 = vpack.c.bf16 %v561_v58, %v545_v57  ;;  %v542_v23 = vld [vmem:[%s6266_s25 + $0x540] sm:$0xff]  ;;  %v591_v28 = vld [vmem:[%s6266_s25 + $0x6c8] sm:$0xff] }
 0x1ec   : > { %v4669_v38 = vadd.f32 %v4668_v35, %v4667_v27  ;;  %2874 = vmatmul.mubr.bf16.gmra.mrb[140].mxu0 %v942_v17  ;;  %5284 = vmatprep.subr.bf16.mxu1 %v5746_v19  ;;  %v575_v27 = vld [vmem:[%s6266_s25 + $0x648] sm:$0xff] }
 0x1ed   : > { %v6628_v44 = vadd.f32 %v4666_v26, %v2272_v32  ;;  %v2275_v45 = vadd.f32 %v4557_v33, %v6512_v55  ;;  %3035 = vmatmul.mubr.bf16.gmra.mrb[140].mxu1 %v944_v24  ;;  %2881 = vmatprep.mubr.bf16.mxu0 %v959_v25  ;;  %v558_v24 = vld [vmem:[%s6266_s25 + $0x5c0] sm:$0xff]  ;;  %v544_v25 = vld [vmem:[%s6266_s25 + $0x550] sm:$0xff]  ;;  %v577_v32 = vld [vmem:[%s6266_s25 + $0x658] sm:$0xff]  ;;  %v991_v47 = vpack.c.bf16 %v591_v28, %v575_v27 }
 0x1ee   : > { %3042 = vmatprep.mubr.bf16.mxu1 %v961_v29  ;;  %5173 = vmatpush3.bf16.msra.mxu0 %v5745_v31  ;;  %v560_v26 = vld [vmem:[%s6266_s25 + $0x5d0] sm:$0xff]  ;;  %v593_v33 = vld [vmem:[%s6266_s25 + $0x6d8] sm:$0xff] }
 0x1ef   : > { %v6636_v54 = vadd.f32 %v4669_v38, %v2275_v45  ;;  %v4558_v56 = vpop.f32.mrb[36].mxu0  ;;  %5285 = vmatpush3.bf16.msra.mxu1 %v5747_v36  ;;  %5174 = vmatprep.subr.bf16.mxu0 %v5748_v37  ;;  %v974_v37 = vpack.c.bf16 %v558_v24, %v542_v23  ;;  %v976_v45 = vpack.c.bf16 %v560_v26, %v544_v25 }
 0x1f0   : > { %v4670_v60 = vpop.f32.mrb[36].mxu1  ;;  %v4559_v61 = vpop.f32.mrb[37].mxu0  ;;  %5286 = vmatprep.subr.bf16.mxu1 %v5750_v41  ;;  %v993_v51 = vpack.c.bf16 %v593_v33, %v577_v32 }
 0x1f1   : > { %v4560_v63 = vadd.f32 %v4559_v61, %v4558_v56  ;;  %v4671_v1 = vpop.f32.mrb[37].mxu1  ;;  %v4561_v3 = vpop.f32.mrb[38].mxu0  ;;  %v574_v61 = vld [vmem:[%s6266_s25 + $0x640] sm:$0xff] }
 0x1f2   : > { %v4672_v8 = vadd.f32 %v4671_v1, %v4670_v60  ;;  %v4673_v9 = vpop.f32.mrb[38].mxu1  ;;  %v4562_v10 = vpop.f32.mrb[39].mxu0  ;;  %5175 = vmatpush3.bf16.msra.mxu0 %v5749_v53  ;;  %v592_v1 = vld [vmem:[%s6266_s25 + $0x6d0] sm:$0xff] }
 0x1f3   : > { %v2280_v15 = vadd.f32 %v4560_v63, %v6512_v55  ;;  %v4563_v16 = vadd.f32 %v4562_v10, %v4561_v3  ;;  %v4674_v17 = vpop.f32.mrb[39].mxu1  ;;  %5287 = vmatpush3.bf16.msra.mxu1 %v5751_v59  ;;  %v576_v63 = vld [vmem:[%s6266_s25 + $0x650] sm:$0xff]  ;;  %v607_v3 = vld [vmem:[%s6266_s25 + $0x748] sm:$0xff]  ;;  %v625_v10 = vld [vmem:[%s6266_s25 + $0x7d8] sm:$0xff] }
 0x1f4   : > { %v4675_v19 = vadd.f32 %v4674_v17, %v4673_v9  ;;  %2882 = vmatmul.mubr.bf16.gmra.mrb[144].mxu0 %v958_v62  ;;  %v590_v62 = vld [vmem:[%s6266_s25 + $0x6c0] sm:$0xff]  ;;  %v609_v9 = vld [vmem:[%s6266_s25 + $0x758] sm:$0xff]  ;;  %v992_v23 = vpack.c.bf16 %v592_v1, %v576_v63 }
 0x1f5   : > { %v6641_v20 = vadd.f32 %v4672_v8, %v2280_v15  ;;  %v2283_v21 = vadd.f32 %v4563_v16, %v6512_v55  ;;  %3043 = vmatmul.mubr.bf16.gmra.mrb[144].mxu1 %v960_v5  ;;  %2889 = vmatprep.mubr.bf16.mxu0 %v975_v6  ;;  %v623_v5 = vld [vmem:[%s6266_s25 + $0x7c8] sm:$0xff]  ;;  %v990_v16 = vpack.c.bf16 %v590_v62, %v574_v61 }
 0x1f6   : > { %3050 = vmatprep.mubr.bf16.mxu1 %v977_v13  ;;  %v1007_v24 = vpack.c.bf16 %v623_v5, %v607_v3  ;;  %v1009_v28 = vpack.c.bf16 %v625_v10, %v609_v9 }
 0x1f7   : > { %v6650_v29 = vadd.f32 %v4675_v19, %v2283_v21  ;;  %v4564_v31 = vpop.f32.mrb[40].mxu0 }
 0x1f8   : > { %v4676_v35 = vpop.f32.mrb[40].mxu1  ;;  %v4565_v36 = vpop.f32.mrb[41].mxu0 }
 0x1f9   : > { %v4566_v38 = vadd.f32 %v4565_v36, %v4564_v31  ;;  %v4677_v40 = vpop.f32.mrb[41].mxu1  ;;  %v4567_v41 = vpop.f32.mrb[42].mxu0 }
 0x1fa   : > { %v4678_v48 = vadd.f32 %v4677_v40, %v4676_v35  ;;  %v4679_v49 = vpop.f32.mrb[42].mxu1  ;;  %v4568_v50 = vpop.f32.mrb[43].mxu0  ;;  %v622_v40 = vld [vmem:[%s6266_s25 + $0x7c0] sm:$0xff] }
 0x1fb   : > { %v2288_v53 = vadd.f32 %v4566_v38, %v6512_v55  ;;  %v4569_v56 = vadd.f32 %v4568_v50, %v4567_v41  ;;  %v4680_v57 = vpop.f32.mrb[43].mxu1  ;;  %v606_v38 = vld [vmem:[%s6266_s25 + $0x740] sm:$0xff]  ;;  %v608_v41 = vld [vmem:[%s6266_s25 + $0x750] sm:$0xff] }
 0x1fc   : > { %v4681_v58 = vadd.f32 %v4680_v57, %v4679_v49  ;;  %2890 = vmatmul.mubr.bf16.gmra.mrb[148].mxu0 %v974_v37 }
 0x1fd   : > { %v6655_v59 = vadd.f32 %v4678_v48, %v2288_v53  ;;  %v2291_v60 = vadd.f32 %v4569_v56, %v6512_v55  ;;  %3051 = vmatmul.mubr.bf16.gmra.mrb[148].mxu1 %v976_v45  ;;  %2897 = vmatprep.mubr.bf16.mxu0 %v991_v47  ;;  %v624_v45 = vld [vmem:[%s6266_s25 + $0x7d0] sm:$0xff]  ;;  %v639_v47 = vld [vmem:[%s6266_s25 + $0x848] sm:$0xff]  ;;  %v657_v53 = vld [vmem:[%s6266_s25 + $0x8d8] sm:$0xff] }
 0x1fe   : > { %3058 = vmatprep.mubr.bf16.mxu1 %v993_v51  ;;  %v655_v48 = vld [vmem:[%s6266_s25 + $0x8c8] sm:$0xff]  ;;  %v641_v51 = vld [vmem:[%s6266_s25 + $0x858] sm:$0xff]  ;;  %v1008_v63 = vpack.c.bf16 %v624_v45, %v608_v41 }
 0x1ff   : > { %v6664_v6 = vadd.f32 %v4681_v58, %v2291_v60  ;;  %v4570_v8 = vpop.f32.mrb[44].mxu0  ;;  %v1006_v58 = vpack.c.bf16 %v622_v40, %v606_v38  ;;  %v1023_v1 = vpack.c.bf16 %v655_v48, %v639_v47  ;;  %v1025_v9 = vpack.c.bf16 %v657_v53, %v641_v51 }
 0x200   : > { %v4682_v13 = vpop.f32.mrb[44].mxu1  ;;  %v4571_v15 = vpop.f32.mrb[45].mxu0 }
 0x201   : > { %v4572_v17 = vadd.f32 %v4571_v15, %v4570_v8  ;;  %v4683_v19 = vpop.f32.mrb[45].mxu1  ;;  %v4573_v21 = vpop.f32.mrb[46].mxu0 }
 0x202   : > { %v4684_v25 = vadd.f32 %v4683_v19, %v4682_v13  ;;  %v4685_v26 = vpop.f32.mrb[46].mxu1  ;;  %v4574_v27 = vpop.f32.mrb[47].mxu0 }
 0x203   : > { %v2296_v31 = vadd.f32 %v4572_v17, %v6512_v55  ;;  %v4575_v32 = vadd.f32 %v4574_v27, %v4573_v21  ;;  %v4686_v33 = vpop.f32.mrb[47].mxu1  ;;  %v638_v21 = vld [vmem:[%s6266_s25 + $0x840] sm:$0xff]  ;;  %v687_v27 = vld [vmem:[%s6266_s25 + $0x9c8] sm:$0xff] }
 0x204   : > { %v4687_v35 = vadd.f32 %v4686_v33, %v4685_v26  ;;  %2898 = vmatmul.mubr.bf16.gmra.mrb[152].mxu0 %v990_v16  ;;  %v671_v26 = vld [vmem:[%s6266_s25 + $0x948] sm:$0xff]  ;;  %v689_v33 = vld [vmem:[%s6266_s25 + $0x9d8] sm:$0xff] }
 0x205   : > { %v6669_v36 = vadd.f32 %v4684_v25, %v2296_v31  ;;  %v2299_v37 = vadd.f32 %v4575_v32, %v6512_v55  ;;  %3059 = vmatmul.mubr.bf16.gmra.mrb[152].mxu1 %v992_v23  ;;  %2905 = vmatprep.mubr.bf16.mxu0 %v1007_v24  ;;  %v654_v23 = vld [vmem:[%s6266_s25 + $0x8c0] sm:$0xff]  ;;  %v640_v24 = vld [vmem:[%s6266_s25 + $0x850] sm:$0xff]  ;;  %v673_v32 = vld [vmem:[%s6266_s25 + $0x958] sm:$0xff]  ;;  %v1039_v48 = vpack.c.bf16 %v687_v27, %v671_v26 }
 0x206   : > { %3066 = vmatprep.mubr.bf16.mxu1 %v1009_v28  ;;  %v656_v25 = vld [vmem:[%s6266_s25 + $0x8d0] sm:$0xff]  ;;  %v1022_v38 = vpack.c.bf16 %v654_v23, %v638_v21 }
 0x207   : > { %v6678_v49 = vadd.f32 %v4687_v35, %v2299_v37  ;;  %v4576_v50 = vpop.f32.mrb[48].mxu0  ;;  %v1024_v47 = vpack.c.bf16 %v656_v25, %v640_v24 }
 0x208   : > { %v4688_v56 = vpop.f32.mrb[48].mxu1  ;;  %v4577_v57 = vpop.f32.mrb[49].mxu0 }
 0x209   : > { %v4578_v60 = vadd.f32 %v4577_v57, %v4576_v50  ;;  %v4689_v61 = vpop.f32.mrb[49].mxu1  ;;  %v4579_v62 = vpop.f32.mrb[50].mxu0 }
 0x20a   : > { %v4690_v3 = vadd.f32 %v4689_v61, %v4688_v56  ;;  %v4691_v5 = vpop.f32.mrb[50].mxu1  ;;  %v4580_v8 = vpop.f32.mrb[51].mxu0  ;;  %v1041_v56 = vpack.c.bf16 %v689_v33, %v673_v32 }
 0x20b   : > { %v2304_v10 = vadd.f32 %v4578_v60, %v6512_v55  ;;  %v4581_v13 = vadd.f32 %v4580_v8, %v4579_v62  ;;  %v4692_v15 = vpop.f32.mrb[51].mxu1  ;;  %v688_v8 = vld [vmem:[%s6266_s25 + $0x9d0] sm:$0xff] }
 0x20c   : > { %v4693_v16 = vadd.f32 %v4692_v15, %v4691_v5  ;;  %2906 = vmatmul.mubr.bf16.gmra.mrb[156].mxu0 %v1006_v58  ;;  %v672_v5 = vld [vmem:[%s6266_s25 + $0x950] sm:$0xff] }
 0x20d   : > { %v6683_v17 = vadd.f32 %v4690_v3, %v2304_v10  ;;  %v2307_v19 = vadd.f32 %v4581_v13, %v6512_v55  ;;  %3067 = vmatmul.mubr.bf16.gmra.mrb[156].mxu1 %v1008_v63  ;;  %2913 = vmatprep.mubr.bf16.mxu0 %v1023_v1  ;;  %v670_v1 = vld [vmem:[%s6266_s25 + $0x940] sm:$0xff]  ;;  %v719_v10 = vld [vmem:[%s6266_s25 + $0xac8] sm:$0xff]  ;;  %v1040_v27 = vpack.c.bf16 %v688_v8, %v672_v5 }
 0x20e   : > { %3074 = vmatprep.mubr.bf16.mxu1 %v1025_v9  ;;  %v686_v3 = vld [vmem:[%s6266_s25 + $0x9c0] sm:$0xff]  ;;  %v703_v9 = vld [vmem:[%s6266_s25 + $0xa48] sm:$0xff] }
 0x20f   : > { %v6692_v28 = vadd.f32 %v4693_v16, %v2307_v19  ;;  %v4582_v31 = vpop.f32.mrb[52].mxu0  ;;  %v705_v16 = vld [vmem:[%s6266_s25 + $0xa58] sm:$0xff]  ;;  %v1038_v24 = vpack.c.bf16 %v686_v3, %v670_v1 }
 0x210   : > { %v4694_v35 = vpop.f32.mrb[52].mxu1  ;;  %v4583_v37 = vpop.f32.mrb[53].mxu0  ;;  %v721_v19 = vld [vmem:[%s6266_s25 + $0xad8] sm:$0xff] }
 0x211   : > { %v4584_v40 = vadd.f32 %v4583_v37, %v4582_v31  ;;  %v4695_v41 = vpop.f32.mrb[53].mxu1  ;;  %v4585_v45 = vpop.f32.mrb[54].mxu0  ;;  %v1055_v31 = vpack.c.bf16 %v719_v10, %v703_v9  ;;  %v1057_v37 = vpack.c.bf16 %v721_v19, %v705_v16  ;;  %v737_v1 = vld [vmem:[%s6266_s25 + $0xb58] sm:$0xff] }
 0x212   : > { %v4696_v50 = vadd.f32 %v4695_v41, %v4694_v35  ;;  %v4697_v51 = vpop.f32.mrb[54].mxu1  ;;  %v4586_v53 = vpop.f32.mrb[55].mxu0  ;;  %v753_v3 = vld [vmem:[%s6266_s25 + $0xbd8] sm:$0xff] }
 0x213   : > { %v2312_v57 = vadd.f32 %v4584_v40, %v6512_v55  ;;  %v4587_v58 = vadd.f32 %v4586_v53, %v4585_v45  ;;  %v4698_v60 = vpop.f32.mrb[55].mxu1  ;;  %v718_v53 = vld [vmem:[%s6266_s25 + $0xac0] sm:$0xff] }
 0x214   : > { %v4699_v61 = vadd.f32 %v4698_v60, %v4697_v51  ;;  %2914 = vmatmul.mubr.bf16.gmra.mrb[160].mxu0 %v1022_v38  ;;  %v5768_v38 = vld [vmem:[#allocation7] ss:$0 sm:$0xff]  ;;  %v751_v60 = vld [vmem:[%s6266_s25 + $0xbc8] sm:$0xff] }
 0x215   : > { %v6697_v62 = vadd.f32 %v4696_v50, %v2312_v57  ;;  %v2315_v63 = vadd.f32 %v4587_v58, %v6512_v55  ;;  %3075 = vmatmul.mubr.bf16.gmra.mrb[160].mxu1 %v1024_v47  ;;  %2921 = vmatprep.mubr.bf16.mxu0 %v1039_v48  ;;  %v702_v51 = vld [vmem:[%s6266_s25 + $0xa40] sm:$0xff]  ;;  %v720_v57 = vld [vmem:[%s6266_s25 + $0xad0] sm:$0xff]  ;;  %v735_v58 = vld [vmem:[%s6266_s25 + $0xb48] sm:$0xff] }
 0x216   : > { %3082 = vmatprep.mubr.bf16.mxu1 %v1041_v56  ;;  %v704_v56 = vld [vmem:[%s6266_s25 + $0xa50] sm:$0xff]  ;;  %v1054_v9 = vpack.c.bf16 %v718_v53, %v702_v51 }
 0x217   : > { %v6706_v13 = vadd.f32 %v4699_v61, %v2315_v63  ;;  %v4588_v15 = vpop.f32.mrb[56].mxu0  ;;  %v1056_v19 = vpack.c.bf16 %v720_v57, %v704_v56  ;;  %v769_v56 = vld [vmem:[%s6266_s25 + $0xc58] sm:$0xff] }
 0x218   : > { %v4700_v21 = vpop.f32.mrb[56].mxu1  ;;  %v4589_v23 = vpop.f32.mrb[57].mxu0  ;;  %v785_v57 = vld [vmem:[%s6266_s25 + $0xcd8] sm:$0xff] }
 0x219   : > { %v4590_v25 = vadd.f32 %v4589_v23, %v4588_v15  ;;  %v4701_v26 = vpop.f32.mrb[57].mxu1  ;;  %v4591_v55 = vpop.f32.mrb[58].mxu0 }
 0x21a   : > { %v4702_v32 = vadd.f32 %v4701_v26, %v4700_v21  ;;  %v4703_v33 = vpop.f32.mrb[58].mxu1  ;;  %v4592_v35 = vpop.f32.mrb[59].mxu0  ;;  %v1071_v21 = vpack.c.bf16 %v751_v60, %v735_v58  ;;  %v1073_v26 = vpack.c.bf16 %v753_v3, %v737_v1 }
 0x21b   : > { %v2320_v40 = vadd.f32 %v5768_v38, %v4590_v25  ;;  %v4593_v41 = vadd.f32 %v4592_v35, %v4591_v55  ;;  %v4704_v45 = vpop.f32.mrb[59].mxu1 }
 0x21c   : > { %v4705_v47 = vadd.f32 %v4704_v45, %v4703_v33  ;;  %2922 = vmatmul.mubr.bf16.gmra.mrb[164].mxu0 %v1038_v24  ;;  %v752_v45 = vld [vmem:[%s6266_s25 + $0xbd0] sm:$0xff] }
 0x21d   : > { %v6710_v48 = vadd.f32 %v4702_v32, %v2320_v40  ;;  %v2323_v50 = vadd.f32 %v5768_v38, %v4593_v41  ;;  %3083 = vmatmul.mubr.bf16.gmra.mrb[164].mxu1 %v1040_v27  ;;  %2929 = vmatprep.mubr.bf16.mxu0 %v1055_v31  ;;  %v750_v40 = vld [vmem:[%s6266_s25 + $0xbc0] sm:$0xff]  ;;  %v736_v41 = vld [vmem:[%s6266_s25 + $0xb50] sm:$0xff] }
 0x21e   : > { %3090 = vmatprep.mubr.bf16.mxu1 %v1057_v37  ;;  %v734_v37 = vld [vmem:[%s6266_s25 + $0xb40] sm:$0xff] }
 0x21f   : > { %v6718_v61 = vadd.f32 %v4705_v47, %v2323_v50  ;;  %v4594_v63 = vpop.f32.mrb[60].mxu0  ;;  %v767_v47 = vld [vmem:[%s6266_s25 + $0xc48] sm:$0xff] }
 0x220   : > { %v4706_v5 = vpop.f32.mrb[60].mxu1  ;;  %v4595_v8 = vpop.f32.mrb[61].mxu0  ;;  %v783_v50 = vld [vmem:[%s6266_s25 + $0xcc8] sm:$0xff] }
 0x221   : > { %v4596_v10 = vadd.f32 %v4595_v8, %v4594_v63  ;;  %v4707_v15 = vpop.f32.mrb[61].mxu1  ;;  %v4597_v16 = vpop.f32.mrb[62].mxu0  ;;  %v1070_v63 = vpack.c.bf16 %v750_v40, %v734_v37  ;;  %v1087_v8 = vpack.c.bf16 %v783_v50, %v767_v47  ;;  %v815_v37 = vld [vmem:[%s6266_s25 + $0xdc8] sm:$0xff] }
 0x222   : > { %v4708_v23 = vadd.f32 %v4707_v15, %v4706_v5  ;;  %v4709_v24 = vpop.f32.mrb[62].mxu1  ;;  %v4598_v25 = vpop.f32.mrb[63].mxu0  ;;  %v1072_v5 = vpack.c.bf16 %v752_v45, %v736_v41  ;;  %v801_v41 = vld [vmem:[%s6266_s25 + $0xd58] sm:$0xff] }
 0x223   : > { %v2328_v55 = vadd.f32 %v5768_v38, %v4596_v10  ;;  %v4599_v27 = vadd.f32 %v4598_v25, %v4597_v16  ;;  %v4710_v31 = vpop.f32.mrb[63].mxu1  ;;  %v1089_v16 = vpack.c.bf16 %v785_v57, %v769_v56  ;;  %v817_v45 = vld [vmem:[%s6266_s25 + $0xdd8] sm:$0xff] }
 0x224   : > { %v4711_v32 = vadd.f32 %v4710_v31, %v4709_v24  ;;  %2930 = vmatmul.mubr.bf16.gmra.mrb[168].mxu0 %v1054_v9  ;;  %v768_v31 = vld [vmem:[%s6266_s25 + $0xc50] sm:$0xff] }
 0x225   : > { %v6722_v33 = vadd.f32 %v4708_v23, %v2328_v55  ;;  %v2331_v35 = vadd.f32 %v5768_v38, %v4599_v27  ;;  %3091 = vmatmul.mubr.bf16.gmra.mrb[168].mxu1 %v1056_v19  ;;  %2937 = vmatprep.mubr.bf16.mxu0 %v1071_v21  ;;  %v766_v55 = vld [vmem:[%s6266_s25 + $0xc40] sm:$0xff] }
 0x226   : > { %3098 = vmatprep.mubr.bf16.mxu1 %v1073_v26  ;;  %v782_v27 = vld [vmem:[%s6266_s25 + $0xcc0] sm:$0xff] }
 0x227   : > { %v6730_v51 = vadd.f32 %v4711_v32, %v2331_v35  ;;  %v4728_v53 = vpop.f32.mrb[64].mxu0  ;;  %v784_v32 = vld [vmem:[%s6266_s25 + $0xcd0] sm:$0xff]  ;;  %v799_v35 = vld [vmem:[%s6266_s25 + $0xd48] sm:$0xff] }
 0x228   : > { %v4840_v58 = vpop.f32.mrb[64].mxu1  ;;  %v4729_v60 = vpop.f32.mrb[65].mxu0 }
 0x229   : > { %v4730_v1 = vadd.f32 %v4729_v60, %v4728_v53  ;;  %v4841_v3 = vpop.f32.mrb[65].mxu1  ;;  %v4731_v38 = vpop.f32.mrb[66].mxu0  ;;  %v1086_v53 = vpack.c.bf16 %v782_v27, %v766_v55  ;;  %v1103_v60 = vpack.c.bf16 %v815_v37, %v799_v35  ;;  %v847_v55 = vld [vmem:[%s6266_s25 + $0xec8] sm:$0xff] }
 0x22a   : > { %v4842_v9 = vadd.f32 %v4841_v3, %v4840_v58  ;;  %v4843_v10 = vpop.f32.mrb[66].mxu1  ;;  %v4732_v15 = vpop.f32.mrb[67].mxu0  ;;  %v1088_v58 = vpack.c.bf16 %v784_v32, %v768_v31  ;;  %v833_v31 = vld [vmem:[%s6266_s25 + $0xe58] sm:$0xff] }
 0x22b   : > { %v2530_v19 = vadd.f32 %v4730_v1, %v6519_v11  ;;  %v4733_v21 = vadd.f32 %v4732_v15, %v4731_v38  ;;  %v4844_v23 = vpop.f32.mrb[67].mxu1  ;;  %v1105_v38 = vpack.c.bf16 %v817_v45, %v801_v41  ;;  %v849_v32 = vld [vmem:[%s6266_s25 + $0xed8] sm:$0xff] }
 0x22c   : > { %v4845_v24 = vadd.f32 %v4844_v23, %v4843_v10  ;;  %2938 = vmatmul.mubr.bf16.gmra.mrb[172].mxu0 %v1070_v63  ;;  %v800_v23 = vld [vmem:[%s6266_s25 + $0xd50] sm:$0xff] }
 0x22d   : > { %v6735_v25 = vadd.f32 %v4842_v9, %v2530_v19  ;;  %v2533_v26 = vadd.f32 %v4733_v21, %v6526_v18  ;;  %3099 = vmatmul.mubr.bf16.gmra.mrb[172].mxu1 %v1072_v5  ;;  %2945 = vmatprep.mubr.bf16.mxu0 %v1087_v8  ;;  %v798_v19 = vld [vmem:[%s6266_s25 + $0xd40] sm:$0xff] }
 0x22e   : > { %3106 = vmatprep.mubr.bf16.mxu1 %v1089_v16  ;;  %v814_v21 = vld [vmem:[%s6266_s25 + $0xdc0] sm:$0xff] }
 0x22f   : > { %v6744_v11 = vadd.f32 %v4845_v24, %v2533_v26  ;;  %v4734_v40 = vpop.f32.mrb[68].mxu0  ;;  %v816_v24 = vld [vmem:[%s6266_s25 + $0xdd0] sm:$0xff]  ;;  %v831_v26 = vld [vmem:[%s6266_s25 + $0xe48] sm:$0xff] }
 0x230   : > { %v4846_v47 = vpop.f32.mrb[68].mxu1  ;;  %v4735_v50 = vpop.f32.mrb[69].mxu0 }
 0x231   : > { %v4736_v56 = vadd.f32 %v4735_v50, %v4734_v40  ;;  %v4847_v57 = vpop.f32.mrb[69].mxu1  ;;  %v4737_v18 = vpop.f32.mrb[70].mxu0  ;;  %v1102_v40 = vpack.c.bf16 %v814_v21, %v798_v19  ;;  %v1119_v50 = vpack.c.bf16 %v847_v55, %v831_v26  ;;  %v879_v19 = vld [vmem:[%s6266_s25 + $0xfc8] sm:$0xff] }
 0x232   : > { %v4848_v63 = vadd.f32 %v4847_v57, %v4846_v47  ;;  %v4849_v1 = vpop.f32.mrb[70].mxu1  ;;  %v4738_v3 = vpop.f32.mrb[71].mxu0  ;;  %v1104_v47 = vpack.c.bf16 %v816_v24, %v800_v23  ;;  %v865_v23 = vld [vmem:[%s6266_s25 + $0xf58] sm:$0xff] }
 0x233   : > { %v2538_v5 = vadd.f32 %v4736_v56, %v6533_v39  ;;  %v4739_v8 = vadd.f32 %v4738_v3, %v4737_v18  ;;  %v4850_v9 = vpop.f32.mrb[71].mxu1  ;;  %v1121_v18 = vpack.c.bf16 %v849_v32, %v833_v31  ;;  %v881_v24 = vld [vmem:[%s6266_s25 + $0xfd8] sm:$0xff] }
 0x234   : > { %v4851_v10 = vadd.f32 %v4850_v9, %v4849_v1  ;;  %2946 = vmatmul.mubr.bf16.gmra.mrb[176].mxu0 %v1086_v53  ;;  %v832_v9 = vld [vmem:[%s6266_s25 + $0xe50] sm:$0xff] }
 0x235   : > { %v6749_v15 = vadd.f32 %v4848_v63, %v2538_v5  ;;  %v2541_v16 = vadd.f32 %v4739_v8, %v6540_v46  ;;  %3107 = vmatmul.mubr.bf16.gmra.mrb[176].mxu1 %v1088_v58  ;;  %2953 = vmatprep.mubr.bf16.mxu0 %v1103_v60  ;;  %v830_v5 = vld [vmem:[%s6266_s25 + $0xe40] sm:$0xff] }
 0x236   : > { %3114 = vmatprep.mubr.bf16.mxu1 %v1105_v38  ;;  %v846_v8 = vld [vmem:[%s6266_s25 + $0xec0] sm:$0xff] }
 0x237   : > { %v6758_v39 = vadd.f32 %v4851_v10, %v2541_v16  ;;  %v4740_v27 = vpop.f32.mrb[72].mxu0  ;;  %v848_v10 = vld [vmem:[%s6266_s25 + $0xed0] sm:$0xff]  ;;  %v863_v16 = vld [vmem:[%s6266_s25 + $0xf48] sm:$0xff] }
 0x238   : > { %v4852_v35 = vpop.f32.mrb[72].mxu1  ;;  %v4741_v37 = vpop.f32.mrb[73].mxu0 }
 0x239   : > { %v4742_v41 = vadd.f32 %v4741_v37, %v4740_v27  ;;  %v4853_v45 = vpop.f32.mrb[73].mxu1  ;;  %v4743_v46 = vpop.f32.mrb[74].mxu0  ;;  %v1118_v27 = vpack.c.bf16 %v846_v8, %v830_v5  ;;  %v1135_v37 = vpack.c.bf16 %v879_v19, %v863_v16  ;;  %v403_v5 = vld [vmem:[%s6266_s25 + $0xe8] sm:$0xff] }
 0x23a   : > { %v4854_v53 = vadd.f32 %v4853_v45, %v4852_v35  ;;  %v4855_v56 = vpop.f32.mrb[74].mxu1  ;;  %v4744_v57 = vpop.f32.mrb[75].mxu0  ;;  %v1120_v35 = vpack.c.bf16 %v848_v10, %v832_v9  ;;  %v389_v9 = vld [vmem:[%s6266_s25 + $0x78] sm:$0xff] }
 0x23b   : > { %v2546_v58 = vadd.f32 %v4742_v41, %v6547_v4  ;;  %v4745_v60 = vadd.f32 %v4744_v57, %v4743_v46  ;;  %v4856_v63 = vpop.f32.mrb[75].mxu1  ;;  %v1137_v46 = vpack.c.bf16 %v881_v24, %v865_v23  ;;  %v405_v10 = vld [vmem:[%s6266_s25 + $0xf8] sm:$0xff] }
 0x23c   : > { %v4857_v1 = vadd.f32 %v4856_v63, %v4855_v56  ;;  %2954 = vmatmul.mubr.bf16.gmra.mrb[180].mxu0 %v1102_v40  ;;  %v864_v63 = vld [vmem:[%s6266_s25 + $0xf50] sm:$0xff] }
 0x23d   : > { %v6763_v3 = vadd.f32 %v4854_v53, %v2546_v58  ;;  %v2549_v38 = vadd.f32 %v4745_v60, %v6554_v12  ;;  %3115 = vmatmul.mubr.bf16.gmra.mrb[180].mxu1 %v1104_v47  ;;  %2961 = vmatprep.mubr.bf16.mxu0 %v1119_v50  ;;  %v862_v58 = vld [vmem:[%s6266_s25 + $0xf40] sm:$0xff] }
 0x23e   : > { %3122 = vmatprep.mubr.bf16.mxu1 %v1121_v18  ;;  %v878_v60 = vld [vmem:[%s6266_s25 + $0xfc0] sm:$0xff] }
 0x23f   : > { %v6772_v4 = vadd.f32 %v4857_v1, %v2549_v38  ;;  %v4746_v21 = vpop.f32.mrb[76].mxu0  ;;  %v880_v1 = vld [vmem:[%s6266_s25 + $0xfd0] sm:$0xff]  ;;  %v387_v38 = vld [vmem:[%s6266_s25 + $0x68] sm:$0xff] }
 0x240   : > { %v4858_v26 = vpop.f32.mrb[76].mxu1  ;;  %v4747_v55 = vpop.f32.mrb[77].mxu0 }
 0x241   : > { %v4748_v31 = vadd.f32 %v4747_v55, %v4746_v21  ;;  %v4859_v32 = vpop.f32.mrb[77].mxu1  ;;  %v4749_v12 = vpop.f32.mrb[78].mxu0  ;;  %v1134_v21 = vpack.c.bf16 %v878_v60, %v862_v58  ;;  %v899_v55 = vpack.c.bf16 %v403_v5, %v387_v38  ;;  %v435_v58 = vld [vmem:[%s6266_s25 + $0x1e8] sm:$0xff] }
 0x242   : > { %v4860_v40 = vadd.f32 %v4859_v32, %v4858_v26  ;;  %v4861_v41 = vpop.f32.mrb[78].mxu1  ;;  %v4750_v45 = vpop.f32.mrb[79].mxu0  ;;  %v1136_v26 = vpack.c.bf16 %v880_v1, %v864_v63  ;;  %v421_v63 = vld [vmem:[%s6266_s25 + $0x178] sm:$0xff] }
 0x243   : > { %v2554_v47 = vadd.f32 %v4748_v31, %v6561_v34  ;;  %v4751_v50 = vadd.f32 %v4750_v45, %v4749_v12  ;;  %v4862_v53 = vpop.f32.mrb[79].mxu1  ;;  %v901_v12 = vpack.c.bf16 %v405_v10, %v389_v9  ;;  %v437_v1 = vld [vmem:[%s6266_s25 + $0x1f8] sm:$0xff] }
 0x244   : > { %v4863_v56 = vadd.f32 %v4862_v53, %v4861_v41  ;;  %2962 = vmatmul.mubr.bf16.gmra.mrb[184].mxu0 %v1118_v27  ;;  %v388_v53 = vld [vmem:[%s6266_s25 + $0x70] sm:$0xff] }
 0x245   : > { %v6777_v57 = vadd.f32 %v4860_v40, %v2554_v47  ;;  %v2557_v18 = vadd.f32 %v4751_v50, %v6568_v42  ;;  %3123 = vmatmul.mubr.bf16.gmra.mrb[184].mxu1 %v1120_v35  ;;  %2969 = vmatprep.mubr.bf16.mxu0 %v1135_v37  ;;  %v386_v47 = vld [vmem:[%s6266_s25 + $0x60] sm:$0xff] }
 0x246   : > { %3130 = vmatprep.mubr.bf16.mxu1 %v1137_v46  ;;  %v402_v50 = vld [vmem:[%s6266_s25 + $0xe0] sm:$0xff] }
 0x247   : > { %v6786_v34 = vadd.f32 %v4863_v56, %v2557_v18  ;;  %v4752_v8 = vpop.f32.mrb[80].mxu0  ;;  %v404_v56 = vld [vmem:[%s6266_s25 + $0xf0] sm:$0xff]  ;;  %v419_v18 = vld [vmem:[%s6266_s25 + $0x168] sm:$0xff] }
 0x248   : > { %v4864_v16 = vpop.f32.mrb[80].mxu1  ;;  %v4753_v19 = vpop.f32.mrb[81].mxu0 }
 0x249   : > { %v4754_v23 = vadd.f32 %v4753_v19, %v4752_v8  ;;  %v4865_v24 = vpop.f32.mrb[81].mxu1  ;;  %v4755_v42 = vpop.f32.mrb[82].mxu0  ;;  %v898_v8 = vpack.c.bf16 %v402_v50, %v386_v47  ;;  %v915_v19 = vpack.c.bf16 %v435_v58, %v419_v18  ;;  %v467_v47 = vld [vmem:[%s6266_s25 + $0x2e8] sm:$0xff] }
 0x24a   : > { %v4866_v27 = vadd.f32 %v4865_v24, %v4864_v16  ;;  %v4867_v31 = vpop.f32.mrb[82].mxu1  ;;  %v4756_v32 = vpop.f32.mrb[83].mxu0  ;;  %v900_v16 = vpack.c.bf16 %v404_v56, %v388_v53  ;;  %v453_v53 = vld [vmem:[%s6266_s25 + $0x278] sm:$0xff] }
 0x24b   : > { %v2562_v35 = vadd.f32 %v4754_v23, %v6574_v0  ;;  %v4757_v37 = vadd.f32 %v4756_v32, %v4755_v42  ;;  %v4868_v40 = vpop.f32.mrb[83].mxu1  ;;  %v917_v42 = vpack.c.bf16 %v437_v1, %v421_v63  ;;  %v469_v56 = vld [vmem:[%s6266_s25 + $0x2f8] sm:$0xff] }
 0x24c   : > { %v4869_v41 = vadd.f32 %v4868_v40, %v4867_v31  ;;  %2970 = vmatmul.mubr.bf16.gmra.mrb[188].mxu0 %v1134_v21  ;;  %v420_v40 = vld [vmem:[%s6266_s25 + $0x170] sm:$0xff] }
 0x24d   : > { %v6791_v45 = vadd.f32 %v4866_v27, %v2562_v35  ;;  %v2565_v46 = vadd.f32 %v4757_v37, %v6580_v7  ;;  %3131 = vmatmul.mubr.bf16.gmra.mrb[188].mxu1 %v1136_v26  ;;  %3171 = vmatprep.mubr.bf16.mxu0 %v899_v55  ;;  %v418_v35 = vld [vmem:[%s6266_s25 + $0x160] sm:$0xff] }
 0x24e   : > { %3332 = vmatprep.mubr.bf16.mxu1 %v901_v12  ;;  %v434_v37 = vld [vmem:[%s6266_s25 + $0x1e0] sm:$0xff] }
 0x24f   : > { %v6800_v0 = vadd.f32 %v4869_v41, %v2565_v46  ;;  %v4758_v60 = vpop.f32.mrb[84].mxu0  ;;  %v436_v41 = vld [vmem:[%s6266_s25 + $0x1f0] sm:$0xff]  ;;  %v451_v46 = vld [vmem:[%s6266_s25 + $0x268] sm:$0xff] }
 0x250   : > { %v4870_v38 = vpop.f32.mrb[84].mxu1  ;;  %v4759_v5 = vpop.f32.mrb[85].mxu0 }
 0x251   : > { %v4760_v9 = vadd.f32 %v4759_v5, %v4758_v60  ;;  %v4871_v10 = vpop.f32.mrb[85].mxu1  ;;  %v4761_v7 = vpop.f32.mrb[86].mxu0  ;;  %v914_v60 = vpack.c.bf16 %v434_v37, %v418_v35  ;;  %v931_v5 = vpack.c.bf16 %v467_v47, %v451_v46  ;;  %v499_v35 = vld [vmem:[%s6266_s25 + $0x3e8] sm:$0xff] }
 0x252   : > { %v4872_v21 = vadd.f32 %v4871_v10, %v4870_v38  ;;  %v4873_v23 = vpop.f32.mrb[86].mxu1  ;;  %v4762_v24 = vpop.f32.mrb[87].mxu0  ;;  %v916_v38 = vpack.c.bf16 %v436_v41, %v420_v40  ;;  %v485_v40 = vld [vmem:[%s6266_s25 + $0x378] sm:$0xff] }
 0x253   : > { %v2570_v26 = vadd.f32 %v4760_v9, %v6591_v43  ;;  %v4763_v55 = vadd.f32 %v4762_v24, %v4761_v7  ;;  %v4874_v27 = vpop.f32.mrb[87].mxu1  ;;  %v933_v7 = vpack.c.bf16 %v469_v56, %v453_v53  ;;  %v501_v41 = vld [vmem:[%s6266_s25 + $0x3f8] sm:$0xff] }
 0x254   : > { %v4875_v31 = vadd.f32 %v4874_v27, %v4873_v23  ;;  %3172 = vmatmul.mubr.bf16.vlgmr.msra.gmra.mrb[192].mxu0 %v898_v8  ;;  %v452_v27 = vld [vmem:[%s6266_s25 + $0x270] sm:$0xff] }
 0x255   : > { %v6805_v32 = vadd.f32 %v4872_v21, %v2570_v26  ;;  %v2573_v12 = vadd.f32 %v4763_v55, %v6596_v52  ;;  %3333 = vmatmul.mubr.bf16.vlgmr.msra.gmra.mrb[192].mxu1 %v900_v16  ;;  %3179 = vmatprep.mubr.bf16.mxu0 %v915_v19  ;;  %v450_v26 = vld [vmem:[%s6266_s25 + $0x260] sm:$0xff] }
 0x256   : > { %3340 = vmatprep.mubr.bf16.mxu1 %v917_v42  ;;  %v466_v55 = vld [vmem:[%s6266_s25 + $0x2e0] sm:$0xff] }
 0x257   : > { %v6814_v43 = vadd.f32 %v4875_v31, %v2573_v12  ;;  %v4764_v50 = vpop.f32.mrb[88].mxu0  ;;  %v468_v31 = vld [vmem:[%s6266_s25 + $0x2f0] sm:$0xff]  ;;  %v483_v12 = vld [vmem:[%s6266_s25 + $0x368] sm:$0xff] }
 0x258   : > { %v4876_v18 = vpop.f32.mrb[88].mxu1  ;;  %v4765_v58 = vpop.f32.mrb[89].mxu0 }
 0x259   : > { %v4766_v63 = vadd.f32 %v4765_v58, %v4764_v50  ;;  %v4877_v1 = vpop.f32.mrb[89].mxu1  ;;  %v4767_v52 = vpop.f32.mrb[90].mxu0  ;;  %v930_v50 = vpack.c.bf16 %v466_v55, %v450_v26  ;;  %v947_v58 = vpack.c.bf16 %v499_v35, %v483_v12  ;;  %v531_v26 = vld [vmem:[%s6266_s25 + $0x4e8] sm:$0xff] }
 0x25a   : > { %v4878_v8 = vadd.f32 %v4877_v1, %v4876_v18  ;;  %v4879_v9 = vpop.f32.mrb[90].mxu1  ;;  %v4768_v10 = vpop.f32.mrb[91].mxu0  ;;  %v932_v18 = vpack.c.bf16 %v468_v31, %v452_v27  ;;  %v517_v27 = vld [vmem:[%s6266_s25 + $0x478] sm:$0xff] }
 0x25b   : > { %v2578_v16 = vadd.f32 %v4766_v63, %v6605_v22  ;;  %v4769_v19 = vadd.f32 %v4768_v10, %v4767_v52  ;;  %v4880_v21 = vpop.f32.mrb[91].mxu1  ;;  %v949_v52 = vpack.c.bf16 %v501_v41, %v485_v40  ;;  %v533_v31 = vld [vmem:[%s6266_s25 + $0x4f8] sm:$0xff] }
 0x25c   : > { %v4881_v23 = vadd.f32 %v4880_v21, %v4879_v9  ;;  %3180 = vmatmul.mubr.bf16.gmra.mrb[196].mxu0 %v914_v60  ;;  %v484_v21 = vld [vmem:[%s6266_s25 + $0x370] sm:$0xff] }
 0x25d   : > { %v6819_v24 = vadd.f32 %v4878_v8, %v2578_v16  ;;  %v2581_v42 = vadd.f32 %v4769_v19, %v6610_v30  ;;  %3341 = vmatmul.mubr.bf16.gmra.mrb[196].mxu1 %v916_v38  ;;  %3187 = vmatprep.mubr.bf16.mxu0 %v931_v5  ;;  %v482_v16 = vld [vmem:[%s6266_s25 + $0x360] sm:$0xff] }
 0x25e   : > { %3348 = vmatprep.mubr.bf16.mxu1 %v933_v7  ;;  %v498_v19 = vld [vmem:[%s6266_s25 + $0x3e0] sm:$0xff] }
 0x25f   : > { %v6828_v22 = vadd.f32 %v4881_v23, %v2581_v42  ;;  %v4770_v37 = vpop.f32.mrb[92].mxu0  ;;  %v500_v23 = vld [vmem:[%s6266_s25 + $0x3f0] sm:$0xff]  ;;  %v515_v42 = vld [vmem:[%s6266_s25 + $0x468] sm:$0xff] }
 0x260   : > { %v4882_v46 = vpop.f32.mrb[92].mxu1  ;;  %v4771_v47 = vpop.f32.mrb[93].mxu0 }
 0x261   : > { %v4772_v53 = vadd.f32 %v4771_v47, %v4770_v37  ;;  %v4883_v56 = vpop.f32.mrb[93].mxu1  ;;  %v4773_v30 = vpop.f32.mrb[94].mxu0  ;;  %v946_v37 = vpack.c.bf16 %v498_v19, %v482_v16  ;;  %v963_v47 = vpack.c.bf16 %v531_v26, %v515_v42  ;;  %v563_v16 = vld [vmem:[%s6266_s25 + $0x5e8] sm:$0xff] }
 0x262   : > { %v4884_v60 = vadd.f32 %v4883_v56, %v4882_v46  ;;  %v4885_v63 = vpop.f32.mrb[94].mxu1  ;;  %v4774_v1 = vpop.f32.mrb[95].mxu0  ;;  %v948_v46 = vpack.c.bf16 %v500_v23, %v484_v21  ;;  %v549_v21 = vld [vmem:[%s6266_s25 + $0x578] sm:$0xff] }
 0x263   : > { %v2586_v38 = vadd.f32 %v4772_v53, %v6619_v2  ;;  %v4775_v5 = vadd.f32 %v4774_v1, %v4773_v30  ;;  %v4886_v8 = vpop.f32.mrb[95].mxu1  ;;  %v965_v30 = vpack.c.bf16 %v533_v31, %v517_v27  ;;  %v565_v23 = vld [vmem:[%s6266_s25 + $0x5f8] sm:$0xff] }
 0x264   : > { %v4887_v9 = vadd.f32 %v4886_v8, %v4885_v63  ;;  %3188 = vmatmul.mubr.bf16.gmra.mrb[200].mxu0 %v930_v50  ;;  %v516_v8 = vld [vmem:[%s6266_s25 + $0x470] sm:$0xff] }
 0x265   : > { %v6833_v10 = vadd.f32 %v4884_v60, %v2586_v38  ;;  %v2589_v7 = vadd.f32 %v4775_v5, %v6624_v14  ;;  %3349 = vmatmul.mubr.bf16.gmra.mrb[200].mxu1 %v932_v18  ;;  %3195 = vmatprep.mubr.bf16.mxu0 %v947_v58  ;;  %v514_v38 = vld [vmem:[%s6266_s25 + $0x460] sm:$0xff] }
 0x266   : > { %3356 = vmatprep.mubr.bf16.mxu1 %v949_v52  ;;  %v530_v5 = vld [vmem:[%s6266_s25 + $0x4e0] sm:$0xff] }
 0x267   : > { %v6842_v2 = vadd.f32 %v4887_v9, %v2589_v7  ;;  %v4776_v55 = vpop.f32.mrb[96].mxu0  ;;  %v532_v9 = vld [vmem:[%s6266_s25 + $0x4f0] sm:$0xff]  ;;  %v547_v7 = vld [vmem:[%s6266_s25 + $0x568] sm:$0xff] }
 0x268   : > { %v4888_v12 = vpop.f32.mrb[96].mxu1  ;;  %v4777_v35 = vpop.f32.mrb[97].mxu0 }
 0x269   : > { %v4778_v40 = vadd.f32 %v4777_v35, %v4776_v55  ;;  %v4889_v41 = vpop.f32.mrb[97].mxu1  ;;  %v4779_v14 = vpop.f32.mrb[98].mxu0  ;;  %v962_v55 = vpack.c.bf16 %v530_v5, %v514_v38  ;;  %v979_v35 = vpack.c.bf16 %v563_v16, %v547_v7  ;;  %v595_v38 = vld [vmem:[%s6266_s25 + $0x6e8] sm:$0xff] }
 0x26a   : > { %v4890_v50 = vadd.f32 %v4889_v41, %v4888_v12  ;;  %v4891_v53 = vpop.f32.mrb[98].mxu1  ;;  %v4780_v56 = vpop.f32.mrb[99].mxu0  ;;  %v964_v12 = vpack.c.bf16 %v532_v9, %v516_v8  ;;  %v581_v8 = vld [vmem:[%s6266_s25 + $0x678] sm:$0xff]  ;;  %v5752_v7 = vld [vmem:[#allocation8] sm:$0xff]  }
 0x26b   : > { %v2594_v18 = vadd.f32 %v4778_v40, %v6628_v44  ;;  %v4781_v58 = vadd.f32 %v4780_v56, %v4779_v14  ;;  %v4892_v60 = vpop.f32.mrb[99].mxu1  ;;  %v981_v14 = vpack.c.bf16 %v565_v23, %v549_v21  ;;  %v597_v9 = vld [vmem:[%s6266_s25 + $0x6f8] sm:$0xff]  ;;  %5432 = vmatprep.subr.bf16.mxu0 %v5752_v7 }
 0x26c   : > { %v4893_v63 = vadd.f32 %v4892_v60, %v4891_v53  ;;  %3196 = vmatmul.mubr.bf16.gmra.mrb[204].mxu0 %v946_v37  ;;  %v548_v60 = vld [vmem:[%s6266_s25 + $0x570] sm:$0xff] }
 0x26d   : > { %v6847_v1 = vadd.f32 %v4890_v50, %v2594_v18  ;;  %v2597_v52 = vadd.f32 %v4781_v58, %v6636_v54  ;;  %3357 = vmatmul.mubr.bf16.gmra.mrb[204].mxu1 %v948_v46  ;;  %3203 = vmatprep.mubr.bf16.mxu0 %v963_v47  ;;  %v546_v18 = vld [vmem:[%s6266_s25 + $0x560] sm:$0xff] }
 0x26e   : > { %3364 = vmatprep.mubr.bf16.mxu1 %v965_v30  ;;  %v562_v58 = vld [vmem:[%s6266_s25 + $0x5e0] sm:$0xff]  ;;  %5433 = vmatpush3.bf16.msra.mxu0 %v5752_v7 }
 0x26f   : > { %v6856_v44 = vadd.f32 %v4893_v63, %v2597_v52  ;;  %v4782_v19 = vpop.f32.mrb[100].mxu0  ;;  %v564_v63 = vld [vmem:[%s6266_s25 + $0x5f0] sm:$0xff]  ;;  %v579_v52 = vld [vmem:[%s6266_s25 + $0x668] sm:$0xff]  ;;  %v978_v21 = vpack.c.bf16 %v562_v58, %v546_v18 }
 0x270   : > { %v4894_v42 = vpop.f32.mrb[100].mxu1  ;;  %v4783_v26 = vpop.f32.mrb[101].mxu0  ;;  %v611_v18 = vld [vmem:[%s6266_s25 + $0x768] sm:$0xff] }
 0x271   : > { %v4784_v27 = vadd.f32 %v4783_v26, %v4782_v19  ;;  %v4895_v31 = vpop.f32.mrb[101].mxu1  ;;  %v4785_v54 = vpop.f32.mrb[102].mxu0  ;;  %v980_v26 = vpack.c.bf16 %v564_v63, %v548_v60  ;;  %v627_v58 = vld [vmem:[%s6266_s25 + $0x7e8] sm:$0xff]  ;;  %v613_v63 = vld [vmem:[%s6266_s25 + $0x778] sm:$0xff] }
 0x272   : > { %v4896_v37 = vadd.f32 %v4895_v31, %v4894_v42  ;;  %v4897_v40 = vpop.f32.mrb[102].mxu1  ;;  %v4786_v41 = vpop.f32.mrb[103].mxu0 }
 0x273   : > { %v2602_v46 = vadd.f32 %v4784_v27, %v6641_v20  ;;  %v4787_v47 = vadd.f32 %v4786_v41, %v4785_v54  ;;  %v4898_v50 = vpop.f32.mrb[103].mxu1 }
 0x274   : > { %v4899_v53 = vadd.f32 %v4898_v50, %v4897_v40  ;;  %3204 = vmatmul.mubr.bf16.gmra.mrb[208].mxu0 %v962_v55  ;;  %v995_v55 = vpack.c.bf16 %v595_v38, %v579_v52  ;;  %v594_v50 = vld [vmem:[%s6266_s25 + $0x6e0] sm:$0xff]  ;;  %v629_v52 = vld [vmem:[%s6266_s25 + $0x7f8] sm:$0xff] }
 0x275   : > { %v6861_v56 = vadd.f32 %v4896_v37, %v2602_v46  ;;  %v2605_v30 = vadd.f32 %v4787_v47, %v6650_v29  ;;  %3365 = vmatmul.mubr.bf16.gmra.mrb[208].mxu1 %v964_v12  ;;  %3211 = vmatprep.mubr.bf16.mxu0 %v979_v35  ;;  %v997_v12 = vpack.c.bf16 %v597_v9, %v581_v8  ;;  %v578_v47 = vld [vmem:[%s6266_s25 + $0x660] sm:$0xff] }
 0x276   : > { %3372 = vmatprep.mubr.bf16.mxu1 %v981_v14  ;;  %v994_v8 = vpack.c.bf16 %v594_v50, %v578_v47  ;;  %v659_v47 = vld [vmem:[%s6266_s25 + $0x8e8] sm:$0xff] }
 0x277   : > { %v6870_v20 = vadd.f32 %v4899_v53, %v2605_v30  ;;  %v4788_v5 = vpop.f32.mrb[104].mxu0  ;;  %v580_v53 = vld [vmem:[%s6266_s25 + $0x670] sm:$0xff] }
 0x278   : > { %v4900_v16 = vpop.f32.mrb[104].mxu1  ;;  %v4789_v19 = vpop.f32.mrb[105].mxu0  ;;  %v596_v30 = vld [vmem:[%s6266_s25 + $0x6f0] sm:$0xff] }
 0x279   : > { %v4790_v23 = vadd.f32 %v4789_v19, %v4788_v5  ;;  %v4901_v29 = vpop.f32.mrb[105].mxu1  ;;  %v4791_v42 = vpop.f32.mrb[106].mxu0  ;;  %v1011_v19 = vpack.c.bf16 %v627_v58, %v611_v18  ;;  %v5753_v18 = vld [vmem:[#allocation8 + $0x8] sm:$0xff]  }
 0x27a   : > { %v4902_v27 = vadd.f32 %v4901_v29, %v4900_v16  ;;  %v4903_v31 = vpop.f32.mrb[106].mxu1  ;;  %v4792_v54 = vpop.f32.mrb[107].mxu0  ;;  %v996_v16 = vpack.c.bf16 %v596_v30, %v580_v53  ;;  %v645_v53 = vld [vmem:[%s6266_s25 + $0x878] sm:$0xff]  ;;  %5434 = vmatprep.subr.bf16.mxu0 %v5753_v18 }
 0x27b   : > { %v2610_v35 = vadd.f32 %v4790_v23, %v6655_v59  ;;  %v4793_v37 = vadd.f32 %v4792_v54, %v4791_v42  ;;  %v4904_v40 = vpop.f32.mrb[107].mxu1  ;;  %v1013_v42 = vpack.c.bf16 %v629_v52, %v613_v63  ;;  %v661_v30 = vld [vmem:[%s6266_s25 + $0x8f8] sm:$0xff]  ;;  %5435 = vmatpush3.bf16.msra.mxu0 %v5753_v18 }
 0x27c   : > { %v4905_v41 = vadd.f32 %v4904_v40, %v4903_v31  ;;  %3212 = vmatmul.mubr.bf16.gmra.mrb[212].mxu0 %v978_v21  ;;  %v612_v40 = vld [vmem:[%s6266_s25 + $0x770] sm:$0xff] }
 0x27d   : > { %v6875_v14 = vadd.f32 %v4902_v27, %v2610_v35  ;;  %v2613_v46 = vadd.f32 %v4793_v37, %v6664_v6  ;;  %3373 = vmatmul.mubr.bf16.gmra.mrb[212].mxu1 %v980_v26  ;;  %3219 = vmatprep.mubr.bf16.mxu0 %v995_v55  ;;  %v610_v35 = vld [vmem:[%s6266_s25 + $0x760] sm:$0xff] }
 0x27e   : > { %3380 = vmatprep.mubr.bf16.mxu1 %v997_v12  ;;  %v626_v37 = vld [vmem:[%s6266_s25 + $0x7e0] sm:$0xff] }
 0x27f   : > { %v6884_v59 = vadd.f32 %v4905_v41, %v2613_v46  ;;  %v4794_v60 = vpop.f32.mrb[108].mxu0  ;;  %v628_v41 = vld [vmem:[%s6266_s25 + $0x7f0] sm:$0xff]  ;;  %v643_v46 = vld [vmem:[%s6266_s25 + $0x868] sm:$0xff]  ;;  %v1010_v63 = vpack.c.bf16 %v626_v37, %v610_v35 }
 0x280   : > { %v4906_v38 = vpop.f32.mrb[108].mxu1  ;;  %v4795_v5 = vpop.f32.mrb[109].mxu0  ;;  %v675_v35 = vld [vmem:[%s6266_s25 + $0x968] sm:$0xff] }
 0x281   : > { %v4796_v9 = vadd.f32 %v4795_v5, %v4794_v60  ;;  %v4907_v7 = vpop.f32.mrb[109].mxu1  ;;  %v4797_v6 = vpop.f32.mrb[110].mxu0  ;;  %v1012_v5 = vpack.c.bf16 %v628_v41, %v612_v40  ;;  %v691_v37 = vld [vmem:[%s6266_s25 + $0x9e8] sm:$0xff]  ;;  %v677_v41 = vld [vmem:[%s6266_s25 + $0x978] sm:$0xff] }
 0x282   : > { %v4908_v21 = vadd.f32 %v4907_v7, %v4906_v38  ;;  %v4909_v23 = vpop.f32.mrb[110].mxu1  ;;  %v4798_v29 = vpop.f32.mrb[111].mxu0 }
 0x283   : > { %v2618_v26 = vadd.f32 %v4796_v9, %v6669_v36  ;;  %v4799_v55 = vadd.f32 %v4798_v29, %v4797_v6  ;;  %v4910_v27 = vpop.f32.mrb[111].mxu1 }
 0x284   : > { %v4911_v31 = vadd.f32 %v4910_v27, %v4909_v23  ;;  %3220 = vmatmul.mubr.bf16.gmra.mrb[216].mxu0 %v994_v8  ;;  %v1027_v8 = vpack.c.bf16 %v659_v47, %v643_v46  ;;  %v658_v27 = vld [vmem:[%s6266_s25 + $0x8e0] sm:$0xff]  ;;  %v693_v46 = vld [vmem:[%s6266_s25 + $0x9f8] sm:$0xff] }
 0x285   : > { %v6889_v54 = vadd.f32 %v4908_v21, %v2618_v26  ;;  %v2621_v12 = vadd.f32 %v4799_v55, %v6678_v49  ;;  %3381 = vmatmul.mubr.bf16.gmra.mrb[216].mxu1 %v996_v16  ;;  %3227 = vmatprep.mubr.bf16.mxu0 %v1011_v19  ;;  %v1029_v16 = vpack.c.bf16 %v661_v30, %v645_v53  ;;  %v642_v55 = vld [vmem:[%s6266_s25 + $0x860] sm:$0xff] }
 0x286   : > { %3388 = vmatprep.mubr.bf16.mxu1 %v1013_v42  ;;  %v1026_v53 = vpack.c.bf16 %v658_v27, %v642_v55  ;;  %v723_v55 = vld [vmem:[%s6266_s25 + $0xae8] sm:$0xff] }
 0x287   : > { %v6898_v36 = vadd.f32 %v4911_v31, %v2621_v12  ;;  %v4800_v50 = vpop.f32.mrb[112].mxu0  ;;  %v644_v31 = vld [vmem:[%s6266_s25 + $0x870] sm:$0xff] }
 0x288   : > { %v4912_v58 = vpop.f32.mrb[112].mxu1  ;;  %v4801_v60 = vpop.f32.mrb[113].mxu0  ;;  %v660_v12 = vld [vmem:[%s6266_s25 + $0x8f0] sm:$0xff] }
 0x289   : > { %v4802_v52 = vadd.f32 %v4801_v60, %v4800_v50  ;;  %v4913_v49 = vpop.f32.mrb[113].mxu1  ;;  %v4803_v38 = vpop.f32.mrb[114].mxu0  ;;  %v1043_v60 = vpack.c.bf16 %v691_v37, %v675_v35  ;;  %v5754_v35 = vld [vmem:[#allocation8 + $0x10] sm:$0xff]  }
 0x28a   : > { %v4914_v9 = vadd.f32 %v4913_v49, %v4912_v58  ;;  %v4915_v7 = vpop.f32.mrb[114].mxu1  ;;  %v4804_v6 = vpop.f32.mrb[115].mxu0  ;;  %v1028_v58 = vpack.c.bf16 %v660_v12, %v644_v31  ;;  %v709_v31 = vld [vmem:[%s6266_s25 + $0xa78] sm:$0xff]  ;;  %5436 = vmatprep.subr.bf16.mxu0 %v5754_v35 }
 0x28b   : > { %v2626_v19 = vadd.f32 %v4802_v52, %v6683_v17  ;;  %v4805_v21 = vadd.f32 %v4804_v6, %v4803_v38  ;;  %v4916_v23 = vpop.f32.mrb[115].mxu1  ;;  %v1045_v38 = vpack.c.bf16 %v693_v46, %v677_v41  ;;  %v725_v12 = vld [vmem:[%s6266_s25 + $0xaf8] sm:$0xff]  ;;  %5437 = vmatpush3.bf16.msra.mxu0 %v5754_v35 }
 0x28c   : > { %v4917_v29 = vadd.f32 %v4916_v23, %v4915_v7  ;;  %3228 = vmatmul.mubr.bf16.gmra.mrb[220].mxu0 %v1010_v63  ;;  %v676_v23 = vld [vmem:[%s6266_s25 + $0x970] sm:$0xff] }
 0x28d   : > { %v6903_v42 = vadd.f32 %v4914_v9, %v2626_v19  ;;  %v2629_v26 = vadd.f32 %v4805_v21, %v6692_v28  ;;  %3389 = vmatmul.mubr.bf16.gmra.mrb[220].mxu1 %v1012_v5  ;;  %3235 = vmatprep.mubr.bf16.mxu0 %v1027_v8  ;;  %v674_v19 = vld [vmem:[%s6266_s25 + $0x960] sm:$0xff] }
 0x28e   : > { %3396 = vmatprep.mubr.bf16.mxu1 %v1029_v16  ;;  %v690_v21 = vld [vmem:[%s6266_s25 + $0x9e0] sm:$0xff] }
 0x28f   : > { %v6912_v17 = vadd.f32 %v4917_v29, %v2629_v26  ;;  %v4806_v40 = vpop.f32.mrb[116].mxu0  ;;  %v692_v29 = vld [vmem:[%s6266_s25 + $0x9f0] sm:$0xff]  ;;  %v707_v26 = vld [vmem:[%s6266_s25 + $0xa68] sm:$0xff]  ;;  %v1042_v41 = vpack.c.bf16 %v690_v21, %v674_v19 }
 0x290   : > { %v4918_v47 = vpop.f32.mrb[116].mxu1  ;;  %v4807_v50 = vpop.f32.mrb[117].mxu0  ;;  %v739_v19 = vld [vmem:[%s6266_s25 + $0xb68] sm:$0xff] }
 0x291   : > { %v4808_v30 = vadd.f32 %v4807_v50, %v4806_v40  ;;  %v4919_v18 = vpop.f32.mrb[117].mxu1  ;;  %v4809_v28 = vpop.f32.mrb[118].mxu0  ;;  %v1044_v50 = vpack.c.bf16 %v692_v29, %v676_v23  ;;  %v755_v21 = vld [vmem:[%s6266_s25 + $0xbe8] sm:$0xff]  ;;  %v741_v29 = vld [vmem:[%s6266_s25 + $0xb78] sm:$0xff] }
 0x292   : > { %v4920_v63 = vadd.f32 %v4919_v18, %v4918_v47  ;;  %v4921_v52 = vpop.f32.mrb[118].mxu1  ;;  %v4810_v49 = vpop.f32.mrb[119].mxu0 }
 0x293   : > { %v2634_v5 = vadd.f32 %v4808_v30, %v6697_v62  ;;  %v4811_v8 = vadd.f32 %v4810_v49, %v4809_v28  ;;  %v4922_v9 = vpop.f32.mrb[119].mxu1 }
 0x294   : > { %v4923_v7 = vadd.f32 %v4922_v9, %v4921_v52  ;;  %3236 = vmatmul.mubr.bf16.gmra.mrb[224].mxu0 %v1026_v53  ;;  %v1059_v53 = vpack.c.bf16 %v723_v55, %v707_v26  ;;  %v722_v9 = vld [vmem:[%s6266_s25 + $0xae0] sm:$0xff]  ;;  %v757_v26 = vld [vmem:[%s6266_s25 + $0xbf8] sm:$0xff] }
 0x295   : > { %v6917_v6 = vadd.f32 %v4920_v63, %v2634_v5  ;;  %v2637_v16 = vadd.f32 %v4811_v8, %v6706_v13  ;;  %3397 = vmatmul.mubr.bf16.gmra.mrb[224].mxu1 %v1028_v58  ;;  %3243 = vmatprep.mubr.bf16.mxu0 %v1043_v60  ;;  %v1061_v58 = vpack.c.bf16 %v725_v12, %v709_v31  ;;  %v706_v8 = vld [vmem:[%s6266_s25 + $0xa60] sm:$0xff] }
 0x296   : > { %3404 = vmatprep.mubr.bf16.mxu1 %v1045_v38  ;;  %v1058_v31 = vpack.c.bf16 %v722_v9, %v706_v8  ;;  %v787_v8 = vld [vmem:[%s6266_s25 + $0xce8] sm:$0xff] }
 0x297   : > { %v6926_v62 = vadd.f32 %v4923_v7, %v2637_v16  ;;  %v4812_v27 = vpop.f32.mrb[120].mxu0  ;;  %v708_v7 = vld [vmem:[%s6266_s25 + $0xa70] sm:$0xff] }
 0x298   : > { %v4924_v37 = vpop.f32.mrb[120].mxu1  ;;  %v4813_v40 = vpop.f32.mrb[121].mxu0  ;;  %v724_v16 = vld [vmem:[%s6266_s25 + $0xaf0] sm:$0xff] }
 0x299   : > { %v4814_v46 = vadd.f32 %v4813_v40, %v4812_v27  ;;  %v4925_v13 = vpop.f32.mrb[121].mxu1  ;;  %v4815_v47 = vpop.f32.mrb[122].mxu0  ;;  %v1075_v40 = vpack.c.bf16 %v755_v21, %v739_v19  ;;  %v789_v19 = vld [vmem:[%s6266_s25 + $0xcf8] sm:$0xff] }
 0x29a   : > { %v4926_v30 = vadd.f32 %v4925_v13, %v4924_v37  ;;  %v4927_v18 = vpop.f32.mrb[122].mxu1  ;;  %v4816_v28 = vpop.f32.mrb[123].mxu0  ;;  %v1060_v37 = vpack.c.bf16 %v724_v16, %v708_v7  ;;  %v773_v16 = vld [vmem:[%s6266_s25 + $0xc78] sm:$0xff] }
 0x29b   : > { %v2642_v60 = vadd.f32 %v4814_v46, %v6710_v48  ;;  %v4817_v63 = vadd.f32 %v4816_v28, %v4815_v47  ;;  %v4928_v52 = vpop.f32.mrb[123].mxu1  ;;  %v1077_v47 = vpack.c.bf16 %v757_v26, %v741_v29  ;;  %v738_v28 = vld [vmem:[%s6266_s25 + $0xb60] sm:$0xff] }
 0x29c   : > { %v4929_v49 = vadd.f32 %v4928_v52, %v4927_v18  ;;  %3244 = vmatmul.mubr.bf16.gmra.mrb[228].mxu0 %v1042_v41  ;;  %v740_v52 = vld [vmem:[%s6266_s25 + $0xb70] sm:$0xff] }
 0x29d   : > { %v6931_v38 = vadd.f32 %v4926_v30, %v2642_v60  ;;  %v2645_v5 = vadd.f32 %v4817_v63, %v6718_v61  ;;  %3405 = vmatmul.mubr.bf16.gmra.mrb[228].mxu1 %v1044_v50  ;;  %3251 = vmatprep.mubr.bf16.mxu0 %v1059_v53  ;;  %v754_v63 = vld [vmem:[%s6266_s25 + $0xbe0] sm:$0xff] }
 0x29e   : > { %3412 = vmatprep.mubr.bf16.mxu1 %v1061_v58  ;;  %v1074_v29 = vpack.c.bf16 %v754_v63, %v738_v28  ;;  %v772_v28 = vld [vmem:[%s6266_s25 + $0xc70] sm:$0xff]  ;;  %v819_v63 = vld [vmem:[%s6266_s25 + $0xde8] sm:$0xff] }
 0x29f   : > { %v6940_v48 = vadd.f32 %v4929_v49, %v2645_v5  ;;  %v4818_v23 = vpop.f32.mrb[124].mxu0  ;;  %v756_v49 = vld [vmem:[%s6266_s25 + $0xbf0] sm:$0xff]  ;;  %v771_v5 = vld [vmem:[%s6266_s25 + $0xc68] sm:$0xff] }
 0x2a0   : > { %v4930_v55 = vpop.f32.mrb[124].mxu1  ;;  %v4819_v27 = vpop.f32.mrb[125].mxu0 }
 0x2a1   : > { %v4820_v12 = vadd.f32 %v4819_v27, %v4818_v23  ;;  %v4931_v61 = vpop.f32.mrb[125].mxu1  ;;  %v4821_v35 = vpop.f32.mrb[126].mxu0  ;;  %v1076_v27 = vpack.c.bf16 %v756_v49, %v740_v52  ;;  %v5757_v52 = vld [vmem:[#allocation8 + $0x28] sm:$0xff]  }
 0x2a2   : > { %v4932_v41 = vadd.f32 %v4931_v61, %v4930_v55  ;;  %v4933_v46 = vpop.f32.mrb[126].mxu1  ;;  %v4822_v13 = vpop.f32.mrb[127].mxu0 }
 0x2a3   : > { %v2650_v50 = vadd.f32 %v4820_v12, %v6722_v33  ;;  %v4823_v53 = vadd.f32 %v4822_v13, %v4821_v35  ;;  %v4934_v30 = vpop.f32.mrb[127].mxu1  ;;  %v5755_v33 = vld [vmem:[#allocation8 + $0x18] sm:$0xff]  }
 0x2a4   : > { %v4935_v18 = vadd.f32 %v4934_v30, %v4933_v46  ;;  %3252 = vmatmul.mubr.bf16.gmra.mrb[232].mxu0 %v1058_v31  ;;  %5438 = vmatprep.subr.bf16.mxu0 %v5755_v33  ;;  %v1091_v31 = vpack.c.bf16 %v787_v8, %v771_v5  ;;  %v805_v8 = vld [vmem:[%s6266_s25 + $0xd78] sm:$0xff] }
 0x2a5   : > { %v6946_v58 = vadd.f32 %v4932_v41, %v2650_v50  ;;  %v2653_v60 = vadd.f32 %v4823_v53, %v6730_v51  ;;  %3413 = vmatmul.mubr.bf16.gmra.mrb[232].mxu1 %v1060_v37  ;;  %3259 = vmatprep.mubr.bf16.mxu0 %v1075_v40  ;;  %v1093_v37 = vpack.c.bf16 %v789_v19, %v773_v16  ;;  %v5756_v40 = vld [vmem:[#allocation8 + $0x20] sm:$0xff]  }
 0x2a6   : > { %3420 = vmatprep.mubr.bf16.mxu1 %v1077_v47  ;;  %5439 = vmatpush3.bf16.msra.mxu0 %v5755_v33  ;;  %v770_v50 = vld [vmem:[%s6266_s25 + $0xc60] sm:$0xff]  ;;  %v821_v33 = vld [vmem:[%s6266_s25 + $0xdf8] sm:$0xff] }
 0x2a7   : > { %v6954_v9 = vadd.f32 %v4935_v18, %v2653_v60  ;;  %v4952_v7 = vpop.f32.mrb[128].mxu0  ;;  %5440 = vmatprep.subr.bf16.mxu0 %v5756_v40  ;;  %v786_v18 = vld [vmem:[%s6266_s25 + $0xce0] sm:$0xff]  ;;  %v788_v60 = vld [vmem:[%s6266_s25 + $0xcf0] sm:$0xff] }
 0x2a8   : > { %v5064_v21 = vpop.f32.mrb[128].mxu1  ;;  %v4953_v23 = vpop.f32.mrb[129].mxu0  ;;  %v1090_v19 = vpack.c.bf16 %v786_v18, %v770_v50  ;;  %v804_v50 = vld [vmem:[%s6266_s25 + $0xd70] sm:$0xff]  ;;  %v851_v18 = vld [vmem:[%s6266_s25 + $0xee8] sm:$0xff] }
 0x2a9   : > { %v4954_v26 = vadd.f32 %v4953_v23, %v4952_v7  ;;  %v5065_v51 = vpop.f32.mrb[129].mxu1  ;;  %v4955_v55 = vpop.f32.mrb[130].mxu0 }
 0x2aa   : > { %v5066_v12 = vadd.f32 %v5065_v51, %v5064_v21  ;;  %v5067_v61 = vpop.f32.mrb[130].mxu1  ;;  %v4956_v35 = vpop.f32.mrb[131].mxu0  ;;  %5441 = vmatpush3.bf16.msra.mxu0 %v5756_v40 }
 0x2ab   : > { %v2852_v41 = vadd.f32 %v4954_v26, %v6735_v25  ;;  %v4957_v46 = vadd.f32 %v4956_v35, %v4955_v55  ;;  %v5068_v13 = vpop.f32.mrb[131].mxu1  ;;  %v803_v25 = vld [vmem:[%s6266_s25 + $0xd68] sm:$0xff]  ;;  %5442 = vmatprep.subr.bf16.mxu0 %v5757_v52 }
 0x2ac   : > { %v5069_v47 = vadd.f32 %v5068_v13, %v5067_v61  ;;  %3260 = vmatmul.mubr.bf16.gmra.mrb[236].mxu0 %v1074_v29  ;;  %v1092_v29 = vpack.c.bf16 %v788_v60, %v772_v28  ;;  %v1107_v26 = vpack.c.bf16 %v819_v63, %v803_v25  ;;  %v5759_v28 = vld [vmem:[#allocation8 + $0x38] sm:$0xff]  }
 0x2ad   : > { %v6960_v53 = vadd.f32 %v5066_v12, %v2852_v41  ;;  %v2855_v30 = vadd.f32 %v4957_v46, %v6744_v11  ;;  %3421 = vmatmul.mubr.bf16.gmra.mrb[236].mxu1 %v1076_v27  ;;  %3267 = vmatprep.mubr.bf16.mxu0 %v1091_v31  ;;  %v1109_v31 = vpack.c.bf16 %v821_v33, %v805_v8  ;;  %v5758_v12 = vld [vmem:[#allocation8 + $0x30] sm:$0xff]   ;;  %v802_v41 = vld [vmem:[%s6266_s25 + $0xd60] sm:$0xff] }
 0x2ae   : > { %3428 = vmatprep.mubr.bf16.mxu1 %v1093_v37  ;;  %5443 = vmatpush3.bf16.msra.mxu0 %v5757_v52  ;;  %v837_v63 = vld [vmem:[%s6266_s25 + $0xe78] sm:$0xff] }
 0x2af   : > { %v6968_v49 = vadd.f32 %v5069_v47, %v2855_v30  ;;  %v4958_v5 = vpop.f32.mrb[132].mxu0  ;;  %5444 = vmatprep.subr.bf16.mxu0 %v5758_v12  ;;  %v818_v47 = vld [vmem:[%s6266_s25 + $0xde0] sm:$0xff]  ;;  %v820_v30 = vld [vmem:[%s6266_s25 + $0xdf0] sm:$0xff]  ;;  %v853_v52 = vld [vmem:[%s6266_s25 + $0xef8] sm:$0xff] }
 0x2b0   : > { %v5070_v7 = vpop.f32.mrb[132].mxu1  ;;  %v4959_v16 = vpop.f32.mrb[133].mxu0  ;;  %v1106_v33 = vpack.c.bf16 %v818_v47, %v802_v41  ;;  %v852_v41 = vld [vmem:[%s6266_s25 + $0xef0] sm:$0xff]  ;;  %v883_v47 = vld [vmem:[%s6266_s25 + $0xfe8] sm:$0xff] }
 0x2b1   : > { %v4960_v11 = vadd.f32 %v4959_v16, %v4958_v5  ;;  %v5071_v21 = vpop.f32.mrb[133].mxu1  ;;  %v4961_v23 = vpop.f32.mrb[134].mxu0 }
 0x2b2   : > { %v5072_v51 = vadd.f32 %v5071_v21, %v5070_v7  ;;  %v5073_v55 = vpop.f32.mrb[134].mxu1  ;;  %v4962_v27 = vpop.f32.mrb[135].mxu0  ;;  %5445 = vmatpush3.bf16.msra.mxu0 %v5758_v12 }
 0x2b3   : > { %v2860_v61 = vadd.f32 %v4960_v11, %v6749_v15  ;;  %v4963_v35 = vadd.f32 %v4962_v27, %v4961_v23  ;;  %v5074_v37 = vpop.f32.mrb[135].mxu1  ;;  %v835_v15 = vld [vmem:[%s6266_s25 + $0xe68] sm:$0xff]  ;;  %5446 = vmatprep.subr.bf16.mxu0 %v5759_v28 }
 0x2b4   : > { %v5075_v40 = vadd.f32 %v5074_v37, %v5073_v55  ;;  %3268 = vmatmul.mubr.bf16.gmra.mrb[240].mxu0 %v1090_v19  ;;  %v1108_v19 = vpack.c.bf16 %v820_v30, %v804_v50  ;;  %v1123_v11 = vpack.c.bf16 %v851_v18, %v835_v15  ;;  %v850_v37 = vld [vmem:[%s6266_s25 + $0xee0] sm:$0xff]  ;;  %v869_v30 = vld [vmem:[%s6266_s25 + $0xf78] sm:$0xff] }
 0x2b5   : > { %v6974_v46 = vadd.f32 %v5072_v51, %v2860_v61  ;;  %v2863_v13 = vadd.f32 %v4963_v35, %v6758_v39  ;;  %3429 = vmatmul.mubr.bf16.gmra.mrb[240].mxu1 %v1092_v29  ;;  %3275 = vmatprep.mubr.bf16.mxu0 %v1107_v26  ;;  %v1125_v26 = vpack.c.bf16 %v853_v52, %v837_v63  ;;  %v834_v35 = vld [vmem:[%s6266_s25 + $0xe60] sm:$0xff]  ;;  %v885_v15 = vld [vmem:[%s6266_s25 + $0xff8] sm:$0xff] }
 0x2b6   : > { %3436 = vmatprep.mubr.bf16.mxu1 %v1109_v31  ;;  %5447 = vmatpush3.bf16.msra.mxu0 %v5759_v28 }
 0x2b7   : > { %v6982_v60 = vadd.f32 %v5075_v40, %v2863_v13  ;;  %v4964_v25 = vpop.f32.mrb[136].mxu0  ;;  %v836_v40 = vld [vmem:[%s6266_s25 + $0xe70] sm:$0xff]  ;;  %v867_v13 = vld [vmem:[%s6266_s25 + $0xf68] sm:$0xff] }
 0x2b8   : > { %v5076_v5 = vpop.f32.mrb[136].mxu1  ;;  %v4965_v8 = vpop.f32.mrb[137].mxu0 }
 0x2b9   : > { %v4966_v39 = vadd.f32 %v4965_v8, %v4964_v25  ;;  %v5077_v7 = vpop.f32.mrb[137].mxu1  ;;  %v4967_v16 = vpop.f32.mrb[138].mxu0  ;;  %v1122_v25 = vpack.c.bf16 %v850_v37, %v834_v35  ;;  %v1139_v8 = vpack.c.bf16 %v883_v47, %v867_v13 }
 0x2ba   : > { %v5078_v21 = vadd.f32 %v5077_v7, %v5076_v5  ;;  %v5079_v23 = vpop.f32.mrb[138].mxu1  ;;  %v4968_v29 = vpop.f32.mrb[139].mxu0  ;;  %v1124_v5 = vpack.c.bf16 %v852_v41, %v836_v40 }
 0x2bb   : > { %v2868_v51 = vadd.f32 %v4966_v39, %v6763_v3  ;;  %v4969_v55 = vadd.f32 %v4968_v29, %v4967_v16  ;;  %v5080_v27 = vpop.f32.mrb[139].mxu1  ;;  %v1141_v16 = vpack.c.bf16 %v885_v15, %v869_v30 }
 0x2bc   : > { %v5081_v31 = vadd.f32 %v5080_v27, %v5079_v23  ;;  %3276 = vmatmul.mubr.bf16.gmra.mrb[244].mxu0 %v1106_v33  ;;  %v868_v27 = vld [vmem:[%s6266_s25 + $0xf70] sm:$0xff] }
 0x2bd   : > { %v6987_v12 = vadd.f32 %v5078_v21, %v2868_v51  ;;  %v2871_v61 = vadd.f32 %v4969_v55, %v6772_v4  ;;  %3437 = vmatmul.mubr.bf16.gmra.mrb[244].mxu1 %v1108_v19  ;;  %3283 = vmatprep.mubr.bf16.mxu0 %v1123_v11  ;;  %v866_v51 = vld [vmem:[%s6266_s25 + $0xf60] sm:$0xff] }
 0x2be   : > { %3444 = vmatprep.mubr.bf16.mxu1 %v1125_v26  ;;  %v882_v55 = vld [vmem:[%s6266_s25 + $0xfe0] sm:$0xff] }
 0x2bf   : > { %v6996_v3 = vadd.f32 %v5081_v31, %v2871_v61  ;;  %v4970_v50 = vpop.f32.mrb[140].mxu0  ;;  %v884_v31 = vld [vmem:[%s6266_s25 + $0xff0] sm:$0xff]  ;;  %v1138_v40 = vpack.c.bf16 %v882_v55, %v866_v51 }
 0x2c0   : > { %v5082_v18 = vpop.f32.mrb[140].mxu1  ;;  %v4971_v28 = vpop.f32.mrb[141].mxu0 }
 0x2c1   : > { %v4972_v63 = vadd.f32 %v4971_v28, %v4970_v50  ;;  %v5083_v52 = vpop.f32.mrb[141].mxu1  ;;  %v4973_v4 = vpop.f32.mrb[142].mxu0  ;;  %v1140_v50 = vpack.c.bf16 %v884_v31, %v868_v27 }
 0x2c2   : > { %v5084_v33 = vadd.f32 %v5083_v52, %v5082_v18  ;;  %v5085_v39 = vpop.f32.mrb[142].mxu1  ;;  %v4974_v7 = vpop.f32.mrb[143].mxu0 }
 0x2c3   : > { %v2876_v19 = vadd.f32 %v4972_v63, %v6777_v57  ;;  %v4975_v11 = vadd.f32 %v4974_v7, %v4973_v4  ;;  %v5086_v21 = vpop.f32.mrb[143].mxu1 }
 0x2c4   : > { %v5087_v23 = vadd.f32 %v5086_v21, %v5085_v39  ;;  %3284 = vmatmul.mubr.bf16.gmra.mrb[248].mxu0 %v1122_v25 }
 0x2c5   : > { %v7001_v29 = vadd.f32 %v5084_v33, %v2876_v19  ;;  %v2879_v26 = vadd.f32 %v4975_v11, %v6786_v34  ;;  %3445 = vmatmul.mubr.bf16.gmra.mrb[248].mxu1 %v1124_v5  ;;  %3291 = vmatprep.mubr.bf16.mxu0 %v1139_v8 }
 0x2c6   : > { %3452 = vmatprep.mubr.bf16.mxu1 %v1141_v16 }
 0x2c7   : > { %v7008_v61 = vadd.f32 %v5087_v23, %v2879_v26  ;;  %v4976_v35 = vpop.f32.mrb[144].mxu0 }
 0x2c8   : > { %v5088_v37 = vpop.f32.mrb[144].mxu1  ;;  %v4977_v57 = vpop.f32.mrb[145].mxu0 }
 0x2c9   : > { %v4978_v41 = vadd.f32 %v4977_v57, %v4976_v35  ;;  %v5089_v13 = vpop.f32.mrb[145].mxu1  ;;  %v4979_v47 = vpop.f32.mrb[146].mxu0 }
 0x2ca   : > { %v5090_v30 = vadd.f32 %v5089_v13, %v5088_v37  ;;  %v5091_v15 = vpop.f32.mrb[146].mxu1  ;;  %v4980_v34 = vpop.f32.mrb[147].mxu0 }
 0x2cb   : > { %v2884_v18 = vadd.f32 %v4978_v41, %v6791_v45  ;;  %v4981_v28 = vadd.f32 %v4980_v34, %v4979_v47  ;;  %v5092_v25 = vpop.f32.mrb[147].mxu1 }
 0x2cc   : > { %v5093_v63 = vadd.f32 %v5092_v25, %v5091_v15  ;;  %3292 = vmatmul.mubr.bf16.gmra.mrb[252].mxu0 %v1138_v40 }
 0x2cd   : > { %v7011_v52 = vadd.f32 %v5090_v30, %v2884_v18  ;;  %v2887_v4 = vadd.f32 %v4981_v28, %v6800_v0  ;;  %3453 = vmatmul.mubr.bf16.gmra.mrb[252].mxu1 %v1140_v50 }
 0x2cf   : > { %v7014_v5 = vadd.f32 %v5093_v63, %v2887_v4  ;;  %v4982_v8 = vpop.f32.mrb[148].mxu0 }
 0x2d0   : > { %v5094_v33 = vpop.f32.mrb[148].mxu1  ;;  %v4983_v39 = vpop.f32.mrb[149].mxu0 }
 0x2d1   : > { %v4984_v7 = vadd.f32 %v4983_v39, %v4982_v8  ;;  %v5095_v16 = vpop.f32.mrb[149].mxu1  ;;  %v4985_v19 = vpop.f32.mrb[150].mxu0 }
 0x2d2   : > { %v5096_v11 = vadd.f32 %v5095_v16, %v5094_v33  ;;  %v5097_v21 = vpop.f32.mrb[150].mxu1  ;;  %v4986_v45 = vpop.f32.mrb[151].mxu0 }
 0x2d3   : > { %v2892_v23 = vadd.f32 %v4984_v7, %v6805_v32  ;;  %v4987_v26 = vadd.f32 %v4986_v45, %v4985_v19  ;;  %v5098_v51 = vpop.f32.mrb[151].mxu1 }
 0x2d4   : > { %v5099_v55 = vadd.f32 %v5098_v51, %v5097_v21 }
 0x2d5   : > { %v7017_v27 = vadd.f32 %v5096_v11, %v2892_v23  ;;  %v2895_v0 = vadd.f32 %v4987_v26, %v6814_v43 }
 0x2d7   : > { %v7020_v31 = vadd.f32 %v5099_v55, %v2895_v0  ;;  %v4988_v35 = vpop.f32.mrb[152].mxu0 }
 0x2d8   : > { %v5100_v37 = vpop.f32.mrb[152].mxu1  ;;  %v4989_v57 = vpop.f32.mrb[153].mxu0 }
 0x2d9   : > { %v4990_v40 = vadd.f32 %v4989_v57, %v4988_v35  ;;  %v5101_v41 = vpop.f32.mrb[153].mxu1  ;;  %v4991_v13 = vpop.f32.mrb[154].mxu0 }
 0x2da   : > { %v5102_v47 = vadd.f32 %v5101_v41, %v5100_v37  ;;  %v5103_v50 = vpop.f32.mrb[154].mxu1  ;;  %v4992_v30 = vpop.f32.mrb[155].mxu0 }
 0x2db   : > { %v2900_v32 = vadd.f32 %v4990_v40, %v6819_v24  ;;  %v4993_v15 = vadd.f32 %v4992_v30, %v4991_v13  ;;  %v5104_v34 = vpop.f32.mrb[155].mxu1 }
 0x2dc   : > { %v5105_v18 = vadd.f32 %v5104_v34, %v5103_v50 }
 0x2dd   : > { %v7023_v28 = vadd.f32 %v5102_v47, %v2900_v32  ;;  %v2903_v43 = vadd.f32 %v4993_v15, %v6828_v22 }
 0x2df   : > { %v7026_v25 = vadd.f32 %v5105_v18, %v2903_v43  ;;  %v4994_v63 = vpop.f32.mrb[156].mxu0 }
 0x2e0   : > { %v5106_v4 = vpop.f32.mrb[156].mxu1  ;;  %v4995_v8 = vpop.f32.mrb[157].mxu0 }
 0x2e1   : > { %v4996_v33 = vadd.f32 %v4995_v8, %v4994_v63  ;;  %v5107_v39 = vpop.f32.mrb[157].mxu1  ;;  %v4997_v7 = vpop.f32.mrb[158].mxu0 }
 0x2e2   : > { %v5108_v16 = vadd.f32 %v5107_v39, %v5106_v4  ;;  %v5109_v19 = vpop.f32.mrb[158].mxu1  ;;  %v4998_v11 = vpop.f32.mrb[159].mxu0 }
 0x2e3   : > { %v2908_v24 = vadd.f32 %v4996_v33, %v6833_v10  ;;  %v4999_v21 = vadd.f32 %v4998_v11, %v4997_v7  ;;  %v5110_v45 = vpop.f32.mrb[159].mxu1 }
 0x2e4   : > { %v5111_v23 = vadd.f32 %v5110_v45, %v5109_v19 }
 0x2e5   : > { %v7029_v26 = vadd.f32 %v5108_v16, %v2908_v24  ;;  %v2911_v22 = vadd.f32 %v4999_v21, %v6842_v2 }
 0x2e7   : > { %v7032_v51 = vadd.f32 %v5111_v23, %v2911_v22  ;;  %v5000_v55 = vpop.f32.mrb[160].mxu0 }
 0x2e8   : > { %v5112_v0 = vpop.f32.mrb[160].mxu1  ;;  %v5001_v35 = vpop.f32.mrb[161].mxu0 }
 0x2e9   : > { %v5002_v37 = vadd.f32 %v5001_v35, %v5000_v55  ;;  %v5113_v57 = vpop.f32.mrb[161].mxu1  ;;  %v5003_v40 = vpop.f32.mrb[162].mxu0 }
 0x2ea   : > { %v5114_v41 = vadd.f32 %v5113_v57, %v5112_v0  ;;  %v5115_v13 = vpop.f32.mrb[162].mxu1  ;;  %v5004_v47 = vpop.f32.mrb[163].mxu0 }
 0x2eb   : > { %v2916_v10 = vadd.f32 %v5002_v37, %v6847_v1  ;;  %v5005_v50 = vadd.f32 %v5004_v47, %v5003_v40  ;;  %v5116_v30 = vpop.f32.mrb[163].mxu1 }
 0x2ec   : > { %v5117_v32 = vadd.f32 %v5116_v30, %v5115_v13 }
 0x2ed   : > { %v7035_v15 = vadd.f32 %v5114_v41, %v2916_v10  ;;  %v2919_v2 = vadd.f32 %v5005_v50, %v6856_v44 }
 0x2ef   : > { %v7038_v34 = vadd.f32 %v5117_v32, %v2919_v2  ;;  %v5006_v18 = vpop.f32.mrb[164].mxu0 }
 0x2f0   : > { %v5118_v43 = vpop.f32.mrb[164].mxu1  ;;  %v5007_v63 = vpop.f32.mrb[165].mxu0 }
 0x2f1   : > { %v5008_v4 = vadd.f32 %v5007_v63, %v5006_v18  ;;  %v5119_v8 = vpop.f32.mrb[165].mxu1  ;;  %v5009_v33 = vpop.f32.mrb[166].mxu0 }
 0x2f2   : > { %v5120_v39 = vadd.f32 %v5119_v8, %v5118_v43  ;;  %v5121_v7 = vpop.f32.mrb[166].mxu1  ;;  %v5010_v16 = vpop.f32.mrb[167].mxu0 }
 0x2f3   : > { %v2924_v1 = vadd.f32 %v5008_v4, %v6861_v56  ;;  %v5011_v19 = vadd.f32 %v5010_v16, %v5009_v33  ;;  %v5122_v11 = vpop.f32.mrb[167].mxu1 }
 0x2f4   : > { %v5123_v24 = vadd.f32 %v5122_v11, %v5121_v7 }
 0x2f5   : > { %v7041_v21 = vadd.f32 %v5120_v39, %v2924_v1  ;;  %v2927_v44 = vadd.f32 %v5011_v19, %v6870_v20 }
 0x2f7   : > { %v7044_v45 = vadd.f32 %v5123_v24, %v2927_v44  ;;  %v5012_v23 = vpop.f32.mrb[168].mxu0 }
 0x2f8   : > { %v5124_v22 = vpop.f32.mrb[168].mxu1  ;;  %v5013_v55 = vpop.f32.mrb[169].mxu0 }
 0x2f9   : > { %v5014_v0 = vadd.f32 %v5013_v55, %v5012_v23  ;;  %v5125_v35 = vpop.f32.mrb[169].mxu1  ;;  %v5015_v37 = vpop.f32.mrb[170].mxu0 }
 0x2fa   : > { %v5126_v57 = vadd.f32 %v5125_v35, %v5124_v22  ;;  %v5127_v40 = vpop.f32.mrb[170].mxu1  ;;  %v5016_v41 = vpop.f32.mrb[171].mxu0 }
 0x2fb   : > { %v2932_v56 = vadd.f32 %v5014_v0, %v6875_v14  ;;  %v5017_v13 = vadd.f32 %v5016_v41, %v5015_v37  ;;  %v5128_v47 = vpop.f32.mrb[171].mxu1 }
 0x2fc   : > { %v5129_v10 = vadd.f32 %v5128_v47, %v5127_v40 }
 0x2fd   : > { %v7047_v50 = vadd.f32 %v5126_v57, %v2932_v56  ;;  %v2935_v20 = vadd.f32 %v5017_v13, %v6884_v59 }
 0x2ff   : > { %v7050_v30 = vadd.f32 %v5129_v10, %v2935_v20  ;;  %v5018_v32 = vpop.f32.mrb[172].mxu0 }
 0x300   : > { %v5130_v2 = vpop.f32.mrb[172].mxu1  ;;  %v5019_v18 = vpop.f32.mrb[173].mxu0 }
 0x301   : > { %v5020_v43 = vadd.f32 %v5019_v18, %v5018_v32  ;;  %v5131_v63 = vpop.f32.mrb[173].mxu1  ;;  %v5021_v4 = vpop.f32.mrb[174].mxu0 }
 0x302   : > { %v5132_v8 = vadd.f32 %v5131_v63, %v5130_v2  ;;  %v5133_v33 = vpop.f32.mrb[174].mxu1  ;;  %v5022_v39 = vpop.f32.mrb[175].mxu0 }
 0x303   : > { %v2940_v14 = vadd.f32 %v5020_v43, %v6889_v54  ;;  %v5023_v7 = vadd.f32 %v5022_v39, %v5021_v4  ;;  %v5134_v16 = vpop.f32.mrb[175].mxu1 }
 0x304   : > { %v5135_v1 = vadd.f32 %v5134_v16, %v5133_v33 }
 0x305   : > { %v7053_v19 = vadd.f32 %v5132_v8, %v2940_v14  ;;  %v2943_v59 = vadd.f32 %v5023_v7, %v6898_v36 }
 0x307   : > { %v7056_v11 = vadd.f32 %v5135_v1, %v2943_v59  ;;  %v5024_v24 = vpop.f32.mrb[176].mxu0 }
 0x308   : > { %v5136_v44 = vpop.f32.mrb[176].mxu1  ;;  %v5025_v23 = vpop.f32.mrb[177].mxu0 }
 0x309   : > { %v5026_v22 = vadd.f32 %v5025_v23, %v5024_v24  ;;  %v5137_v55 = vpop.f32.mrb[177].mxu1  ;;  %v5027_v0 = vpop.f32.mrb[178].mxu0 }
 0x30a   : > { %v5138_v35 = vadd.f32 %v5137_v55, %v5136_v44  ;;  %v5139_v37 = vpop.f32.mrb[178].mxu1  ;;  %v5028_v57 = vpop.f32.mrb[179].mxu0 }
 0x30b   : > { %v2948_v54 = vadd.f32 %v5026_v22, %v6903_v42  ;;  %v5029_v40 = vadd.f32 %v5028_v57, %v5027_v0  ;;  %v5140_v41 = vpop.f32.mrb[179].mxu1 }
 0x30c   : > { %v5141_v56 = vadd.f32 %v5140_v41, %v5139_v37 }
 0x30d   : > { %v7059_v13 = vadd.f32 %v5138_v35, %v2948_v54  ;;  %v2951_v36 = vadd.f32 %v5029_v40, %v6912_v17 }
 0x30f   : > { %v7062_v47 = vadd.f32 %v5141_v56, %v2951_v36  ;;  %v5030_v10 = vpop.f32.mrb[180].mxu0 }
 0x310   : > { %v5142_v20 = vpop.f32.mrb[180].mxu1  ;;  %v5031_v32 = vpop.f32.mrb[181].mxu0 }
 0x311   : > { %v5032_v2 = vadd.f32 %v5031_v32, %v5030_v10  ;;  %v5143_v18 = vpop.f32.mrb[181].mxu1  ;;  %v5033_v43 = vpop.f32.mrb[182].mxu0 }
 0x312   : > { %v5144_v63 = vadd.f32 %v5143_v18, %v5142_v20  ;;  %v5145_v4 = vpop.f32.mrb[182].mxu1  ;;  %v5034_v8 = vpop.f32.mrb[183].mxu0 }
 0x313   : > { %v2956_v42 = vadd.f32 %v5032_v2, %v6917_v6  ;;  %v5035_v33 = vadd.f32 %v5034_v8, %v5033_v43  ;;  %v5146_v39 = vpop.f32.mrb[183].mxu1 }
 0x314   : > { %v5147_v14 = vadd.f32 %v5146_v39, %v5145_v4 }
 0x315   : > { %v7065_v7 = vadd.f32 %v5144_v63, %v2956_v42  ;;  %v2959_v17 = vadd.f32 %v5035_v33, %v6926_v62 }
 0x317   : > { %v7068_v16 = vadd.f32 %v5147_v14, %v2959_v17  ;;  %v5036_v1 = vpop.f32.mrb[184].mxu0 }
 0x318   : > { %v5148_v59 = vpop.f32.mrb[184].mxu1  ;;  %v5037_v24 = vpop.f32.mrb[185].mxu0 }
 0x319   : > { %v5038_v44 = vadd.f32 %v5037_v24, %v5036_v1  ;;  %v5149_v23 = vpop.f32.mrb[185].mxu1  ;;  %v5039_v22 = vpop.f32.mrb[186].mxu0 }
 0x31a   : > { %v5150_v55 = vadd.f32 %v5149_v23, %v5148_v59  ;;  %v5151_v0 = vpop.f32.mrb[186].mxu1  ;;  %v5040_v35 = vpop.f32.mrb[187].mxu0 }
 0x31b   : > { %v2964_v6 = vadd.f32 %v5038_v44, %v6931_v38  ;;  %v5041_v37 = vadd.f32 %v5040_v35, %v5039_v22  ;;  %v5152_v57 = vpop.f32.mrb[187].mxu1 }
 0x31c   : > { %v5153_v54 = vadd.f32 %v5152_v57, %v5151_v0 }
 0x31d   : > { %v7071_v40 = vadd.f32 %v5150_v55, %v2964_v6  ;;  %v2967_v62 = vadd.f32 %v5041_v37, %v6940_v48  ;;  %v5760_v6 = vld [vmem:[#allocation8 + $0x40] sm:$0xff]   ;;  %v5761_v37 = vld [vmem:[#allocation8 + $0x48] sm:$0xff]  }
 0x31e   : > { %5480 = vmatprep.subr.bf16.mxu1 %v5760_v6 }
 0x31f   : > { %v7074_v41 = vadd.f32 %v5153_v54, %v2967_v62  ;;  %v5042_v56 = vpop.f32.mrb[188].mxu0  ;;  %5481 = vmatpush3.bf16.msra.mxu1 %v5760_v6 }
 0x320   : > { %v5154_v36 = vpop.f32.mrb[188].mxu1  ;;  %v5043_v10 = vpop.f32.mrb[189].mxu0  ;;  %5482 = vmatprep.subr.bf16.mxu1 %v5761_v37 }
 0x321   : > { %v5044_v20 = vadd.f32 %v5043_v10, %v5042_v56  ;;  %v5155_v32 = vpop.f32.mrb[189].mxu1  ;;  %v5045_v2 = vpop.f32.mrb[190].mxu0 }
 0x322   : > { %v5156_v18 = vadd.f32 %v5155_v32, %v5154_v36  ;;  %v5157_v43 = vpop.f32.mrb[190].mxu1  ;;  %v5046_v63 = vpop.f32.mrb[191].mxu0  ;;  %v5762_v36 = vld [vmem:[#allocation8 + $0x50] sm:$0xff]  }
 0x323   : > { %v2972_v38 = vadd.f32 %v5044_v20, %v6946_v58  ;;  %v5047_v4 = vadd.f32 %v5046_v63, %v5045_v2  ;;  %v5158_v8 = vpop.f32.mrb[191].mxu1  ;;  %5483 = vmatpush3.bf16.msra.mxu1 %v5761_v37 }
 0x324   : > { %v5159_v42 = vadd.f32 %v5158_v8, %v5157_v43  ;;  %5484 = vmatprep.subr.bf16.mxu1 %v5762_v36 }
 0x325   : > { %v7077_v33 = vadd.f32 %v5156_v18, %v2972_v38  ;;  %v2975_v48 = vadd.f32 %v5047_v4, %v6954_v9 }
 0x327   : > { %v7080_v39 = vadd.f32 %v5159_v42, %v2975_v48  ;;  %v5176_v14 = vpop.f32.mrb[192].mxu0  ;;  %v5763_v42 = vld [vmem:[#allocation8 + $0x58] sm:$0xff]   ;;  %5485 = vmatpush3.bf16.msra.mxu1 %v5762_v36 }
 0x328   : > { %v5288_v17 = vpop.f32.mrb[192].mxu1  ;;  %v5177_v1 = vpop.f32.mrb[193].mxu0  ;;  %5486 = vmatprep.subr.bf16.mxu1 %v5763_v42 }
 0x329   : > { %v5178_v59 = vadd.f32 %v5177_v1, %v5176_v14  ;;  %v5289_v24 = vpop.f32.mrb[193].mxu1  ;;  %v5179_v44 = vpop.f32.mrb[194].mxu0 }
 0x32a   : > { %v5290_v23 = vadd.f32 %v5289_v24, %v5288_v17  ;;  %v5291_v22 = vpop.f32.mrb[194].mxu1  ;;  %v5180_v55 = vpop.f32.mrb[195].mxu0  ;;  %v5764_v24 = vld [vmem:[#allocation8 + $0x60] sm:$0xff]  }
 0x32b   : > { %v3174_v58 = vadd.f32 %v5178_v59, %v6960_v53  ;;  %v5181_v0 = vadd.f32 %v5180_v55, %v5179_v44  ;;  %v5292_v35 = vpop.f32.mrb[195].mxu1  ;;  %5487 = vmatpush3.bf16.msra.mxu1 %v5763_v42 }
 0x32c   : > { %v5293_v57 = vadd.f32 %v5292_v35, %v5291_v22  ;;  %5488 = vmatprep.subr.bf16.mxu1 %v5764_v24 }
 0x32d   : > { %v3335_v54 = vadd.f32 %v5290_v23, %v3174_v58  ;;  %v3177_v9 = vadd.f32 %v5181_v0, %v6968_v49 }
 0x32f   : > { %v3338_v62 = vadd.f32 %v5293_v57, %v3177_v9  ;;  %v5182_v56 = vpop.f32.mrb[196].mxu0  ;;  %5489 = vmatpush3.bf16.msra.mxu1 %v5764_v24 }
 0x330   : > { %v5294_v10 = vpop.f32.mrb[196].mxu1  ;;  %v5183_v20 = vpop.f32.mrb[197].mxu0 }
 0x331   : > { %v5184_v32 = vadd.f32 %v5183_v20, %v5182_v56  ;;  %v5295_v2 = vpop.f32.mrb[197].mxu1  ;;  %v5185_v18 = vpop.f32.mrb[198].mxu0  ;;  %v3461_v53 = vpack.c.bf16 %v3338_v62, %v3335_v54 }
 0x332   : > { %v5296_v43 = vadd.f32 %v5295_v2, %v5294_v10  ;;  %v5297_v63 = vpop.f32.mrb[198].mxu1  ;;  %v5186_v38 = vpop.f32.mrb[199].mxu0 }
 0x333   : > { %v3182_v4 = vadd.f32 %v5184_v32, %v6974_v46  ;;  %v5187_v8 = vadd.f32 %v5186_v38, %v5185_v18  ;;  %v5298_v49 = vpop.f32.mrb[199].mxu1  ;;  %5448 = vmatprep.mubr.bf16.mxu0 %v3461_v53 }
 0x334   : > { %v5299_v48 = vadd.f32 %v5298_v49, %v5297_v63 }
 0x335   : > { %v3343_v14 = vadd.f32 %v5296_v43, %v3182_v4  ;;  %v3185_v17 = vadd.f32 %v5187_v8, %v6982_v60  ;;  %v5765_v60 = vld [vmem:[#allocation8 + $0x68] sm:$0xff]  }
 0x336   : > { %5490 = vmatprep.subr.bf16.mxu1 %v5765_v60 }
 0x337   : > { %v3346_v1 = vadd.f32 %v5299_v48, %v3185_v17  ;;  %v5188_v59 = vpop.f32.mrb[200].mxu0  ;;  %5491 = vmatpush3.bf16.msra.mxu1 %v5765_v60 }
 0x338   : > { %v5300_v44 = vpop.f32.mrb[200].mxu1  ;;  %v5189_v23 = vpop.f32.mrb[201].mxu0 }
 0x339   : > { %v3462_v22 = vpack.c.bf16 %v3346_v1, %v3343_v14  ;;  %v5190_v55 = vadd.f32 %v5189_v23, %v5188_v59  ;;  %v5301_v58 = vpop.f32.mrb[201].mxu1  ;;  %v5191_v46 = vpop.f32.mrb[202].mxu0 }
 0x33a   : > { %v5302_v0 = vadd.f32 %v5301_v58, %v5300_v44  ;;  %v5303_v35 = vpop.f32.mrb[202].mxu1  ;;  %v5192_v6 = vpop.f32.mrb[203].mxu0 }
 0x33b   : > { %v3190_v37 = vadd.f32 %v5190_v55, %v6987_v12  ;;  %v5193_v57 = vadd.f32 %v5192_v6, %v5191_v46  ;;  %v5304_v54 = vpop.f32.mrb[203].mxu1  ;;  %5449 = vmatmul.mubr.bf16.vlgmr.msra.gmra.mrb[0].mxu0 %v3462_v22 }
 0x33c   : > { %v5305_v9 = vadd.f32 %v5304_v54, %v5303_v35 }
 0x33d   : > { %v3351_v62 = vadd.f32 %v5302_v0, %v3190_v37  ;;  %v3193_v56 = vadd.f32 %v5193_v57, %v6996_v3 }
 0x33f   : > { %v3354_v36 = vadd.f32 %v5305_v9, %v3193_v56  ;;  %v5194_v10 = vpop.f32.mrb[204].mxu0 }
 0x340   : > { %v5306_v20 = vpop.f32.mrb[204].mxu1  ;;  %v5195_v32 = vpop.f32.mrb[205].mxu0 }
 0x341   : > { %v5196_v2 = vadd.f32 %v5195_v32, %v5194_v10  ;;  %v5307_v18 = vpop.f32.mrb[205].mxu1  ;;  %v5197_v53 = vpop.f32.mrb[206].mxu0  ;;  %v3463_v43 = vpack.c.bf16 %v3354_v36, %v3351_v62 }
 0x342   : > { %v5308_v12 = vadd.f32 %v5307_v18, %v5306_v20  ;;  %v5309_v63 = vpop.f32.mrb[206].mxu1  ;;  %v5198_v38 = vpop.f32.mrb[207].mxu0 }
 0x343   : > { %v3198_v4 = vadd.f32 %v5196_v2, %v7001_v29  ;;  %v5199_v8 = vadd.f32 %v5198_v38, %v5197_v53  ;;  %v5310_v49 = vpop.f32.mrb[207].mxu1  ;;  %5452 = vmatprep.mubr.bf16.mxu0 %v3463_v43 }
 0x344   : > { %v5311_v3 = vadd.f32 %v5310_v49, %v5309_v63 }
 0x345   : > { %v3359_v42 = vadd.f32 %v5308_v12, %v3198_v4  ;;  %v3201_v48 = vadd.f32 %v5199_v8, %v7008_v61 }
 0x347   : > { %v3362_v14 = vadd.f32 %v5311_v3, %v3201_v48  ;;  %v5200_v17 = vpop.f32.mrb[208].mxu0 }
 0x348   : > { %v5312_v1 = vpop.f32.mrb[208].mxu1  ;;  %v5201_v59 = vpop.f32.mrb[209].mxu0 }
 0x349   : > { %v3464_v24 = vpack.c.bf16 %v3362_v14, %v3359_v42  ;;  %v5202_v44 = vadd.f32 %v5201_v59, %v5200_v17  ;;  %v5313_v23 = vpop.f32.mrb[209].mxu1  ;;  %v5203_v22 = vpop.f32.mrb[210].mxu0 }
 0x34a   : > { %v5314_v55 = vadd.f32 %v5313_v23, %v5312_v1  ;;  %v5315_v58 = vpop.f32.mrb[210].mxu1  ;;  %v5204_v46 = vpop.f32.mrb[211].mxu0 }
 0x34b   : > { %v3206_v29 = vadd.f32 %v5202_v44, %v7011_v52  ;;  %v5205_v0 = vadd.f32 %v5204_v46, %v5203_v22  ;;  %v5316_v35 = vpop.f32.mrb[211].mxu1  ;;  %5453 = vmatmul.mubr.bf16.gmra.mrb[4].mxu0 %v3464_v24 }
 0x34c   : > { %v5317_v6 = vadd.f32 %v5316_v35, %v5315_v58 }
 0x34d   : > { %v3367_v37 = vadd.f32 %v5314_v55, %v3206_v29  ;;  %v3209_v61 = vadd.f32 %v5205_v0, %v7014_v5 }
 0x34f   : > { %v3370_v57 = vadd.f32 %v5317_v6, %v3209_v61  ;;  %v5206_v54 = vpop.f32.mrb[212].mxu0 }
 0x350   : > { %v5318_v60 = vpop.f32.mrb[212].mxu1  ;;  %v5207_v9 = vpop.f32.mrb[213].mxu0 }
 0x351   : > { %v5208_v62 = vadd.f32 %v5207_v9, %v5206_v54  ;;  %v5319_v56 = vpop.f32.mrb[213].mxu1  ;;  %v5209_v36 = vpop.f32.mrb[214].mxu0  ;;  %v3465_v10 = vpack.c.bf16 %v3370_v57, %v3367_v37 }
 0x352   : > { %v5320_v20 = vadd.f32 %v5319_v56, %v5318_v60  ;;  %v5321_v32 = vpop.f32.mrb[214].mxu1  ;;  %v5210_v2 = vpop.f32.mrb[215].mxu0 }
 0x353   : > { %v3214_v52 = vadd.f32 %v5208_v62, %v7017_v27  ;;  %v5211_v18 = vadd.f32 %v5210_v2, %v5209_v36  ;;  %v5322_v53 = vpop.f32.mrb[215].mxu1  ;;  %5456 = vmatprep.mubr.bf16.mxu0 %v3465_v10 }
 0x354   : > { %v5323_v43 = vadd.f32 %v5322_v53, %v5321_v32 }
 0x355   : > { %v3375_v12 = vadd.f32 %v5320_v20, %v3214_v52  ;;  %v3217_v5 = vadd.f32 %v5211_v18, %v7020_v31 }
 0x357   : > { %v3378_v63 = vadd.f32 %v5323_v43, %v3217_v5  ;;  %v5212_v38 = vpop.f32.mrb[216].mxu0 }
 0x358   : > { %v5324_v4 = vpop.f32.mrb[216].mxu1  ;;  %v5213_v8 = vpop.f32.mrb[217].mxu0 }
 0x359   : > { %v3466_v49 = vpack.c.bf16 %v3378_v63, %v3375_v12  ;;  %v5214_v3 = vadd.f32 %v5213_v8, %v5212_v38  ;;  %v5325_v42 = vpop.f32.mrb[217].mxu1  ;;  %v5215_v48 = vpop.f32.mrb[218].mxu0 }
 0x35a   : > { %v5326_v14 = vadd.f32 %v5325_v42, %v5324_v4  ;;  %v5327_v17 = vpop.f32.mrb[218].mxu1  ;;  %v5216_v1 = vpop.f32.mrb[219].mxu0 }
 0x35b   : > { %v3222_v27 = vadd.f32 %v5214_v3, %v7023_v28  ;;  %v5217_v59 = vadd.f32 %v5216_v1, %v5215_v48  ;;  %v5328_v24 = vpop.f32.mrb[219].mxu1  ;;  %5457 = vmatmul.mubr.bf16.gmra.mrb[8].mxu0 %v3466_v49 }
 0x35c   : > { %v5329_v44 = vadd.f32 %v5328_v24, %v5327_v17 }
 0x35d   : > { %v3383_v23 = vadd.f32 %v5326_v14, %v3222_v27  ;;  %v3225_v31 = vadd.f32 %v5217_v59, %v7026_v25 }
 0x35f   : > { %v3386_v22 = vadd.f32 %v5329_v44, %v3225_v31  ;;  %v5218_v55 = vpop.f32.mrb[220].mxu0 }
 0x360   : > { %v5330_v58 = vpop.f32.mrb[220].mxu1  ;;  %v5219_v46 = vpop.f32.mrb[221].mxu0 }
 0x361   : > { %v5220_v29 = vadd.f32 %v5219_v46, %v5218_v55  ;;  %v5331_v0 = vpop.f32.mrb[221].mxu1  ;;  %v5221_v35 = vpop.f32.mrb[222].mxu0  ;;  %v3467_v6 = vpack.c.bf16 %v3386_v22, %v3383_v23 }
 0x362   : > { %v5332_v37 = vadd.f32 %v5331_v0, %v5330_v58  ;;  %v5333_v61 = vpop.f32.mrb[222].mxu1  ;;  %v5222_v57 = vpop.f32.mrb[223].mxu0 }
 0x363   : > { %v3230_v28 = vadd.f32 %v5220_v29, %v7029_v26  ;;  %v5223_v54 = vadd.f32 %v5222_v57, %v5221_v35  ;;  %v5334_v60 = vpop.f32.mrb[223].mxu1  ;;  %5460 = vmatprep.mubr.bf16.mxu0 %v3467_v6 }
 0x364   : > { %v5335_v9 = vadd.f32 %v5334_v60, %v5333_v61 }
 0x365   : > { %v3391_v62 = vadd.f32 %v5332_v37, %v3230_v28  ;;  %v3233_v25 = vadd.f32 %v5223_v54, %v7032_v51 }
 0x367   : > { %v3394_v56 = vadd.f32 %v5335_v9, %v3233_v25  ;;  %v5224_v36 = vpop.f32.mrb[224].mxu0 }
 0x368   : > { %v5336_v10 = vpop.f32.mrb[224].mxu1  ;;  %v5225_v20 = vpop.f32.mrb[225].mxu0 }
 0x369   : > { %v3468_v32 = vpack.c.bf16 %v3394_v56, %v3391_v62  ;;  %v5226_v2 = vadd.f32 %v5225_v20, %v5224_v36  ;;  %v5337_v52 = vpop.f32.mrb[225].mxu1  ;;  %v5227_v18 = vpop.f32.mrb[226].mxu0 }
 0x36a   : > { %v5338_v53 = vadd.f32 %v5337_v52, %v5336_v10  ;;  %v5339_v43 = vpop.f32.mrb[226].mxu1  ;;  %v5228_v12 = vpop.f32.mrb[227].mxu0 }
 0x36b   : > { %v3238_v26 = vadd.f32 %v5226_v2, %v7035_v15  ;;  %v5229_v5 = vadd.f32 %v5228_v12, %v5227_v18  ;;  %v5340_v63 = vpop.f32.mrb[227].mxu1  ;;  %5461 = vmatmul.mubr.bf16.gmra.mrb[12].mxu0 %v3468_v32 }
 0x36c   : > { %v5341_v38 = vadd.f32 %v5340_v63, %v5339_v43 }
 0x36d   : > { %v3399_v4 = vadd.f32 %v5338_v53, %v3238_v26  ;;  %v3241_v51 = vadd.f32 %v5229_v5, %v7038_v34 }
 0x36f   : > { %v3402_v8 = vadd.f32 %v5341_v38, %v3241_v51  ;;  %v5230_v49 = vpop.f32.mrb[228].mxu0 }
 0x370   : > { %v5342_v3 = vpop.f32.mrb[228].mxu1  ;;  %v5231_v42 = vpop.f32.mrb[229].mxu0 }
 0x371   : > { %v5232_v48 = vadd.f32 %v5231_v42, %v5230_v49  ;;  %v5343_v14 = vpop.f32.mrb[229].mxu1  ;;  %v5233_v17 = vpop.f32.mrb[230].mxu0  ;;  %v3469_v1 = vpack.c.bf16 %v3402_v8, %v3399_v4 }
 0x372   : > { %v5344_v27 = vadd.f32 %v5343_v14, %v5342_v3  ;;  %v5345_v59 = vpop.f32.mrb[230].mxu1  ;;  %v5234_v24 = vpop.f32.mrb[231].mxu0 }
 0x373   : > { %v3246_v15 = vadd.f32 %v5232_v48, %v7041_v21  ;;  %v5235_v44 = vadd.f32 %v5234_v24, %v5233_v17  ;;  %v5346_v23 = vpop.f32.mrb[231].mxu1  ;;  %5464 = vmatprep.mubr.bf16.mxu0 %v3469_v1 }
 0x374   : > { %v5347_v31 = vadd.f32 %v5346_v23, %v5345_v59 }
 0x375   : > { %v3407_v22 = vadd.f32 %v5344_v27, %v3246_v15  ;;  %v3249_v34 = vadd.f32 %v5235_v44, %v7044_v45 }
 0x377   : > { %v3410_v55 = vadd.f32 %v5347_v31, %v3249_v34  ;;  %v5236_v58 = vpop.f32.mrb[232].mxu0  ;;  %v5766_v34 = vld [vmem:[#allocation8 + $0x70] sm:$0xff]  }
 0x378   : > { %v5348_v46 = vpop.f32.mrb[232].mxu1  ;;  %v5237_v29 = vpop.f32.mrb[233].mxu0  ;;  %5492 = vmatprep.subr.bf16.mxu1 %v5766_v34 }
 0x379   : > { %v3470_v0 = vpack.c.bf16 %v3410_v55, %v3407_v22  ;;  %v5238_v35 = vadd.f32 %v5237_v29, %v5236_v58  ;;  %v5349_v6 = vpop.f32.mrb[233].mxu1  ;;  %v5239_v37 = vpop.f32.mrb[234].mxu0  ;;  %5493 = vmatpush3.bf16.msra.mxu1 %v5766_v34 }
 0x37a   : > { %v5350_v61 = vadd.f32 %v5349_v6, %v5348_v46  ;;  %v5351_v57 = vpop.f32.mrb[234].mxu1  ;;  %v5240_v28 = vpop.f32.mrb[235].mxu0 }
 0x37b   : > { %v3254_v21 = vadd.f32 %v5238_v35, %v7047_v50  ;;  %v5241_v54 = vadd.f32 %v5240_v28, %v5239_v37  ;;  %v5352_v60 = vpop.f32.mrb[235].mxu1  ;;  %5465 = vmatmul.mubr.bf16.gmra.mrb[16].mxu0 %v3470_v0 }
 0x37c   : > { %v5353_v9 = vadd.f32 %v5352_v60, %v5351_v57  ;;  %v5767_v57 = vld [vmem:[#allocation8 + $0x78] sm:$0xff]  }
 0x37d   : > { %v3415_v62 = vadd.f32 %v5350_v61, %v3254_v21  ;;  %v3257_v45 = vadd.f32 %v5241_v54, %v7050_v30  ;;  %5494 = vmatprep.subr.bf16.mxu1 %v5767_v57 }
 0x37e   : > { %5495 = vmatpush3.bf16.msra.mxu1 %v5767_v57 }
 0x37f   : > { %v3418_v25 = vadd.f32 %v5353_v9, %v3257_v45  ;;  %v5242_v56 = vpop.f32.mrb[236].mxu0 }
 0x380   : > { %v5354_v36 = vpop.f32.mrb[236].mxu1  ;;  %v5243_v10 = vpop.f32.mrb[237].mxu0 }
 0x381   : > { %v5244_v20 = vadd.f32 %v5243_v10, %v5242_v56  ;;  %v5355_v32 = vpop.f32.mrb[237].mxu1  ;;  %v5245_v2 = vpop.f32.mrb[238].mxu0  ;;  %v3471_v52 = vpack.c.bf16 %v3418_v25, %v3415_v62 }
 0x382   : > { %v5356_v18 = vadd.f32 %v5355_v32, %v5354_v36  ;;  %v5357_v53 = vpop.f32.mrb[238].mxu1  ;;  %v5246_v43 = vpop.f32.mrb[239].mxu0 }
 0x383   : > { %v3262_v50 = vadd.f32 %v5244_v20, %v7053_v19  ;;  %v5247_v12 = vadd.f32 %v5246_v43, %v5245_v2  ;;  %v5358_v26 = vpop.f32.mrb[239].mxu1  ;;  %5468 = vmatprep.mubr.bf16.mxu0 %v3471_v52 }
 0x384   : > { %v5359_v5 = vadd.f32 %v5358_v26, %v5357_v53 }
 0x385   : > { %v3423_v63 = vadd.f32 %v5356_v18, %v3262_v50  ;;  %v3265_v30 = vadd.f32 %v5247_v12, %v7056_v11 }
 0x387   : > { %v3426_v38 = vadd.f32 %v5359_v5, %v3265_v30  ;;  %v5248_v4 = vpop.f32.mrb[240].mxu0 }
 0x388   : > { %v5360_v51 = vpop.f32.mrb[240].mxu1  ;;  %v5249_v8 = vpop.f32.mrb[241].mxu0 }
 0x389   : > { %v3472_v49 = vpack.c.bf16 %v3426_v38, %v3423_v63  ;;  %v5250_v3 = vadd.f32 %v5249_v8, %v5248_v4  ;;  %v5361_v42 = vpop.f32.mrb[241].mxu1  ;;  %v5251_v48 = vpop.f32.mrb[242].mxu0 }
 0x38a   : > { %v5362_v14 = vadd.f32 %v5361_v42, %v5360_v51  ;;  %v5363_v17 = vpop.f32.mrb[242].mxu1  ;;  %v5252_v1 = vpop.f32.mrb[243].mxu0 }
 0x38b   : > { %v3270_v19 = vadd.f32 %v5250_v3, %v7059_v13  ;;  %v5253_v27 = vadd.f32 %v5252_v1, %v5251_v48  ;;  %v5364_v59 = vpop.f32.mrb[243].mxu1  ;;  %5469 = vmatmul.mubr.bf16.gmra.mrb[20].mxu0 %v3472_v49  ;;  %v7114_v1 = vld [vmem:[#allocation10] ss:$0 sm:$0xff] }
 0x38c   : > { %v5365_v24 = vadd.f32 %v5364_v59, %v5363_v17 }
 0x38d   : > { %v3431_v15 = vadd.f32 %v5362_v14, %v3270_v19  ;;  %v3273_v11 = vadd.f32 %v5253_v27, %v7062_v47 }
 0x38f   : > { %v3434_v44 = vadd.f32 %v5365_v24, %v3273_v11  ;;  %v5254_v23 = vpop.f32.mrb[244].mxu0 }
 0x390   : > { %v5366_v31 = vpop.f32.mrb[244].mxu1  ;;  %v5255_v22 = vpop.f32.mrb[245].mxu0 }
 0x391   : > { %v5256_v55 = vadd.f32 %v5255_v22, %v5254_v23  ;;  %v5367_v58 = vpop.f32.mrb[245].mxu1  ;;  %v5257_v46 = vpop.f32.mrb[246].mxu0  ;;  %v3473_v29 = vpack.c.bf16 %v3434_v44, %v3431_v15 }
 0x392   : > { %v5368_v0 = vadd.f32 %v5367_v58, %v5366_v31  ;;  %v5369_v35 = vpop.f32.mrb[246].mxu1  ;;  %v5258_v6 = vpop.f32.mrb[247].mxu0 }
 0x393   : > { %v3278_v13 = vadd.f32 %v5256_v55, %v7065_v7  ;;  %v5259_v37 = vadd.f32 %v5258_v6, %v5257_v46  ;;  %v5370_v61 = vpop.f32.mrb[247].mxu1  ;;  %5472 = vmatprep.mubr.bf16.mxu0 %v3473_v29 }
 0x394   : > { %v5371_v47 = vadd.f32 %v5370_v61, %v5369_v35 }
 0x395   : > { %v3439_v28 = vadd.f32 %v5368_v0, %v3278_v13  ;;  %v3281_v21 = vadd.f32 %v5259_v37, %v7068_v16 }
 0x397   : > { %v3442_v54 = vadd.f32 %v5371_v47, %v3281_v21  ;;  %v5260_v60 = vpop.f32.mrb[248].mxu0 }
 0x398   : > { %v5372_v9 = vpop.f32.mrb[248].mxu1  ;;  %v5261_v62 = vpop.f32.mrb[249].mxu0 }
 0x399   : > { %v3474_v45 = vpack.c.bf16 %v3442_v54, %v3439_v28  ;;  %v5262_v25 = vadd.f32 %v5261_v62, %v5260_v60  ;;  %v5373_v56 = vpop.f32.mrb[249].mxu1  ;;  %v5263_v36 = vpop.f32.mrb[250].mxu0 }
 0x39a   : > { %v5374_v7 = vadd.f32 %v5373_v56, %v5372_v9  ;;  %v5375_v10 = vpop.f32.mrb[250].mxu1  ;;  %v5264_v20 = vpop.f32.mrb[251].mxu0 }
 0x39b   : > { %v3286_v32 = vadd.f32 %v5262_v25, %v7071_v40  ;;  %v5265_v2 = vadd.f32 %v5264_v20, %v5263_v36  ;;  %v5376_v52 = vpop.f32.mrb[251].mxu1  ;;  %5473 = vmatmul.mubr.bf16.gmra.mrb[24].mxu0 %v3474_v45 }
 0x39c   : > { %v5377_v18 = vadd.f32 %v5376_v52, %v5375_v10 }
 0x39d   : > { %v3447_v16 = vadd.f32 %v5374_v7, %v3286_v32  ;;  %v3289_v53 = vadd.f32 %v5265_v2, %v7074_v41 }
 0x39f   : > { %v3450_v43 = vadd.f32 %v5377_v18, %v3289_v53  ;;  %v5266_v50 = vpop.f32.mrb[252].mxu0 }
 0x3a0   : > { %v5378_v12 = vpop.f32.mrb[252].mxu1  ;;  %v5267_v26 = vpop.f32.mrb[253].mxu0 }
 0x3a1   : > { %v5268_v5 = vadd.f32 %v5267_v26, %v5266_v50  ;;  %v5379_v63 = vpop.f32.mrb[253].mxu1  ;;  %v5269_v30 = vpop.f32.mrb[254].mxu0  ;;  %v3475_v38 = vpack.c.bf16 %v3450_v43, %v3447_v16 }
 0x3a2   : > { %v5380_v4 = vadd.f32 %v5379_v63, %v5378_v12  ;;  %v5381_v51 = vpop.f32.mrb[254].mxu1  ;;  %v5270_v8 = vpop.f32.mrb[255].mxu0 }
 0x3a3   : > { %v3294_v40 = vadd.f32 %v5268_v5, %v7077_v33  ;;  %v5271_v49 = vadd.f32 %v5270_v8, %v5269_v30  ;;  %v5382_v3 = vpop.f32.mrb[255].mxu1  ;;  %5476 = vmatprep.mubr.bf16.mxu0 %v3475_v38 }
 0x3a4   : > { %v5383_v42 = vadd.f32 %v5382_v3, %v5381_v51 }
 0x3a5   : > { %v3455_v48 = vadd.f32 %v5380_v4, %v3294_v40  ;;  %v3297_v41 = vadd.f32 %v5271_v49, %v7080_v39 }
 0x3a7   : > { %v3458_v14 = vadd.f32 %v5383_v42, %v3297_v41 }
 0x3a9   : > { %v3476_v17 = vpack.c.bf16 %v3458_v14, %v3455_v48 }
 0x3ab   : > { %5477 = vmatmul.mubr.bf16.gmra.mrb[28].mxu0 %v3476_v17 }
 0x40e   : > { %v5450_v19 = vpop.f32.mrb[0].mxu0 }
 0x40f   : > { %v3591_v27 = vadd.f32 %v5450_v19, %v7114_v1  ;;  %v3582_v59 = vpop.f32.mrb[1].mxu0 }
 0x410   : > { %v3583_v24 = vadd.f32 %v7114_v1, %v3582_v59  ;;  %v5451_v15 = vpop.f32.mrb[2].mxu0 }
 0x411   : > { %v3594_v33 = vadd.f32 %v5451_v15, %v7114_v1  ;;  %v3585_v11 = vpop.f32.mrb[3].mxu0  ;;  %v3711_v23 = vmax.f32 %v3591_v27, 0.0 }
 0x412   : > { %v3586_v44 = vadd.f32 %v7114_v1, %v3585_v11  ;;  %v3709_v39 = vmax.f32 %v3583_v24, 0.0 }
 0x413   : > { %v3712_v31 = vmax.f32 %v3594_v33, 0.0 }
 0x414   : > { %v3710_v22 = vmax.f32 %v3586_v44, 0.0 }
 0x415   : > { %v3742_v34 = vpack.c.bf16 %v3712_v31, %v3711_v23 }
 0x416   : > { %v3741_v55 = vpack.c.bf16 %v3710_v22, %v3709_v39 }
 0x418   : > { %5496 = vmatprep.mubr.bf16.mxu1 %v3741_v55 }
 0x419   : > { %5497 = vmatmul.mubr.bf16.vlgmr.msra.gmra.mrb[0].mxu1 %v3742_v34 }
 0x41e   : > { %v5454_v58 = vpop.f32.mrb[4].mxu0 }
 0x41f   : > { %v3607_v46 = vadd.f32 %v5454_v58, %v7114_v1  ;;  %v3598_v29 = vpop.f32.mrb[5].mxu0 }
 0x420   : > { %v3599_v0 = vadd.f32 %v7114_v1, %v3598_v29  ;;  %v5455_v35 = vpop.f32.mrb[6].mxu0 }
 0x421   : > { %v3610_v6 = vadd.f32 %v5455_v35, %v7114_v1  ;;  %v3601_v13 = vpop.f32.mrb[7].mxu0  ;;  %v3715_v61 = vmax.f32 %v3607_v46, 0.0 }
 0x422   : > { %v3602_v37 = vadd.f32 %v7114_v1, %v3601_v13  ;;  %v3713_v57 = vmax.f32 %v3599_v0, 0.0 }
 0x423   : > { %v3716_v47 = vmax.f32 %v3610_v6, 0.0 }
 0x424   : > { %v3714_v28 = vmax.f32 %v3602_v37, 0.0 }
 0x425   : > { %v3744_v21 = vpack.c.bf16 %v3716_v47, %v3715_v61 }
 0x426   : > { %v3743_v54 = vpack.c.bf16 %v3714_v28, %v3713_v57 }
 0x428   : > { %5500 = vmatprep.mubr.bf16.mxu1 %v3743_v54 }
 0x429   : > { %5501 = vmatmul.mubr.bf16.gmra.mrb[4].mxu1 %v3744_v21 }
 0x42e   : > { %v5458_v60 = vpop.f32.mrb[8].mxu0 }
 0x42f   : > { %v3623_v9 = vadd.f32 %v5458_v60, %v7114_v1  ;;  %v3614_v62 = vpop.f32.mrb[9].mxu0 }
 0x430   : > { %v3615_v45 = vadd.f32 %v7114_v1, %v3614_v62  ;;  %v5459_v25 = vpop.f32.mrb[10].mxu0 }
 0x431   : > { %v3626_v56 = vadd.f32 %v5459_v25, %v7114_v1  ;;  %v3617_v36 = vpop.f32.mrb[11].mxu0  ;;  %v3719_v10 = vmax.f32 %v3623_v9, 0.0 }
 0x432   : > { %v3618_v7 = vadd.f32 %v7114_v1, %v3617_v36  ;;  %v3717_v32 = vmax.f32 %v3615_v45, 0.0 }
 0x433   : > { %v3720_v20 = vmax.f32 %v3626_v56, 0.0 }
 0x434   : > { %v3718_v2 = vmax.f32 %v3618_v7, 0.0 }
 0x435   : > { %v3746_v52 = vpack.c.bf16 %v3720_v20, %v3719_v10 }
 0x436   : > { %v3745_v18 = vpack.c.bf16 %v3718_v2, %v3717_v32 }
 0x438   : > { %5504 = vmatprep.mubr.bf16.mxu1 %v3745_v18 }
 0x439   : > { %5505 = vmatmul.mubr.bf16.gmra.mrb[8].mxu1 %v3746_v52 }
 0x43e   : > { %v5462_v16 = vpop.f32.mrb[12].mxu0 }
 0x43f   : > { %v3639_v53 = vadd.f32 %v5462_v16, %v7114_v1  ;;  %v3630_v43 = vpop.f32.mrb[13].mxu0 }
 0x440   : > { %v3631_v50 = vadd.f32 %v7114_v1, %v3630_v43  ;;  %v5463_v12 = vpop.f32.mrb[14].mxu0 }
 0x441   : > { %v3642_v26 = vadd.f32 %v5463_v12, %v7114_v1  ;;  %v3633_v5 = vpop.f32.mrb[15].mxu0  ;;  %v3723_v30 = vmax.f32 %v3639_v53, 0.0 }
 0x442   : > { %v3634_v63 = vadd.f32 %v7114_v1, %v3633_v5  ;;  %v3721_v4 = vmax.f32 %v3631_v50, 0.0 }
 0x443   : > { %v3724_v38 = vmax.f32 %v3642_v26, 0.0 }
 0x444   : > { %v3722_v51 = vmax.f32 %v3634_v63, 0.0  ;;  %v7148_v63 = vld [vmem:[#allocation10 + $0x1] ss:$0 sm:$0xff] }
 0x445   : > { %v3748_v8 = vpack.c.bf16 %v3724_v38, %v3723_v30 }
 0x446   : > { %v3747_v40 = vpack.c.bf16 %v3722_v51, %v3721_v4 }
 0x448   : > { %5508 = vmatprep.mubr.bf16.mxu1 %v3747_v40  ;;  %v7152_v40 = vld [vmem:[#allocation11] ss:$0 sm:$0xff] }
 0x449   : > { %5509 = vmatmul.mubr.bf16.gmra.mrb[12].mxu1 %v3748_v8 }
 0x44e   : > { %v5466_v49 = vpop.f32.mrb[16].mxu0 }
 0x44f   : > { %v3655_v3 = vadd.f32 %v5466_v49, %v7114_v1  ;;  %v3646_v42 = vpop.f32.mrb[17].mxu0 }
 0x450   : > { %v3647_v48 = vadd.f32 %v7114_v1, %v3646_v42  ;;  %v5467_v41 = vpop.f32.mrb[18].mxu0 }
 0x451   : > { %v3658_v14 = vadd.f32 %v5467_v41, %v7114_v1  ;;  %v3649_v17 = vpop.f32.mrb[19].mxu0  ;;  %v3727_v27 = vmax.f32 %v3655_v3, 0.0 }
 0x452   : > { %v3650_v19 = vadd.f32 %v7114_v1, %v3649_v17  ;;  %v3725_v24 = vmax.f32 %v3647_v48, 0.0 }
 0x453   : > { %v3728_v59 = vmax.f32 %v3658_v14, 0.0 }
 0x454   : > { %v3726_v15 = vmax.f32 %v3650_v19, 0.0 }
 0x455   : > { %v3750_v33 = vpack.c.bf16 %v3728_v59, %v3727_v27 }
 0x456   : > { %v3749_v11 = vpack.c.bf16 %v3726_v15, %v3725_v24 }
 0x458   : > { %5512 = vmatprep.mubr.bf16.mxu1 %v3749_v11 }
 0x459   : > { %5513 = vmatmul.mubr.bf16.gmra.mrb[16].mxu1 %v3750_v33 }
 0x45e   : > { %v5470_v44 = vpop.f32.mrb[20].mxu0 }
 0x45f   : > { %v3671_v23 = vadd.f32 %v5470_v44, %v7114_v1  ;;  %v3662_v31 = vpop.f32.mrb[21].mxu0 }
 0x460   : > { %v3663_v39 = vadd.f32 %v7114_v1, %v3662_v31  ;;  %v5471_v22 = vpop.f32.mrb[22].mxu0 }
 0x461   : > { %v3674_v34 = vadd.f32 %v5471_v22, %v7114_v1  ;;  %v3665_v55 = vpop.f32.mrb[23].mxu0  ;;  %v3731_v46 = vmax.f32 %v3671_v23, 0.0 }
 0x462   : > { %v3666_v58 = vadd.f32 %v7114_v1, %v3665_v55  ;;  %v3729_v0 = vmax.f32 %v3663_v39, 0.0 }
 0x463   : > { %v3732_v29 = vmax.f32 %v3674_v34, 0.0 }
 0x464   : > { %v3730_v35 = vmax.f32 %v3666_v58, 0.0 }
 0x465   : > { %v3752_v6 = vpack.c.bf16 %v3732_v29, %v3731_v46 }
 0x466   : > { %v3751_v13 = vpack.c.bf16 %v3730_v35, %v3729_v0 }
 0x468   : > { %5516 = vmatprep.mubr.bf16.mxu1 %v3751_v13 }
 0x469   : > { %5517 = vmatmul.mubr.bf16.gmra.mrb[20].mxu1 %v3752_v6 }
 0x46e   : > { %v5474_v37 = vpop.f32.mrb[24].mxu0 }
 0x46f   : > { %v3687_v61 = vadd.f32 %v5474_v37, %v7114_v1  ;;  %v3678_v47 = vpop.f32.mrb[25].mxu0 }
 0x470   : > { %v3679_v57 = vadd.f32 %v7114_v1, %v3678_v47  ;;  %v5475_v28 = vpop.f32.mrb[26].mxu0 }
 0x471   : > { %v3690_v21 = vadd.f32 %v5475_v28, %v7114_v1  ;;  %v3681_v54 = vpop.f32.mrb[27].mxu0  ;;  %v3735_v9 = vmax.f32 %v3687_v61, 0.0 }
 0x472   : > { %v3682_v60 = vadd.f32 %v7114_v1, %v3681_v54  ;;  %v3733_v45 = vmax.f32 %v3679_v57, 0.0 }
 0x473   : > { %v3736_v62 = vmax.f32 %v3690_v21, 0.0 }
 0x474   : > { %v3734_v25 = vmax.f32 %v3682_v60, 0.0 }
 0x475   : > { %v3754_v56 = vpack.c.bf16 %v3736_v62, %v3735_v9 }
 0x476   : > { %v3753_v36 = vpack.c.bf16 %v3734_v25, %v3733_v45 }
 0x478   : > { %5520 = vmatprep.mubr.bf16.mxu1 %v3753_v36 }
 0x479   : > { %5521 = vmatmul.mubr.bf16.gmra.mrb[24].mxu1 %v3754_v56 }
 0x47e   : > { %v5478_v7 = vpop.f32.mrb[28].mxu0 }
 0x47f   : > { %v3703_v10 = vadd.f32 %v5478_v7, %v7114_v1  ;;  %v3694_v20 = vpop.f32.mrb[29].mxu0 }
 0x480   : > { %v3695_v32 = vadd.f32 %v7114_v1, %v3694_v20  ;;  %v5479_v2 = vpop.f32.mrb[30].mxu0 }
 0x481   : > { %v3706_v52 = vadd.f32 %v5479_v2, %v7114_v1  ;;  %v3697_v18 = vpop.f32.mrb[31].mxu0  ;;  %v3739_v53 = vmax.f32 %v3703_v10, 0.0 }
 0x482   : > { %v3698_v16 = vadd.f32 %v7114_v1, %v3697_v18  ;;  %v3737_v50 = vmax.f32 %v3695_v32, 0.0 }
 0x483   : > { %v3740_v43 = vmax.f32 %v3706_v52, 0.0 }
 0x484   : > { %v3738_v12 = vmax.f32 %v3698_v16, 0.0 }
 0x485   : > { %v3756_v26 = vpack.c.bf16 %v3740_v43, %v3739_v53 }
 0x486   : > { %v3755_v5 = vpack.c.bf16 %v3738_v12, %v3737_v50 }
 0x488   : > { %5524 = vmatprep.mubr.bf16.mxu1 %v3755_v5 }
 0x489   : > { %5525 = vmatmul.mubr.bf16.gmra.mrb[28].mxu1 %v3756_v26 }
 0x4ec   : > { %v5498_v30 = vpop.f32.mrb[0].mxu1 }
 0x4ed   : > { %v3873_v38 = vadd.f32 %v5498_v30, %v7148_v63  ;;  %v3864_v4 = vpop.f32.mrb[1].mxu1 }
 0x4ee   : > { %v3865_v51 = vadd.f32 %v7148_v63, %v3864_v4  ;;  %v5499_v8 = vpop.f32.mrb[2].mxu1 }
 0x4ef   : > { %v3993_v1 = vmax.f32 %v3873_v38, 0.0  ;;  %v3876_v49 = vadd.f32 %v5499_v8, %v7148_v63  ;;  %v3867_v3 = vpop.f32.mrb[3].mxu1 }
 0x4f0   : > { %v3991_v42 = vmax.f32 %v3865_v51, 0.0  ;;  %v3868_v48 = vadd.f32 %v7148_v63, %v3867_v3 }
 0x4f1   : > { %v3994_v41 = vmax.f32 %v3876_v49, 0.0  ;;  %v4032_v14 = vmul.f32 %v7152_v40, %v3993_v1 }
 0x4f2   : > { %v3992_v17 = vmax.f32 %v3868_v48, 0.0  ;;  %v4030_v19 = vmul.f32 %v7152_v40, %v3991_v42 }
 0x4f3   : > { %4066 = vadd.xlane.f32.xlu1 %v4032_v14  ;;  %v4033_v27 = vmul.f32 %v7152_v40, %v3994_v41 }
 0x4f4   : > { %4062 = vadd.xlane.f32.xlu0 %v4030_v19  ;;  %v4031_v59 = vmul.f32 %v7152_v40, %v3992_v17 }
 0x4f7   : > { %4068 = vadd.xlane.f32.xlu1 %v4033_v27 }
 0x4f8   : > { %4064 = vadd.xlane.f32.xlu0 %v4031_v59 }
 0x4fc   : > { %v5502_v24 = vpop.f32.mrb[4].mxu1 }
 0x4fd   : > { %v3889_v15 = vadd.f32 %v5502_v24, %v7148_v63  ;;  %v3880_v33 = vpop.f32.mrb[5].mxu1 }
 0x4fe   : > { %v3881_v11 = vadd.f32 %v7148_v63, %v3880_v33  ;;  %v5503_v44 = vpop.f32.mrb[6].mxu1 }
 0x4ff   : > { %v3997_v23 = vmax.f32 %v3889_v15, 0.0  ;;  %v3892_v31 = vadd.f32 %v5503_v44, %v7148_v63  ;;  %v3883_v39 = vpop.f32.mrb[7].mxu1 }
 0x500   : > { %v3884_v22 = vadd.f32 %v7148_v63, %v3883_v39  ;;  %v3995_v34 = vmax.f32 %v3881_v11, 0.0 }
 0x501   : > { %v3998_v55 = vmax.f32 %v3892_v31, 0.0  ;;  %v4036_v58 = vmul.f32 %v7152_v40, %v3997_v23 }
 0x502   : > { %v3996_v46 = vmax.f32 %v3884_v22, 0.0  ;;  %v4034_v0 = vmul.f32 %v7152_v40, %v3995_v34 }
 0x503   : > { %4074 = vadd.xlane.f32.xlu0 %v4036_v58  ;;  %v4037_v29 = vmul.f32 %v7152_v40, %v3998_v55 }
 0x504   : > { %v4035_v35 = vmul.f32 %v7152_v40, %v3996_v46 }
 0x505   : > { %4076 = vadd.xlane.f32.xlu1 %v4037_v29 }
 0x507   : > { %4070 = vadd.xlane.f32.xlu0 %v4034_v0 }
 0x509   : > { %4072 = vadd.xlane.f32.xlu1 %v4035_v35 }
 0x50c   : > { %v5506_v6 = vpop.f32.mrb[8].mxu1 }
 0x50d   : > { %v3905_v13 = vadd.f32 %v5506_v6, %v7148_v63  ;;  %v3896_v37 = vpop.f32.mrb[9].mxu1 }
 0x50e   : > { %v3897_v61 = vadd.f32 %v7148_v63, %v3896_v37  ;;  %v5507_v47 = vpop.f32.mrb[10].mxu1 }
 0x50f   : > { %v4001_v57 = vmax.f32 %v3905_v13, 0.0  ;;  %v3908_v28 = vadd.f32 %v5507_v47, %v7148_v63  ;;  %v3899_v21 = vpop.f32.mrb[11].mxu1 }
 0x510   : > { %v3900_v54 = vadd.f32 %v7148_v63, %v3899_v21  ;;  %v3999_v60 = vmax.f32 %v3897_v61, 0.0 }
 0x511   : > { %v4002_v9 = vmax.f32 %v3908_v28, 0.0  ;;  %v4040_v62 = vmul.f32 %v7152_v40, %v4001_v57 }
 0x512   : > { %v4000_v45 = vmax.f32 %v3900_v54, 0.0  ;;  %v4038_v56 = vmul.f32 %v7152_v40, %v3999_v60 }
 0x513   : > { %4082 = vadd.xlane.f32.xlu0 %v4040_v62  ;;  %v4041_v25 = vmul.f32 %v7152_v40, %v4002_v9 }
 0x514   : > { %v4039_v36 = vmul.f32 %v7152_v40, %v4000_v45 }
 0x515   : > { %4084 = vadd.xlane.f32.xlu1 %v4041_v25 }
 0x517   : > { %4078 = vadd.xlane.f32.xlu0 %v4038_v56 }
 0x519   : > { %4080 = vadd.xlane.f32.xlu1 %v4039_v36 }
 0x51c   : > { %v5510_v7 = vpop.f32.mrb[12].mxu1 }
 0x51d   : > { %v3921_v10 = vadd.f32 %v5510_v7, %v7148_v63  ;;  %v3912_v20 = vpop.f32.mrb[13].mxu1 }
 0x51e   : > { %v3913_v32 = vadd.f32 %v7148_v63, %v3912_v20  ;;  %v5511_v2 = vpop.f32.mrb[14].mxu1 }
 0x51f   : > { %v4005_v52 = vmax.f32 %v3921_v10, 0.0  ;;  %v3924_v18 = vadd.f32 %v5511_v2, %v7148_v63  ;;  %v3915_v16 = vpop.f32.mrb[15].mxu1 }
 0x520   : > { %v3916_v53 = vadd.f32 %v7148_v63, %v3915_v16  ;;  %v4003_v43 = vmax.f32 %v3913_v32, 0.0 }
 0x521   : > { %v4006_v50 = vmax.f32 %v3924_v18, 0.0  ;;  %v4044_v12 = vmul.f32 %v7152_v40, %v4005_v52 }
 0x522   : > { %v4004_v26 = vmax.f32 %v3916_v53, 0.0  ;;  %v4042_v30 = vmul.f32 %v7152_v40, %v4003_v43 }
 0x523   : > { %4090 = vadd.xlane.f32.xlu0 %v4044_v12  ;;  %v4045_v5 = vmul.f32 %v7152_v40, %v4006_v50 }
 0x524   : > { %v4043_v38 = vmul.f32 %v7152_v40, %v4004_v26 }
 0x525   : > { %4092 = vadd.xlane.f32.xlu1 %v4045_v5 }
 0x527   : > { %4086 = vadd.xlane.f32.xlu0 %v4042_v30 }
 0x529   : > { %4088 = vadd.xlane.f32.xlu1 %v4043_v38 }
 0x52c   : > { %v5514_v4 = vpop.f32.mrb[16].mxu1 }
 0x52d   : > { %v3937_v51 = vadd.f32 %v5514_v4, %v7148_v63  ;;  %v3928_v8 = vpop.f32.mrb[17].mxu1 }
 0x52e   : > { %v3929_v1 = vadd.f32 %v7148_v63, %v3928_v8  ;;  %v5515_v49 = vpop.f32.mrb[18].mxu1 }
 0x52f   : > { %v4009_v3 = vmax.f32 %v3937_v51, 0.0  ;;  %v3940_v42 = vadd.f32 %v5515_v49, %v7148_v63  ;;  %v3931_v48 = vpop.f32.mrb[19].mxu1 }
 0x530   : > { %v3932_v41 = vadd.f32 %v7148_v63, %v3931_v48  ;;  %v4007_v14 = vmax.f32 %v3929_v1, 0.0 }
 0x531   : > { %v4010_v17 = vmax.f32 %v3940_v42, 0.0  ;;  %v4048_v19 = vmul.f32 %v7152_v40, %v4009_v3 }
 0x532   : > { %v4008_v27 = vmax.f32 %v3932_v41, 0.0  ;;  %v4046_v24 = vmul.f32 %v7152_v40, %v4007_v14 }
 0x533   : > { %4098 = vadd.xlane.f32.xlu0 %v4048_v19  ;;  %v4049_v59 = vmul.f32 %v7152_v40, %v4010_v17 }
 0x534   : > { %v4047_v15 = vmul.f32 %v7152_v40, %v4008_v27 }
 0x535   : > { %4100 = vadd.xlane.f32.xlu1 %v4049_v59 }
 0x537   : > { %4094 = vadd.xlane.f32.xlu0 %v4046_v24 }
 0x539   : > { %4096 = vadd.xlane.f32.xlu1 %v4047_v15 }
 0x53c   : > { %v5518_v33 = vpop.f32.mrb[20].mxu1 }
 0x53d   : > { %v3953_v11 = vadd.f32 %v5518_v33, %v7148_v63  ;;  %v3944_v44 = vpop.f32.mrb[21].mxu1 }
 0x53e   : > { %v3945_v23 = vadd.f32 %v7148_v63, %v3944_v44  ;;  %v5519_v31 = vpop.f32.mrb[22].mxu1 }
 0x53f   : > { %v4013_v39 = vmax.f32 %v3953_v11, 0.0  ;;  %v3956_v22 = vadd.f32 %v5519_v31, %v7148_v63  ;;  %v3947_v34 = vpop.f32.mrb[23].mxu1 }
 0x540   : > { %v3948_v55 = vadd.f32 %v7148_v63, %v3947_v34  ;;  %v4011_v58 = vmax.f32 %v3945_v23, 0.0 }
 0x541   : > { %v4014_v46 = vmax.f32 %v3956_v22, 0.0  ;;  %v4052_v29 = vmul.f32 %v7152_v40, %v4013_v39 }
 0x542   : > { %v4012_v0 = vmax.f32 %v3948_v55, 0.0  ;;  %v4050_v6 = vmul.f32 %v7152_v40, %v4011_v58 }
 0x543   : > { %4106 = vadd.xlane.f32.xlu0 %v4052_v29  ;;  %v4053_v35 = vmul.f32 %v7152_v40, %v4014_v46 }
 0x544   : > { %v4051_v13 = vmul.f32 %v7152_v40, %v4012_v0 }
 0x545   : > { %4108 = vadd.xlane.f32.xlu1 %v4053_v35 }
 0x547   : > { %4102 = vadd.xlane.f32.xlu0 %v4050_v6 }
 0x549   : > { %4104 = vadd.xlane.f32.xlu1 %v4051_v13 }
 0x54c   : > { %v5522_v37 = vpop.f32.mrb[24].mxu1 }
 0x54d   : > { %v3969_v61 = vadd.f32 %v5522_v37, %v7148_v63  ;;  %v3960_v47 = vpop.f32.mrb[25].mxu1 }
 0x54e   : > { %v3961_v57 = vadd.f32 %v7148_v63, %v3960_v47  ;;  %v5523_v28 = vpop.f32.mrb[26].mxu1 }
 0x54f   : > { %v4017_v21 = vmax.f32 %v3969_v61, 0.0  ;;  %v3972_v54 = vadd.f32 %v5523_v28, %v7148_v63  ;;  %v3963_v60 = vpop.f32.mrb[27].mxu1 }
 0x550   : > { %v3964_v9 = vadd.f32 %v7148_v63, %v3963_v60  ;;  %v4015_v62 = vmax.f32 %v3961_v57, 0.0 }
 0x551   : > { %v4018_v45 = vmax.f32 %v3972_v54, 0.0  ;;  %v4056_v25 = vmul.f32 %v7152_v40, %v4017_v21 }
 0x552   : > { %v4016_v56 = vmax.f32 %v3964_v9, 0.0  ;;  %v4054_v7 = vmul.f32 %v7152_v40, %v4015_v62 }
 0x553   : > { %4114 = vadd.xlane.f32.xlu0 %v4056_v25  ;;  %v4057_v36 = vmul.f32 %v7152_v40, %v4018_v45 }
 0x554   : > { %v4055_v10 = vmul.f32 %v7152_v40, %v4016_v56 }
 0x555   : > { %4116 = vadd.xlane.f32.xlu1 %v4057_v36 }
 0x557   : > { %4110 = vadd.xlane.f32.xlu0 %v4054_v7 }
 0x559   : > { %4112 = vadd.xlane.f32.xlu1 %v4055_v10 }
 0x55c   : > { %v5526_v20 = vpop.f32.mrb[28].mxu1 }
 0x55d   : > { %v3976_v32 = vpop.f32.mrb[29].mxu1  ;;  %v3985_v2 = vadd.f32 %v5526_v20, %v7148_v63 }
 0x55e   : > { %v3977_v52 = vadd.f32 %v7148_v63, %v3976_v32  ;;  %v5527_v18 = vpop.f32.mrb[30].mxu1 }
 0x55f   : > { %v3979_v16 = vpop.f32.mrb[31].mxu1  ;;  %v3988_v43 = vadd.f32 %v5527_v18, %v7148_v63  ;;  %v4021_v12 = vmax.f32 %v3985_v2, 0.0 }
 0x560   : > { %v4019_v53 = vmax.f32 %v3977_v52, 0.0  ;;  %v3980_v50 = vadd.f32 %v7148_v63, %v3979_v16  ;;  %v7218_v63 = vld [vmem:[#allocation2] ss:$0 sm:$0xff] }
 0x561   : > { %v4022_v30 = vmax.f32 %v3988_v43, 0.0  ;;  %v4060_v4 = vmul.f32 %v7152_v40, %v4021_v12 }
 0x562   : > { %v4020_v26 = vmax.f32 %v3980_v50, 0.0  ;;  %v4058_v5 = vmul.f32 %v7152_v40, %v4019_v53 }
 0x563   : > { %v4061_v51 = vmul.f32 %v7152_v40, %v4022_v30 }
 0x564   : > { %4118 = vadd.xlane.f32.xlu0 %v4058_v5  ;;  %v4059_v38 = vmul.f32 %v7152_v40, %v4020_v26 }
 0x566   : > { %4120 = vadd.xlane.f32.xlu1 %v4059_v38 }
 0x568   : > { %4122 = vadd.xlane.f32.xlu0 %v4060_v4 }
 0x56a   : > { %4124 = vadd.xlane.f32.xlu1 %v4061_v51 }
 0x580   : > { %v4067_v40 = vpop.xlane.xlu1 %4066 }
 0x581   : > { %v4135_v8 = vadd.f32 %v7218_v63, %v4067_v40  ;;  %v4063_v1 = vpop.xlane.xlu0 %4062 }
 0x582   : > { %v4133_v49 = vadd.f32 %v7218_v63, %v4063_v1 }
 0x583   : > { %4168 = vst.msk [vmem:[%s7223_s19 + $0x10] sm:$0xff] %vm4165_vm0, %v4135_v8 }
 0x584   : > { %4166 = vst.msk [vmem:[%s7223_s19] sm:$0xff] %vm4165_vm0, %v4133_v49  ;;  %v4069_v3 = vpop.xlane.xlu1 %4068 }
 0x585   : > { %v4136_v42 = vadd.f32 %v7218_v63, %v4069_v3  ;;  %v4065_v48 = vpop.xlane.xlu0 %4064 }
 0x586   : > { %v4134_v41 = vadd.f32 %v7218_v63, %v4065_v48 }
 0x587   : > { %4169 = vst.msk [vmem:[%s7223_s19 + $0x18] sm:$0xff] %vm4165_vm0, %v4136_v42 }
 0x588   : > { %4167 = vst.msk [vmem:[%s7223_s19 + $0x8] sm:$0xff] %vm4165_vm0, %v4134_v41 }
 0x590   : > { %v4075_v14 = vpop.xlane.xlu0 %4074 }
 0x591   : > { %v4139_v17 = vadd.f32 %v7218_v63, %v4075_v14 }
 0x592   : > { %v4077_v19 = vpop.xlane.xlu1 %4076 }
 0x593   : > { %4172 = vst.msk [vmem:[%s7223_s19 + $0x30] sm:$0xff] %vm4165_vm0, %v4139_v17  ;;  %v4140_v27 = vadd.f32 %v7218_v63, %v4077_v19 }
 0x594   : > { %v4071_v59 = vpop.xlane.xlu0 %4070 }
 0x595   : > { %4173 = vst.msk [vmem:[%s7223_s19 + $0x38] sm:$0xff] %vm4165_vm0, %v4140_v27  ;;  %v4137_v24 = vadd.f32 %v7218_v63, %v4071_v59 }
 0x596   : > { %v4073_v15 = vpop.xlane.xlu1 %4072 }
 0x597   : > { %4170 = vst.msk [vmem:[%s7223_s19 + $0x20] sm:$0xff] %vm4165_vm0, %v4137_v24  ;;  %v4138_v33 = vadd.f32 %v7218_v63, %v4073_v15 }
 0x599   : > { %4171 = vst.msk [vmem:[%s7223_s19 + $0x28] sm:$0xff] %vm4165_vm0, %v4138_v33 }
 0x5a0   : > { %v4083_v11 = vpop.xlane.xlu0 %4082 }
 0x5a1   : > { %v4143_v44 = vadd.f32 %v7218_v63, %v4083_v11 }
 0x5a2   : > { %v4085_v23 = vpop.xlane.xlu1 %4084 }
 0x5a3   : > { %4176 = vst.msk [vmem:[%s7223_s19 + $0x50] sm:$0xff] %vm4165_vm0, %v4143_v44  ;;  %v4144_v31 = vadd.f32 %v7218_v63, %v4085_v23 }
 0x5a4   : > { %v4079_v39 = vpop.xlane.xlu0 %4078 }
 0x5a5   : > { %4177 = vst.msk [vmem:[%s7223_s19 + $0x58] sm:$0xff] %vm4165_vm0, %v4144_v31  ;;  %v4141_v22 = vadd.f32 %v7218_v63, %v4079_v39 }
 0x5a6   : > { %v4081_v34 = vpop.xlane.xlu1 %4080 }
 0x5a7   : > { %4174 = vst.msk [vmem:[%s7223_s19 + $0x40] sm:$0xff] %vm4165_vm0, %v4141_v22  ;;  %v4142_v55 = vadd.f32 %v7218_v63, %v4081_v34 }
 0x5a9   : > { %4175 = vst.msk [vmem:[%s7223_s19 + $0x48] sm:$0xff] %vm4165_vm0, %v4142_v55 }
 0x5b0   : > { %v4091_v58 = vpop.xlane.xlu0 %4090 }
 0x5b1   : > { %v4147_v46 = vadd.f32 %v7218_v63, %v4091_v58 }
 0x5b2   : > { %v4093_v29 = vpop.xlane.xlu1 %4092 }
 0x5b3   : > { %4180 = vst.msk [vmem:[%s7223_s19 + $0x70] sm:$0xff] %vm4165_vm0, %v4147_v46  ;;  %v4148_v0 = vadd.f32 %v7218_v63, %v4093_v29 }
 0x5b4   : > { %v4087_v35 = vpop.xlane.xlu0 %4086 }
 0x5b5   : > { %4181 = vst.msk [vmem:[%s7223_s19 + $0x78] sm:$0xff] %vm4165_vm0, %v4148_v0  ;;  %v4145_v6 = vadd.f32 %v7218_v63, %v4087_v35 }
 0x5b6   : > { %v4089_v13 = vpop.xlane.xlu1 %4088 }
 0x5b7   : > { %4178 = vst.msk [vmem:[%s7223_s19 + $0x60] sm:$0xff] %vm4165_vm0, %v4145_v6  ;;  %v4146_v37 = vadd.f32 %v7218_v63, %v4089_v13 }
 0x5b9   : > { %4179 = vst.msk [vmem:[%s7223_s19 + $0x68] sm:$0xff] %vm4165_vm0, %v4146_v37 }
 0x5c0   : > { %v4099_v61 = vpop.xlane.xlu0 %4098 }
 0x5c1   : > { %v4151_v47 = vadd.f32 %v7218_v63, %v4099_v61 }
 0x5c2   : > { %v4101_v57 = vpop.xlane.xlu1 %4100 }
 0x5c3   : > { %4184 = vst.msk [vmem:[%s7223_s19 + $0x90] sm:$0xff] %vm4165_vm0, %v4151_v47  ;;  %v4152_v28 = vadd.f32 %v7218_v63, %v4101_v57 }
 0x5c4   : > { %v4095_v21 = vpop.xlane.xlu0 %4094 }
 0x5c5   : > { %4185 = vst.msk [vmem:[%s7223_s19 + $0x98] sm:$0xff] %vm4165_vm0, %v4152_v28  ;;  %v4149_v54 = vadd.f32 %v7218_v63, %v4095_v21 }
 0x5c6   : > { %v4097_v60 = vpop.xlane.xlu1 %4096 }
 0x5c7   : > { %4182 = vst.msk [vmem:[%s7223_s19 + $0x80] sm:$0xff] %vm4165_vm0, %v4149_v54  ;;  %v4150_v9 = vadd.f32 %v7218_v63, %v4097_v60 }
 0x5c9   : > { %4183 = vst.msk [vmem:[%s7223_s19 + $0x88] sm:$0xff] %vm4165_vm0, %v4150_v9 }
 0x5d0   : > { %v4107_v62 = vpop.xlane.xlu0 %4106 }
 0x5d1   : > { %v4155_v45 = vadd.f32 %v7218_v63, %v4107_v62 }
 0x5d2   : > { %v4109_v25 = vpop.xlane.xlu1 %4108 }
 0x5d3   : > { %4188 = vst.msk [vmem:[%s7223_s19 + $0xb0] sm:$0xff] %vm4165_vm0, %v4155_v45  ;;  %v4156_v56 = vadd.f32 %v7218_v63, %v4109_v25 }
 0x5d4   : > { %v4103_v36 = vpop.xlane.xlu0 %4102 }
 0x5d5   : > { %4189 = vst.msk [vmem:[%s7223_s19 + $0xb8] sm:$0xff] %vm4165_vm0, %v4156_v56  ;;  %v4153_v7 = vadd.f32 %v7218_v63, %v4103_v36 }
 0x5d6   : > { %v4105_v10 = vpop.xlane.xlu1 %4104 }
 0x5d7   : > { %4186 = vst.msk [vmem:[%s7223_s19 + $0xa0] sm:$0xff] %vm4165_vm0, %v4153_v7  ;;  %v4154_v20 = vadd.f32 %v7218_v63, %v4105_v10 }
 0x5d9   : > { %4187 = vst.msk [vmem:[%s7223_s19 + $0xa8] sm:$0xff] %vm4165_vm0, %v4154_v20 }
 0x5e0   : > { %v4115_v32 = vpop.xlane.xlu0 %4114 }
 0x5e1   : > { %v4159_v2 = vadd.f32 %v7218_v63, %v4115_v32 }
 0x5e2   : > { %v4117_v52 = vpop.xlane.xlu1 %4116 }
 0x5e3   : > { %4192 = vst.msk [vmem:[%s7223_s19 + $0xd0] sm:$0xff] %vm4165_vm0, %v4159_v2  ;;  %v4160_v18 = vadd.f32 %v7218_v63, %v4117_v52 }
 0x5e4   : > { %v4111_v16 = vpop.xlane.xlu0 %4110 }
 0x5e5   : > { %4193 = vst.msk [vmem:[%s7223_s19 + $0xd8] sm:$0xff] %vm4165_vm0, %v4160_v18  ;;  %v4157_v53 = vadd.f32 %v7218_v63, %v4111_v16 }
 0x5e6   : > { %v4113_v43 = vpop.xlane.xlu1 %4112 }
 0x5e7   : > { %4190 = vst.msk [vmem:[%s7223_s19 + $0xc0] sm:$0xff] %vm4165_vm0, %v4157_v53  ;;  %v4158_v50 = vadd.f32 %v7218_v63, %v4113_v43 }
 0x5e9   : > { %4191 = vst.msk [vmem:[%s7223_s19 + $0xc8] sm:$0xff] %vm4165_vm0, %v4158_v50 }
 0x5f1   : > { %v4119_v12 = vpop.xlane.xlu0 %4118 }
 0x5f2   : > { %v4161_v26 = vadd.f32 %v7218_v63, %v4119_v12 }
 0x5f3   : > { %v4121_v5 = vpop.xlane.xlu1 %4120 }
 0x5f4   : > { %4194 = vst.msk [vmem:[%s7223_s19 + $0xe0] sm:$0xff] %vm4165_vm0, %v4161_v26  ;;  %v4162_v30 = vadd.f32 %v7218_v63, %v4121_v5 }
 0x5f5   : > { %v4123_v38 = vpop.xlane.xlu0 %4122 }
 0x5f6   : > { %4195 = vst.msk [vmem:[%s7223_s19 + $0xe8] sm:$0xff] %vm4165_vm0, %v4162_v30  ;;  %v4163_v4 = vadd.f32 %v7218_v63, %v4123_v38 }
 0x5f7   : > { %v4125_v51 = vpop.xlane.xlu1 %4124 }
 0x5f8   : > { %4196 = vst.msk [vmem:[%s7223_s19 + $0xf0] sm:$0xff] %vm4165_vm0, %v4163_v4  ;;  %v4164_v40 = vadd.f32 %v7218_v63, %v4125_v51 }
 0x5fa   : > { %4197 = vst.msk [vmem:[%s7223_s19 + $0xf8] sm:$0xff] %vm4165_vm0, %v4164_v40 }
 0x5fb PF: > { %p22_p5 = scmp.ge.s32.totalorder %s6202_s21, 4   ;;  %s7354_s26 = smov %s5977_s27 }
 0x5fc   : > { %s7355_s27 = smov %s5981_s28  ;;  %s7356_s28 = smov %s6213_s6 }
 0x5fd   : > { %s7357_s29 = smov %s6202_s21  ;;  %24 = sbr.rel (!%p22_p5) target bundleno = 9 (0x9), region = 110 }
 0x604   :  { %4220 = vsyncpa [#allocation4], 1 }
 0x605   :  { %4222 = vsyncpa [#allocation4 + $0x1], 1 }
 0x606   :  { %4223 = vsyncpa [#allocation6], 1 }
 0x607   :  { %4224 = vsyncpa [#allocation9], 1 }
 0x608   :  { %4225 = vsyncpa [#allocation12], 1 }

</bundles_post_ra>
